<compile_context>
chip_gen: v7x
topology: tpu7x:2x2x1
jax: 0.10.0
libtpu: 0.0.40
codegen_flags: <defaults>
</compile_context>

<pallas_src>
import math

import jax
import jax.numpy as jnp
from jax.experimental import pallas as pl
from jax.experimental.pallas import tpu as pltpu

# Small, deterministic problem sizes consistent with the module's __init__.
B, S, E, H, FF, L, VOCAB = 2, 8, 32, 4, 64, 2, 32
DH = E // H
BS = B * S
VOCAB_PAD = 128           # lane-dense output width (multiple of 128 lanes)
PAD_ID = 0
NEG = jnp.float32(-1e30)  # additive mask value (same effect as -inf given >=1 valid key)
LN_EPS = 1e-5


def sinusoidal_pe(seq_len, dim):
    pos = jnp.arange(seq_len, dtype=jnp.float32)[:, None]
    i = jnp.arange(dim // 2, dtype=jnp.float32)[None, :]
    angle = pos / jnp.power(10000.0, (2.0 * i) / dim)
    # interleave: sin at even indices, cos at odd indices
    return jnp.stack([jnp.sin(angle), jnp.cos(angle)], axis=-1).reshape(seq_len, dim)


# ----------------------------------------------------------------------------
# Pallas kernel: whole decoder stack + vocab head in a single invocation.
# Batch is folded into the sublane (row) axis of a (B*S, E) slab.
# ----------------------------------------------------------------------------
def decoder_kernel(x_ref, smask_ref, cmask_ref,
                   sa_w_ref, sa_b_ref, sa_ow_ref, sa_ob_ref,
                   ca_w_ref, ca_b_ref, ca_ow_ref, ca_ob_ref,
                   ff_w1_ref, ff_b1_ref, ff_w2_ref, ff_b2_ref,
                   n1g_ref, n1b_ref, n2g_ref, n2b_ref, n3g_ref, n3b_ref,
                   hw_ref, hb_ref, out_ref):
    x = x_ref[...]                  # (BS, E) slab
    mem = x                         # memory = positional-encoded embeddings (same tensor)
    smask = smask_ref[...]          # (BS, BS) causal + key-padding + batch-block mask
    cmask = cmask_ref[...]          # (BS, BS) batch-block mask only (cross-attn)

    sa_b = sa_b_ref[...]; sa_ob = sa_ob_ref[...]
    ca_b = ca_b_ref[...]; ca_ob = ca_ob_ref[...]
    ff_b1 = ff_b1_ref[...]; ff_b2 = ff_b2_ref[...]
    n1g = n1g_ref[...]; n1b = n1b_ref[...]
    n2g = n2g_ref[...]; n2b = n2b_ref[...]
    n3g = n3g_ref[...]; n3b = n3b_ref[...]

    scale = 1.0 / math.sqrt(DH)

    def layer_norm(v, g, b):
        mu = jnp.mean(v, axis=-1, keepdims=True)
        var = jnp.mean((v - mu) ** 2, axis=-1, keepdims=True)
        return (v - mu) * jax.lax.rsqrt(var + LN_EPS) * g + b

    def attention(q, k, v, w_out, b_out, add_mask):
        # Per-head accumulated out-projection: no lane-wise head concat.
        acc = jnp.zeros((BS, E), jnp.float32)
        for h in range(H):                        # static unroll over heads
            lo = h * DH
            qh = q[:, lo:lo + DH]
            kh = k[:, lo:lo + DH]
            vh = v[:, lo:lo + DH]
            s = jax.lax.dot_general(qh, kh, (((1,), (1,)), ((), ())),
                                    preferred_element_type=jnp.float32) * scale
            s = s + add_mask
            s = s - jnp.max(s, axis=-1, keepdims=True)
            p = jnp.exp(s)
            p = p * pl.reciprocal(jnp.sum(p, axis=-1, keepdims=True), approx=True)
            oh = jnp.dot(p, vh, preferred_element_type=jnp.float32)         # (BS, DH)
            acc = acc + jnp.dot(oh, w_out[lo:lo + DH, :],
                                preferred_element_type=jnp.float32)
        return acc + b_out

    for l in range(L):                            # static unroll over decoder layers
        # --- self-attention block (fused QKV: one MXU push; post-norm; dropout=identity) ---
        qkv = jnp.dot(x, sa_w_ref[l], preferred_element_type=jnp.float32) + sa_b[l:l + 1, :]
        sa = attention(qkv[:, 0:E], qkv[:, E:2 * E], qkv[:, 2 * E:3 * E],
                       sa_ow_ref[l], sa_ob[l:l + 1, :], smask)
        x = layer_norm(x + sa, n1g[l:l + 1, :], n1b[l:l + 1, :])

        # --- cross-attention against memory (q from x, fused kv from mem; batch-block mask) ---
        ca_w = ca_w_ref[l]
        q = jnp.dot(x, ca_w[:, 0:E], preferred_element_type=jnp.float32) + ca_b[l:l + 1, 0:E]
        kv = jnp.dot(mem, ca_w[:, E:3 * E], preferred_element_type=jnp.float32) + ca_b[l:l + 1, E:3 * E]
        ca = attention(q, kv[:, 0:E], kv[:, E:2 * E],
                       ca_ow_ref[l], ca_ob[l:l + 1, :], cmask)
        x = layer_norm(x + ca, n2g[l:l + 1, :], n2b[l:l + 1, :])

        # --- feed-forward block (ReLU) ---
        h1 = jnp.maximum(
            jnp.dot(x, ff_w1_ref[l], preferred_element_type=jnp.float32) + ff_b1[l:l + 1, :], 0.0)
        h2 = jnp.dot(h1, ff_w2_ref[l], preferred_element_type=jnp.float32) + ff_b2[l:l + 1, :]
        x = layer_norm(x + h2, n3g[l:l + 1, :], n3b[l:l + 1, :])

    # Lane-dense vocab projection (padded to 128 lanes) -> unmasked full-lane stores.
    out_ref[...] = (jnp.dot(x, hw_ref[...], preferred_element_type=jnp.float32)
                    + hb_ref[...]).astype(out_ref.dtype)


# ----------------------------------------------------------------------------
# Wrapper (glue: embedding gather, PE, mask construction, pallas_call).
# ----------------------------------------------------------------------------
@jax.jit
def outline_transformer_forward(token_ids, p):
    x = (p['embedding'][token_ids] + sinusoidal_pe(S, E)[None]).astype(jnp.float32)  # (B,S,E)
    x_flat = x.reshape(BS, E)

    # Per-batch additive self-attention mask: causal + key padding (pad keys masked).
    causal = jnp.where(jnp.arange(S)[None, :] > jnp.arange(S)[:, None], NEG, 0.0)
    kpm = jnp.where(token_ids == PAD_ID, NEG, 0.0)                             # (B, S)
    per_batch = (causal[None, :, :] + kpm[:, None, :]).astype(jnp.float32)     # (B, S, S)

    # Block-diagonal masks over the folded (B*S) axis: queries of batch b may only
    # attend to keys of batch b.  Self mask additionally carries causal + padding.
    same_b = jnp.eye(B, dtype=bool)[:, None, :, None]                          # (B,1,B,1)
    smask = jnp.where(same_b, per_batch[:, :, None, :], NEG).reshape(BS, BS)
    bid = jnp.repeat(jnp.arange(B), S)
    cmask = jnp.where(bid[:, None] == bid[None, :], 0.0, NEG).astype(jnp.float32)

    # Pad the vocab head to 128 lanes (lane-dense output block).
    hw = jnp.pad(p['head_w'], ((0, 0), (0, VOCAB_PAD - VOCAB)))
    hb = jnp.pad(p['head_b'], ((0, 0), (0, VOCAB_PAD - VOCAB)))

    m2 = lambda i: (0, 0)
    m3 = lambda i: (0, 0, 0)

    in_specs = [
        pl.BlockSpec((BS, E), m2),               # activation slab (tgt == memory)
        pl.BlockSpec((BS, BS), m2),              # self-attn additive mask
        pl.BlockSpec((BS, BS), m2),              # cross-attn additive mask
        pl.BlockSpec((L, E, 3 * E), m3), pl.BlockSpec((L, 3 * E), m2),   # self-attn in-proj
        pl.BlockSpec((L, E, E), m3),     pl.BlockSpec((L, E), m2),       # self-attn out-proj
        pl.BlockSpec((L, E, 3 * E), m3), pl.BlockSpec((L, 3 * E), m2),   # cross-attn in-proj
        pl.BlockSpec((L, E, E), m3),     pl.BlockSpec((L, E), m2),       # cross-attn out-proj
        pl.BlockSpec((L, E, FF), m3),    pl.BlockSpec((L, FF), m2),      # ffn linear1
        pl.BlockSpec((L, FF, E), m3),    pl.BlockSpec((L, E), m2),       # ffn linear2
        pl.BlockSpec((L, E), m2), pl.BlockSpec((L, E), m2),              # norm1
        pl.BlockSpec((L, E), m2), pl.BlockSpec((L, E), m2),              # norm2
        pl.BlockSpec((L, E), m2), pl.BlockSpec((L, E), m2),              # norm3
        pl.BlockSpec((E, VOCAB_PAD), m2), pl.BlockSpec((1, VOCAB_PAD), m2),  # vocab head (padded)
    ]
    out_spec = pl.BlockSpec((BS, VOCAB_PAD), m2)

    operands = (x_flat, smask, cmask,
                p['sa_w'], p['sa_b'], p['sa_ow'], p['sa_ob'],
                p['ca_w'], p['ca_b'], p['ca_ow'], p['ca_ob'],
                p['ff_w1'], p['ff_b1'], p['ff_w2'], p['ff_b2'],
                p['n1g'], p['n1b'], p['n2g'], p['n2b'], p['n3g'], p['n3b'],
                hw, hb)

    # Advisory cost estimate so XLA schedules the surrounding glue sensibly.
    flops = (L * (2 * BS * E * (3 * E + E + E + 2 * E + E + 2 * FF)
                  + 2 * 2 * 2 * BS * BS * E)
             + 2 * BS * E * VOCAB_PAD)
    transcendentals = L * 2 * H * BS * BS + L * 3 * BS
    bytes_accessed = 4 * (sum(int(o.size) for o in operands) + BS * VOCAB_PAD)

    logits_padded = pl.pallas_call(
        decoder_kernel,
        out_shape=jax.ShapeDtypeStruct((BS, VOCAB_PAD), jnp.float32),
        grid_spec=pltpu.PrefetchScalarGridSpec(
            num_scalar_prefetch=0, grid=(1,),
            in_specs=in_specs, out_specs=out_spec),
        compiler_params=pltpu.CompilerParams(dimension_semantics=("arbitrary",)),
        cost_estimate=pl.CostEstimate(flops=flops,
                                      transcendentals=transcendentals,
                                      bytes_accessed=bytes_accessed),
    )(*operands)

    # output.reshape(-1, vocab_size)
    return logits_padded[:, :VOCAB]


# ----------------------------------------------------------------------------
# Pure-JAX reference (same math, batched) for correctness checking.
# ----------------------------------------------------------------------------
def ref_forward(token_ids, p):
    x = (p['embedding'][token_ids] + sinusoidal_pe(S, E)[None]).astype(jnp.float32)
    mem = x
    causal = jnp.where(jnp.arange(S)[None, :] > jnp.arange(S)[:, None], NEG, 0.0)
    kpm = jnp.where(token_ids == PAD_ID, NEG, 0.0)
    mask = causal[None] + kpm[:, None, :]

    def layer_norm(v, g, b):
        mu = jnp.mean(v, axis=-1, keepdims=True)
        var = jnp.mean((v - mu) ** 2, axis=-1, keepdims=True)
        return (v - mu) * jax.lax.rsqrt(var + LN_EPS) * g + b

    def mha(xq, xkv, w_in, b_in, w_out, b_out, m):
        q = jnp.einsum('bse,ef->bsf', xq, w_in[:, :E]) + b_in[:E]
        k = jnp.einsum('bse,ef->bsf', xkv, w_in[:, E:2 * E]) + b_in[E:2 * E]
        v = jnp.einsum('bse,ef->bsf', xkv, w_in[:, 2 * E:]) + b_in[2 * E:]
        q = q.reshape(B, S, H, DH).transpose(0, 2, 1, 3)
        k = k.reshape(B, S, H, DH).transpose(0, 2, 1, 3)
        v = v.reshape(B, S, H, DH).transpose(0, 2, 1, 3)
        s = jnp.einsum('bhqd,bhkd->bhqk', q, k) / math.sqrt(DH)
        if m is not None:
            s = s + m[:, None]
        a = jax.nn.softmax(s, axis=-1)
        o = jnp.einsum('bhqk,bhkd->bhqd', a, v).transpose(0, 2, 1, 3).reshape(B, S, E)
        return jnp.einsum('bse,ef->bsf', o, w_out) + b_out

    for l in range(L):
        x = layer_norm(x + mha(x, x, p['sa_w'][l], p['sa_b'][l],
                               p['sa_ow'][l], p['sa_ob'][l], mask),
                       p['n1g'][l], p['n1b'][l])
        x = layer_norm(x + mha(x, mem, p['ca_w'][l], p['ca_b'][l],
                               p['ca_ow'][l], p['ca_ob'][l], None),
                       p['n2g'][l], p['n2b'][l])
        h = jnp.maximum(jnp.einsum('bse,ef->bsf', x, p['ff_w1'][l]) + p['ff_b1'][l], 0.0)
        h = jnp.einsum('bsf,fe->bse', h, p['ff_w2'][l]) + p['ff_b2'][l]
        x = layer_norm(x + h, p['n3g'][l], p['n3b'][l])

    logits = jnp.einsum('bse,ev->bsv', x, p['head_w']) + p['head_b'][0]
    return logits.reshape(-1, VOCAB)


def init_params(key):
    keys = jax.random.split(key, 16)

    def nrm(k, shape, scale=0.05):
        return (scale * jax.random.normal(k, shape)).astype(jnp.float32)

    return dict(
        embedding=nrm(keys[0], (VOCAB, E), 1.0),
        sa_w=nrm(keys[1], (L, E, 3 * E)), sa_b=nrm(keys[2], (L, 3 * E)),
        sa_ow=nrm(keys[3], (L, E, E)),    sa_ob=nrm(keys[4], (L, E)),
        ca_w=nrm(keys[5], (L, E, 3 * E)), ca_b=nrm(keys[6], (L, 3 * E)),
        ca_ow=nrm(keys[7], (L, E, E)),    ca_ob=nrm(keys[8], (L, E)),
        ff_w1=nrm(keys[9], (L, E, FF)),   ff_b1=nrm(keys[10], (L, FF)),
        ff_w2=nrm(keys[11], (L, FF, E)),  ff_b2=nrm(keys[12], (L, E)),
        n1g=jnp.ones((L, E), jnp.float32), n1b=jnp.zeros((L, E), jnp.float32),
        n2g=jnp.ones((L, E), jnp.float32), n2b=jnp.zeros((L, E), jnp.float32),
        n3g=jnp.ones((L, E), jnp.float32), n3b=jnp.zeros((L, E), jnp.float32),
        head_w=nrm(keys[13], (E, VOCAB)), head_b=nrm(keys[14], (1, VOCAB)),
    )


if __name__ == "__main__":
    key = jax.random.PRNGKey(0)
    pkey, ikey = jax.random.split(key)
    params = init_params(pkey)

    # deterministic "already tokenized" prompt indices; trailing pads on row 1
    token_ids = jax.random.randint(ikey, (B, S), 1, VOCAB, dtype=jnp.int32)
    token_ids = token_ids.at[1, -3:].set(PAD_ID)

    out = jax.block_until_ready(outline_transformer_forward(token_ids, params))
    ref = jax.block_until_ready(ref_forward(token_ids, params))

    assert out.shape == (B * S, VOCAB), out.shape
    assert bool(jnp.all(jnp.isfinite(out)))
    max_err = float(jnp.max(jnp.abs(out - ref)))
    assert max_err < 5e-2, f"mismatch vs reference: {max_err}"
    print("KERNEL_OK")
</pallas_src>

<mosaic_0001>
module attributes {stable_mosaic.version = 11 : i64} {
  func.func @decoder_kernel(%arg0: i32, %arg1: memref<16x32xf32, #tpu.memory_space<vmem>>, %arg2: memref<16x16xf32, #tpu.memory_space<vmem>>, %arg3: memref<16x16xf32, #tpu.memory_space<vmem>>, %arg4: memref<2x32x96xf32, #tpu.memory_space<vmem>>, %arg5: memref<2x96xf32, #tpu.memory_space<vmem>>, %arg6: memref<2x32x32xf32, #tpu.memory_space<vmem>>, %arg7: memref<2x32xf32, #tpu.memory_space<vmem>>, %arg8: memref<2x32x96xf32, #tpu.memory_space<vmem>>, %arg9: memref<2x96xf32, #tpu.memory_space<vmem>>, %arg10: memref<2x32x32xf32, #tpu.memory_space<vmem>>, %arg11: memref<2x32xf32, #tpu.memory_space<vmem>>, %arg12: memref<2x32x64xf32, #tpu.memory_space<vmem>>, %arg13: memref<2x64xf32, #tpu.memory_space<vmem>>, %arg14: memref<2x64x32xf32, #tpu.memory_space<vmem>>, %arg15: memref<2x32xf32, #tpu.memory_space<vmem>>, %arg16: memref<2x32xf32, #tpu.memory_space<vmem>>, %arg17: memref<2x32xf32, #tpu.memory_space<vmem>>, %arg18: memref<2x32xf32, #tpu.memory_space<vmem>>, %arg19: memref<2x32xf32, #tpu.memory_space<vmem>>, %arg20: memref<2x32xf32, #tpu.memory_space<vmem>>, %arg21: memref<2x32xf32, #tpu.memory_space<vmem>>, %arg22: memref<32x128xf32, #tpu.memory_space<vmem>>, %arg23: memref<1x128xf32, #tpu.memory_space<vmem>>, %arg24: memref<16x128xf32, #tpu.memory_space<vmem>>) attributes {dimension_semantics = [#tpu.dimension_semantics<arbitrary>], iteration_bounds = array<i64: 1>, scalar_prefetch = 0 : i64, scratch_operands = 0 : i64, tpu.core_type = #tpu.core_type<tc>, window_params = [{pipeline_mode = #tpu.pipeline_mode<synchronous>, transform_indices = @transform_0, window_bounds = array<i64: 16, 32>}, {pipeline_mode = #tpu.pipeline_mode<synchronous>, transform_indices = @transform_1, window_bounds = array<i64: 16, 16>}, {pipeline_mode = #tpu.pipeline_mode<synchronous>, transform_indices = @transform_2, window_bounds = array<i64: 16, 16>}, {pipeline_mode = #tpu.pipeline_mode<synchronous>, transform_indices = @transform_3, window_bounds = array<i64: 2, 32, 96>}, {pipeline_mode = #tpu.pipeline_mode<synchronous>, transform_indices = @transform_4, window_bounds = array<i64: 2, 96>}, {pipeline_mode = #tpu.pipeline_mode<synchronous>, transform_indices = @transform_5, window_bounds = array<i64: 2, 32, 32>}, {pipeline_mode = #tpu.pipeline_mode<synchronous>, transform_indices = @transform_6, window_bounds = array<i64: 2, 32>}, {pipeline_mode = #tpu.pipeline_mode<synchronous>, transform_indices = @transform_7, window_bounds = array<i64: 2, 32, 96>}, {pipeline_mode = #tpu.pipeline_mode<synchronous>, transform_indices = @transform_8, window_bounds = array<i64: 2, 96>}, {pipeline_mode = #tpu.pipeline_mode<synchronous>, transform_indices = @transform_9, window_bounds = array<i64: 2, 32, 32>}, {pipeline_mode = #tpu.pipeline_mode<synchronous>, transform_indices = @transform_10, window_bounds = array<i64: 2, 32>}, {pipeline_mode = #tpu.pipeline_mode<synchronous>, transform_indices = @transform_11, window_bounds = array<i64: 2, 32, 64>}, {pipeline_mode = #tpu.pipeline_mode<synchronous>, transform_indices = @transform_12, window_bounds = array<i64: 2, 64>}, {pipeline_mode = #tpu.pipeline_mode<synchronous>, transform_indices = @transform_13, window_bounds = array<i64: 2, 64, 32>}, {pipeline_mode = #tpu.pipeline_mode<synchronous>, transform_indices = @transform_14, window_bounds = array<i64: 2, 32>}, {pipeline_mode = #tpu.pipeline_mode<synchronous>, transform_indices = @transform_15, window_bounds = array<i64: 2, 32>}, {pipeline_mode = #tpu.pipeline_mode<synchronous>, transform_indices = @transform_16, window_bounds = array<i64: 2, 32>}, {pipeline_mode = #tpu.pipeline_mode<synchronous>, transform_indices = @transform_17, window_bounds = array<i64: 2, 32>}, {pipeline_mode = #tpu.pipeline_mode<synchronous>, transform_indices = @transform_18, window_bounds = array<i64: 2, 32>}, {pipeline_mode = #tpu.pipeline_mode<synchronous>, transform_indices = @transform_19, window_bounds = array<i64: 2, 32>}, {pipeline_mode = #tpu.pipeline_mode<synchronous>, transform_indices = @transform_20, window_bounds = array<i64: 2, 32>}, {pipeline_mode = #tpu.pipeline_mode<synchronous>, transform_indices = @transform_21, window_bounds = array<i64: 32, 128>}, {pipeline_mode = #tpu.pipeline_mode<synchronous>, transform_indices = @transform_22, window_bounds = array<i64: 1, 128>}, {pipeline_mode = #tpu.pipeline_mode<synchronous>, transform_indices = @transform_23, window_bounds = array<i64: 16, 128>}]} {
    %c0 = arith.constant 0 : index
    %c0_0 = arith.constant 0 : index
    %0 = vector.load %arg1[%c0, %c0_0] : memref<16x32xf32, #tpu.memory_space<vmem>>, vector<16x32xf32>
    %c0_1 = arith.constant 0 : index
    %c0_2 = arith.constant 0 : index
    %1 = vector.load %arg2[%c0_1, %c0_2] : memref<16x16xf32, #tpu.memory_space<vmem>>, vector<16x16xf32>
    %c0_3 = arith.constant 0 : index
    %c0_4 = arith.constant 0 : index
    %2 = vector.load %arg3[%c0_3, %c0_4] : memref<16x16xf32, #tpu.memory_space<vmem>>, vector<16x16xf32>
    %c0_5 = arith.constant 0 : index
    %c0_6 = arith.constant 0 : index
    %3 = vector.load %arg5[%c0_5, %c0_6] : memref<2x96xf32, #tpu.memory_space<vmem>>, vector<2x96xf32>
    %c0_7 = arith.constant 0 : index
    %c0_8 = arith.constant 0 : index
    %4 = vector.load %arg7[%c0_7, %c0_8] : memref<2x32xf32, #tpu.memory_space<vmem>>, vector<2x32xf32>
    %c0_9 = arith.constant 0 : index
    %c0_10 = arith.constant 0 : index
    %5 = vector.load %arg9[%c0_9, %c0_10] : memref<2x96xf32, #tpu.memory_space<vmem>>, vector<2x96xf32>
    %c0_11 = arith.constant 0 : index
    %c0_12 = arith.constant 0 : index
    %6 = vector.load %arg11[%c0_11, %c0_12] : memref<2x32xf32, #tpu.memory_space<vmem>>, vector<2x32xf32>
    %c0_13 = arith.constant 0 : index
    %c0_14 = arith.constant 0 : index
    %7 = vector.load %arg13[%c0_13, %c0_14] : memref<2x64xf32, #tpu.memory_space<vmem>>, vector<2x64xf32>
    %c0_15 = arith.constant 0 : index
    %c0_16 = arith.constant 0 : index
    %8 = vector.load %arg15[%c0_15, %c0_16] : memref<2x32xf32, #tpu.memory_space<vmem>>, vector<2x32xf32>
    %c0_17 = arith.constant 0 : index
    %c0_18 = arith.constant 0 : index
    %9 = vector.load %arg16[%c0_17, %c0_18] : memref<2x32xf32, #tpu.memory_space<vmem>>, vector<2x32xf32>
    %c0_19 = arith.constant 0 : index
    %c0_20 = arith.constant 0 : index
    %10 = vector.load %arg17[%c0_19, %c0_20] : memref<2x32xf32, #tpu.memory_space<vmem>>, vector<2x32xf32>
    %c0_21 = arith.constant 0 : index
    %c0_22 = arith.constant 0 : index
    %11 = vector.load %arg18[%c0_21, %c0_22] : memref<2x32xf32, #tpu.memory_space<vmem>>, vector<2x32xf32>
    %c0_23 = arith.constant 0 : index
    %c0_24 = arith.constant 0 : index
    %12 = vector.load %arg19[%c0_23, %c0_24] : memref<2x32xf32, #tpu.memory_space<vmem>>, vector<2x32xf32>
    %c0_25 = arith.constant 0 : index
    %c0_26 = arith.constant 0 : index
    %13 = vector.load %arg20[%c0_25, %c0_26] : memref<2x32xf32, #tpu.memory_space<vmem>>, vector<2x32xf32>
    %c0_27 = arith.constant 0 : index
    %c0_28 = arith.constant 0 : index
    %14 = vector.load %arg21[%c0_27, %c0_28] : memref<2x32xf32, #tpu.memory_space<vmem>>, vector<2x32xf32>
    %c0_29 = arith.constant 0 : index
    %c0_30 = arith.constant 0 : index
    %c0_31 = arith.constant 0 : index
    %15 = vector.load %arg4[%c0_29, %c0_30, %c0_31] : memref<2x32x96xf32, #tpu.memory_space<vmem>>, vector<1x32x96xf32>
    %16 = vector.shape_cast %15 : vector<1x32x96xf32> to vector<32x96xf32>
    %cst = arith.constant dense<0.000000e+00> : vector<16x96xf32>
    %17 = tpu.matmul %0, %16, %cst {dimension_numbers = #tpu.dot_dimension_numbers<[1], [0], [0], [1], [0, 0, 1, 1], [], []>} : vector<16x32xf32>, vector<32x96xf32>, vector<16x96xf32> -> vector<16x96xf32>
    %18 = vector.extract_strided_slice %3 {offsets = [0, 0], sizes = [1, 96], strides = [1, 1]} : vector<2x96xf32> to vector<1x96xf32>
    %19 = vector.broadcast %18 : vector<1x96xf32> to vector<16x96xf32>
    %20 = arith.addf %17, %19 : vector<16x96xf32>
    %21 = vector.extract_strided_slice %20 {offsets = [0, 0], sizes = [16, 32], strides = [1, 1]} : vector<16x96xf32> to vector<16x32xf32>
    %22 = vector.extract_strided_slice %20 {offsets = [0, 32], sizes = [16, 32], strides = [1, 1]} : vector<16x96xf32> to vector<16x32xf32>
    %23 = vector.extract_strided_slice %20 {offsets = [0, 64], sizes = [16, 32], strides = [1, 1]} : vector<16x96xf32> to vector<16x32xf32>
    %c0_32 = arith.constant 0 : index
    %c0_33 = arith.constant 0 : index
    %c0_34 = arith.constant 0 : index
    %24 = vector.load %arg6[%c0_32, %c0_33, %c0_34] : memref<2x32x32xf32, #tpu.memory_space<vmem>>, vector<1x32x32xf32>
    %25 = vector.shape_cast %24 : vector<1x32x32xf32> to vector<32x32xf32>
    %26 = vector.extract_strided_slice %4 {offsets = [0, 0], sizes = [1, 32], strides = [1, 1]} : vector<2x32xf32> to vector<1x32xf32>
    %cst_35 = arith.constant 0.000000e+00 : f32
    %27 = vector.broadcast %cst_35 : f32 to vector<16x32xf32>
    %28 = vector.extract_strided_slice %21 {offsets = [0, 0], sizes = [16, 8], strides = [1, 1]} : vector<16x32xf32> to vector<16x8xf32>
    %29 = vector.extract_strided_slice %22 {offsets = [0, 0], sizes = [16, 8], strides = [1, 1]} : vector<16x32xf32> to vector<16x8xf32>
    %30 = vector.extract_strided_slice %23 {offsets = [0, 0], sizes = [16, 8], strides = [1, 1]} : vector<16x32xf32> to vector<16x8xf32>
    %cst_36 = arith.constant dense<0.000000e+00> : vector<16x16xf32>
    %31 = tpu.matmul %28, %29, %cst_36 {dimension_numbers = #tpu.dot_dimension_numbers<[1], [1], [0], [0], [0, 0, 1, 0], [], []>} : vector<16x8xf32>, vector<16x8xf32>, vector<16x16xf32> -> vector<16x16xf32>
    %cst_37 = arith.constant 0.353553385 : f32
    %32 = vector.broadcast %cst_37 : f32 to vector<16x16xf32>
    %33 = arith.mulf %31, %32 : vector<16x16xf32>
    %34 = arith.addf %33, %1 : vector<16x16xf32>
    %cst_38 = arith.constant dense<0xFF800000> : vector<16xf32>
    %35 = vector.multi_reduction <maximumf>, %34, %cst_38 [1] : vector<16x16xf32> to vector<16xf32>
    %36 = vector.shape_cast %35 : vector<16xf32> to vector<16x1xf32>
    %37 = vector.broadcast %36 : vector<16x1xf32> to vector<16x16xf32>
    %38 = arith.subf %34, %37 : vector<16x16xf32>
    %39 = math.exp %38 : vector<16x16xf32>
    %cst_39 = arith.constant dense<0.000000e+00> : vector<16xf32>
    %40 = vector.multi_reduction <add>, %39, %cst_39 [1] : vector<16x16xf32> to vector<16xf32>
    %41 = vector.shape_cast %40 : vector<16xf32> to vector<16x1xf32>
    %42 = tpu.reciprocal %41 {approx = true} : vector<16x1xf32> -> vector<16x1xf32>
    %43 = vector.broadcast %42 : vector<16x1xf32> to vector<16x16xf32>
    %44 = arith.mulf %39, %43 : vector<16x16xf32>
    %cst_40 = arith.constant dense<0.000000e+00> : vector<16x8xf32>
    %45 = tpu.matmul %44, %30, %cst_40 {dimension_numbers = #tpu.dot_dimension_numbers<[1], [0], [0], [1], [0, 0, 1, 1], [], []>} : vector<16x16xf32>, vector<16x8xf32>, vector<16x8xf32> -> vector<16x8xf32>
    %46 = vector.extract_strided_slice %25 {offsets = [0, 0], sizes = [8, 32], strides = [1, 1]} : vector<32x32xf32> to vector<8x32xf32>
    %cst_41 = arith.constant dense<0.000000e+00> : vector<16x32xf32>
    %47 = tpu.matmul %45, %46, %cst_41 {dimension_numbers = #tpu.dot_dimension_numbers<[1], [0], [0], [1], [0, 0, 1, 1], [], []>} : vector<16x8xf32>, vector<8x32xf32>, vector<16x32xf32> -> vector<16x32xf32>
    %48 = arith.addf %27, %47 : vector<16x32xf32>
    %49 = vector.extract_strided_slice %21 {offsets = [0, 8], sizes = [16, 8], strides = [1, 1]} : vector<16x32xf32> to vector<16x8xf32>
    %50 = vector.extract_strided_slice %22 {offsets = [0, 8], sizes = [16, 8], strides = [1, 1]} : vector<16x32xf32> to vector<16x8xf32>
    %51 = vector.extract_strided_slice %23 {offsets = [0, 8], sizes = [16, 8], strides = [1, 1]} : vector<16x32xf32> to vector<16x8xf32>
    %cst_42 = arith.constant dense<0.000000e+00> : vector<16x16xf32>
    %52 = tpu.matmul %49, %50, %cst_42 {dimension_numbers = #tpu.dot_dimension_numbers<[1], [1], [0], [0], [0, 0, 1, 0], [], []>} : vector<16x8xf32>, vector<16x8xf32>, vector<16x16xf32> -> vector<16x16xf32>
    %cst_43 = arith.constant 0.353553385 : f32
    %53 = vector.broadcast %cst_43 : f32 to vector<16x16xf32>
    %54 = arith.mulf %52, %53 : vector<16x16xf32>
    %55 = arith.addf %54, %1 : vector<16x16xf32>
    %cst_44 = arith.constant dense<0xFF800000> : vector<16xf32>
    %56 = vector.multi_reduction <maximumf>, %55, %cst_44 [1] : vector<16x16xf32> to vector<16xf32>
    %57 = vector.shape_cast %56 : vector<16xf32> to vector<16x1xf32>
    %58 = vector.broadcast %57 : vector<16x1xf32> to vector<16x16xf32>
    %59 = arith.subf %55, %58 : vector<16x16xf32>
    %60 = math.exp %59 : vector<16x16xf32>
    %cst_45 = arith.constant dense<0.000000e+00> : vector<16xf32>
    %61 = vector.multi_reduction <add>, %60, %cst_45 [1] : vector<16x16xf32> to vector<16xf32>
    %62 = vector.shape_cast %61 : vector<16xf32> to vector<16x1xf32>
    %63 = tpu.reciprocal %62 {approx = true} : vector<16x1xf32> -> vector<16x1xf32>
    %64 = vector.broadcast %63 : vector<16x1xf32> to vector<16x16xf32>
    %65 = arith.mulf %60, %64 : vector<16x16xf32>
    %cst_46 = arith.constant dense<0.000000e+00> : vector<16x8xf32>
    %66 = tpu.matmul %65, %51, %cst_46 {dimension_numbers = #tpu.dot_dimension_numbers<[1], [0], [0], [1], [0, 0, 1, 1], [], []>} : vector<16x16xf32>, vector<16x8xf32>, vector<16x8xf32> -> vector<16x8xf32>
    %67 = vector.extract_strided_slice %25 {offsets = [8, 0], sizes = [8, 32], strides = [1, 1]} : vector<32x32xf32> to vector<8x32xf32>
    %cst_47 = arith.constant dense<0.000000e+00> : vector<16x32xf32>
    %68 = tpu.matmul %66, %67, %cst_47 {dimension_numbers = #tpu.dot_dimension_numbers<[1], [0], [0], [1], [0, 0, 1, 1], [], []>} : vector<16x8xf32>, vector<8x32xf32>, vector<16x32xf32> -> vector<16x32xf32>
    %69 = arith.addf %48, %68 : vector<16x32xf32>
    %70 = vector.extract_strided_slice %21 {offsets = [0, 16], sizes = [16, 8], strides = [1, 1]} : vector<16x32xf32> to vector<16x8xf32>
    %71 = vector.extract_strided_slice %22 {offsets = [0, 16], sizes = [16, 8], strides = [1, 1]} : vector<16x32xf32> to vector<16x8xf32>
    %72 = vector.extract_strided_slice %23 {offsets = [0, 16], sizes = [16, 8], strides = [1, 1]} : vector<16x32xf32> to vector<16x8xf32>
    %cst_48 = arith.constant dense<0.000000e+00> : vector<16x16xf32>
    %73 = tpu.matmul %70, %71, %cst_48 {dimension_numbers = #tpu.dot_dimension_numbers<[1], [1], [0], [0], [0, 0, 1, 0], [], []>} : vector<16x8xf32>, vector<16x8xf32>, vector<16x16xf32> -> vector<16x16xf32>
    %cst_49 = arith.constant 0.353553385 : f32
    %74 = vector.broadcast %cst_49 : f32 to vector<16x16xf32>
    %75 = arith.mulf %73, %74 : vector<16x16xf32>
    %76 = arith.addf %75, %1 : vector<16x16xf32>
    %cst_50 = arith.constant dense<0xFF800000> : vector<16xf32>
    %77 = vector.multi_reduction <maximumf>, %76, %cst_50 [1] : vector<16x16xf32> to vector<16xf32>
    %78 = vector.shape_cast %77 : vector<16xf32> to vector<16x1xf32>
    %79 = vector.broadcast %78 : vector<16x1xf32> to vector<16x16xf32>
    %80 = arith.subf %76, %79 : vector<16x16xf32>
    %81 = math.exp %80 : vector<16x16xf32>
    %cst_51 = arith.constant dense<0.000000e+00> : vector<16xf32>
    %82 = vector.multi_reduction <add>, %81, %cst_51 [1] : vector<16x16xf32> to vector<16xf32>
    %83 = vector.shape_cast %82 : vector<16xf32> to vector<16x1xf32>
    %84 = tpu.reciprocal %83 {approx = true} : vector<16x1xf32> -> vector<16x1xf32>
    %85 = vector.broadcast %84 : vector<16x1xf32> to vector<16x16xf32>
    %86 = arith.mulf %81, %85 : vector<16x16xf32>
    %cst_52 = arith.constant dense<0.000000e+00> : vector<16x8xf32>
    %87 = tpu.matmul %86, %72, %cst_52 {dimension_numbers = #tpu.dot_dimension_numbers<[1], [0], [0], [1], [0, 0, 1, 1], [], []>} : vector<16x16xf32>, vector<16x8xf32>, vector<16x8xf32> -> vector<16x8xf32>
    %88 = vector.extract_strided_slice %25 {offsets = [16, 0], sizes = [8, 32], strides = [1, 1]} : vector<32x32xf32> to vector<8x32xf32>
    %cst_53 = arith.constant dense<0.000000e+00> : vector<16x32xf32>
    %89 = tpu.matmul %87, %88, %cst_53 {dimension_numbers = #tpu.dot_dimension_numbers<[1], [0], [0], [1], [0, 0, 1, 1], [], []>} : vector<16x8xf32>, vector<8x32xf32>, vector<16x32xf32> -> vector<16x32xf32>
    %90 = arith.addf %69, %89 : vector<16x32xf32>
    %91 = vector.extract_strided_slice %21 {offsets = [0, 24], sizes = [16, 8], strides = [1, 1]} : vector<16x32xf32> to vector<16x8xf32>
    %92 = vector.extract_strided_slice %22 {offsets = [0, 24], sizes = [16, 8], strides = [1, 1]} : vector<16x32xf32> to vector<16x8xf32>
    %93 = vector.extract_strided_slice %23 {offsets = [0, 24], sizes = [16, 8], strides = [1, 1]} : vector<16x32xf32> to vector<16x8xf32>
    %cst_54 = arith.constant dense<0.000000e+00> : vector<16x16xf32>
    %94 = tpu.matmul %91, %92, %cst_54 {dimension_numbers = #tpu.dot_dimension_numbers<[1], [1], [0], [0], [0, 0, 1, 0], [], []>} : vector<16x8xf32>, vector<16x8xf32>, vector<16x16xf32> -> vector<16x16xf32>
    %cst_55 = arith.constant 0.353553385 : f32
    %95 = vector.broadcast %cst_55 : f32 to vector<16x16xf32>
    %96 = arith.mulf %94, %95 : vector<16x16xf32>
    %97 = arith.addf %96, %1 : vector<16x16xf32>
    %cst_56 = arith.constant dense<0xFF800000> : vector<16xf32>
    %98 = vector.multi_reduction <maximumf>, %97, %cst_56 [1] : vector<16x16xf32> to vector<16xf32>
    %99 = vector.shape_cast %98 : vector<16xf32> to vector<16x1xf32>
    %100 = vector.broadcast %99 : vector<16x1xf32> to vector<16x16xf32>
    %101 = arith.subf %97, %100 : vector<16x16xf32>
    %102 = math.exp %101 : vector<16x16xf32>
    %cst_57 = arith.constant dense<0.000000e+00> : vector<16xf32>
    %103 = vector.multi_reduction <add>, %102, %cst_57 [1] : vector<16x16xf32> to vector<16xf32>
    %104 = vector.shape_cast %103 : vector<16xf32> to vector<16x1xf32>
    %105 = tpu.reciprocal %104 {approx = true} : vector<16x1xf32> -> vector<16x1xf32>
    %106 = vector.broadcast %105 : vector<16x1xf32> to vector<16x16xf32>
    %107 = arith.mulf %102, %106 : vector<16x16xf32>
    %cst_58 = arith.constant dense<0.000000e+00> : vector<16x8xf32>
    %108 = tpu.matmul %107, %93, %cst_58 {dimension_numbers = #tpu.dot_dimension_numbers<[1], [0], [0], [1], [0, 0, 1, 1], [], []>} : vector<16x16xf32>, vector<16x8xf32>, vector<16x8xf32> -> vector<16x8xf32>
    %109 = vector.extract_strided_slice %25 {offsets = [24, 0], sizes = [8, 32], strides = [1, 1]} : vector<32x32xf32> to vector<8x32xf32>
    %cst_59 = arith.constant dense<0.000000e+00> : vector<16x32xf32>
    %110 = tpu.matmul %108, %109, %cst_59 {dimension_numbers = #tpu.dot_dimension_numbers<[1], [0], [0], [1], [0, 0, 1, 1], [], []>} : vector<16x8xf32>, vector<8x32xf32>, vector<16x32xf32> -> vector<16x32xf32>
    %111 = arith.addf %90, %110 : vector<16x32xf32>
    %112 = vector.broadcast %26 : vector<1x32xf32> to vector<16x32xf32>
    %113 = arith.addf %111, %112 : vector<16x32xf32>
    %114 = arith.addf %0, %113 : vector<16x32xf32>
    %115 = vector.extract_strided_slice %9 {offsets = [0, 0], sizes = [1, 32], strides = [1, 1]} : vector<2x32xf32> to vector<1x32xf32>
    %116 = vector.extract_strided_slice %10 {offsets = [0, 0], sizes = [1, 32], strides = [1, 1]} : vector<2x32xf32> to vector<1x32xf32>
    %cst_60 = arith.constant dense<0.000000e+00> : vector<16xf32>
    %117 = vector.multi_reduction <add>, %114, %cst_60 [1] : vector<16x32xf32> to vector<16xf32>
    %118 = vector.shape_cast %117 : vector<16xf32> to vector<16x1xf32>
    %cst_61 = arith.constant 3.200000e+01 : f32
    %119 = vector.broadcast %cst_61 : f32 to vector<16x1xf32>
    %120 = arith.divf %118, %119 : vector<16x1xf32>
    %121 = vector.broadcast %120 : vector<16x1xf32> to vector<16x32xf32>
    %122 = arith.subf %114, %121 : vector<16x32xf32>
    %123 = arith.mulf %122, %122 : vector<16x32xf32>
    %cst_62 = arith.constant dense<0.000000e+00> : vector<16xf32>
    %124 = vector.multi_reduction <add>, %123, %cst_62 [1] : vector<16x32xf32> to vector<16xf32>
    %125 = vector.shape_cast %124 : vector<16xf32> to vector<16x1xf32>
    %cst_63 = arith.constant 3.200000e+01 : f32
    %126 = vector.broadcast %cst_63 : f32 to vector<16x1xf32>
    %127 = arith.divf %125, %126 : vector<16x1xf32>
    %128 = vector.broadcast %120 : vector<16x1xf32> to vector<16x32xf32>
    %129 = arith.subf %114, %128 : vector<16x32xf32>
    %cst_64 = arith.constant 9.99999974E-6 : f32
    %130 = vector.broadcast %cst_64 : f32 to vector<16x1xf32>
    %131 = arith.addf %127, %130 : vector<16x1xf32>
    %132 = math.rsqrt %131 : vector<16x1xf32>
    %133 = vector.broadcast %132 : vector<16x1xf32> to vector<16x32xf32>
    %134 = arith.mulf %129, %133 : vector<16x32xf32>
    %135 = vector.broadcast %115 : vector<1x32xf32> to vector<16x32xf32>
    %136 = arith.mulf %134, %135 : vector<16x32xf32>
    %137 = vector.broadcast %116 : vector<1x32xf32> to vector<16x32xf32>
    %138 = arith.addf %136, %137 : vector<16x32xf32>
    %c0_65 = arith.constant 0 : index
    %c0_66 = arith.constant 0 : index
    %c0_67 = arith.constant 0 : index
    %139 = vector.load %arg8[%c0_65, %c0_66, %c0_67] : memref<2x32x96xf32, #tpu.memory_space<vmem>>, vector<1x32x96xf32>
    %140 = vector.shape_cast %139 : vector<1x32x96xf32> to vector<32x96xf32>
    %141 = vector.extract_strided_slice %140 {offsets = [0, 0], sizes = [32, 32], strides = [1, 1]} : vector<32x96xf32> to vector<32x32xf32>
    %cst_68 = arith.constant dense<0.000000e+00> : vector<16x32xf32>
    %142 = tpu.matmul %138, %141, %cst_68 {dimension_numbers = #tpu.dot_dimension_numbers<[1], [0], [0], [1], [0, 0, 1, 1], [], []>} : vector<16x32xf32>, vector<32x32xf32>, vector<16x32xf32> -> vector<16x32xf32>
    %143 = vector.extract_strided_slice %5 {offsets = [0, 0], sizes = [1, 32], strides = [1, 1]} : vector<2x96xf32> to vector<1x32xf32>
    %144 = vector.broadcast %143 : vector<1x32xf32> to vector<16x32xf32>
    %145 = arith.addf %142, %144 : vector<16x32xf32>
    %146 = vector.extract_strided_slice %140 {offsets = [0, 32], sizes = [32, 64], strides = [1, 1]} : vector<32x96xf32> to vector<32x64xf32>
    %cst_69 = arith.constant dense<0.000000e+00> : vector<16x64xf32>
    %147 = tpu.matmul %0, %146, %cst_69 {dimension_numbers = #tpu.dot_dimension_numbers<[1], [0], [0], [1], [0, 0, 1, 1], [], []>} : vector<16x32xf32>, vector<32x64xf32>, vector<16x64xf32> -> vector<16x64xf32>
    %148 = vector.extract_strided_slice %5 {offsets = [0, 32], sizes = [1, 64], strides = [1, 1]} : vector<2x96xf32> to vector<1x64xf32>
    %149 = vector.broadcast %148 : vector<1x64xf32> to vector<16x64xf32>
    %150 = arith.addf %147, %149 : vector<16x64xf32>
    %151 = vector.extract_strided_slice %150 {offsets = [0, 0], sizes = [16, 32], strides = [1, 1]} : vector<16x64xf32> to vector<16x32xf32>
    %152 = vector.extract_strided_slice %150 {offsets = [0, 32], sizes = [16, 32], strides = [1, 1]} : vector<16x64xf32> to vector<16x32xf32>
    %c0_70 = arith.constant 0 : index
    %c0_71 = arith.constant 0 : index
    %c0_72 = arith.constant 0 : index
    %153 = vector.load %arg10[%c0_70, %c0_71, %c0_72] : memref<2x32x32xf32, #tpu.memory_space<vmem>>, vector<1x32x32xf32>
    %154 = vector.shape_cast %153 : vector<1x32x32xf32> to vector<32x32xf32>
    %155 = vector.extract_strided_slice %6 {offsets = [0, 0], sizes = [1, 32], strides = [1, 1]} : vector<2x32xf32> to vector<1x32xf32>
    %cst_73 = arith.constant 0.000000e+00 : f32
    %156 = vector.broadcast %cst_73 : f32 to vector<16x32xf32>
    %157 = vector.extract_strided_slice %145 {offsets = [0, 0], sizes = [16, 8], strides = [1, 1]} : vector<16x32xf32> to vector<16x8xf32>
    %158 = vector.extract_strided_slice %151 {offsets = [0, 0], sizes = [16, 8], strides = [1, 1]} : vector<16x32xf32> to vector<16x8xf32>
    %159 = vector.extract_strided_slice %152 {offsets = [0, 0], sizes = [16, 8], strides = [1, 1]} : vector<16x32xf32> to vector<16x8xf32>
    %cst_74 = arith.constant dense<0.000000e+00> : vector<16x16xf32>
    %160 = tpu.matmul %157, %158, %cst_74 {dimension_numbers = #tpu.dot_dimension_numbers<[1], [1], [0], [0], [0, 0, 1, 0], [], []>} : vector<16x8xf32>, vector<16x8xf32>, vector<16x16xf32> -> vector<16x16xf32>
    %cst_75 = arith.constant 0.353553385 : f32
    %161 = vector.broadcast %cst_75 : f32 to vector<16x16xf32>
    %162 = arith.mulf %160, %161 : vector<16x16xf32>
    %163 = arith.addf %162, %2 : vector<16x16xf32>
    %cst_76 = arith.constant dense<0xFF800000> : vector<16xf32>
    %164 = vector.multi_reduction <maximumf>, %163, %cst_76 [1] : vector<16x16xf32> to vector<16xf32>
    %165 = vector.shape_cast %164 : vector<16xf32> to vector<16x1xf32>
    %166 = vector.broadcast %165 : vector<16x1xf32> to vector<16x16xf32>
    %167 = arith.subf %163, %166 : vector<16x16xf32>
    %168 = math.exp %167 : vector<16x16xf32>
    %cst_77 = arith.constant dense<0.000000e+00> : vector<16xf32>
    %169 = vector.multi_reduction <add>, %168, %cst_77 [1] : vector<16x16xf32> to vector<16xf32>
    %170 = vector.shape_cast %169 : vector<16xf32> to vector<16x1xf32>
    %171 = tpu.reciprocal %170 {approx = true} : vector<16x1xf32> -> vector<16x1xf32>
    %172 = vector.broadcast %171 : vector<16x1xf32> to vector<16x16xf32>
    %173 = arith.mulf %168, %172 : vector<16x16xf32>
    %cst_78 = arith.constant dense<0.000000e+00> : vector<16x8xf32>
    %174 = tpu.matmul %173, %159, %cst_78 {dimension_numbers = #tpu.dot_dimension_numbers<[1], [0], [0], [1], [0, 0, 1, 1], [], []>} : vector<16x16xf32>, vector<16x8xf32>, vector<16x8xf32> -> vector<16x8xf32>
    %175 = vector.extract_strided_slice %154 {offsets = [0, 0], sizes = [8, 32], strides = [1, 1]} : vector<32x32xf32> to vector<8x32xf32>
    %cst_79 = arith.constant dense<0.000000e+00> : vector<16x32xf32>
    %176 = tpu.matmul %174, %175, %cst_79 {dimension_numbers = #tpu.dot_dimension_numbers<[1], [0], [0], [1], [0, 0, 1, 1], [], []>} : vector<16x8xf32>, vector<8x32xf32>, vector<16x32xf32> -> vector<16x32xf32>
    %177 = arith.addf %156, %176 : vector<16x32xf32>
    %178 = vector.extract_strided_slice %145 {offsets = [0, 8], sizes = [16, 8], strides = [1, 1]} : vector<16x32xf32> to vector<16x8xf32>
    %179 = vector.extract_strided_slice %151 {offsets = [0, 8], sizes = [16, 8], strides = [1, 1]} : vector<16x32xf32> to vector<16x8xf32>
    %180 = vector.extract_strided_slice %152 {offsets = [0, 8], sizes = [16, 8], strides = [1, 1]} : vector<16x32xf32> to vector<16x8xf32>
    %cst_80 = arith.constant dense<0.000000e+00> : vector<16x16xf32>
    %181 = tpu.matmul %178, %179, %cst_80 {dimension_numbers = #tpu.dot_dimension_numbers<[1], [1], [0], [0], [0, 0, 1, 0], [], []>} : vector<16x8xf32>, vector<16x8xf32>, vector<16x16xf32> -> vector<16x16xf32>
    %cst_81 = arith.constant 0.353553385 : f32
    %182 = vector.broadcast %cst_81 : f32 to vector<16x16xf32>
    %183 = arith.mulf %181, %182 : vector<16x16xf32>
    %184 = arith.addf %183, %2 : vector<16x16xf32>
    %cst_82 = arith.constant dense<0xFF800000> : vector<16xf32>
    %185 = vector.multi_reduction <maximumf>, %184, %cst_82 [1] : vector<16x16xf32> to vector<16xf32>
    %186 = vector.shape_cast %185 : vector<16xf32> to vector<16x1xf32>
    %187 = vector.broadcast %186 : vector<16x1xf32> to vector<16x16xf32>
    %188 = arith.subf %184, %187 : vector<16x16xf32>
    %189 = math.exp %188 : vector<16x16xf32>
    %cst_83 = arith.constant dense<0.000000e+00> : vector<16xf32>
    %190 = vector.multi_reduction <add>, %189, %cst_83 [1] : vector<16x16xf32> to vector<16xf32>
    %191 = vector.shape_cast %190 : vector<16xf32> to vector<16x1xf32>
    %192 = tpu.reciprocal %191 {approx = true} : vector<16x1xf32> -> vector<16x1xf32>
    %193 = vector.broadcast %192 : vector<16x1xf32> to vector<16x16xf32>
    %194 = arith.mulf %189, %193 : vector<16x16xf32>
    %cst_84 = arith.constant dense<0.000000e+00> : vector<16x8xf32>
    %195 = tpu.matmul %194, %180, %cst_84 {dimension_numbers = #tpu.dot_dimension_numbers<[1], [0], [0], [1], [0, 0, 1, 1], [], []>} : vector<16x16xf32>, vector<16x8xf32>, vector<16x8xf32> -> vector<16x8xf32>
    %196 = vector.extract_strided_slice %154 {offsets = [8, 0], sizes = [8, 32], strides = [1, 1]} : vector<32x32xf32> to vector<8x32xf32>
    %cst_85 = arith.constant dense<0.000000e+00> : vector<16x32xf32>
    %197 = tpu.matmul %195, %196, %cst_85 {dimension_numbers = #tpu.dot_dimension_numbers<[1], [0], [0], [1], [0, 0, 1, 1], [], []>} : vector<16x8xf32>, vector<8x32xf32>, vector<16x32xf32> -> vector<16x32xf32>
    %198 = arith.addf %177, %197 : vector<16x32xf32>
    %199 = vector.extract_strided_slice %145 {offsets = [0, 16], sizes = [16, 8], strides = [1, 1]} : vector<16x32xf32> to vector<16x8xf32>
    %200 = vector.extract_strided_slice %151 {offsets = [0, 16], sizes = [16, 8], strides = [1, 1]} : vector<16x32xf32> to vector<16x8xf32>
    %201 = vector.extract_strided_slice %152 {offsets = [0, 16], sizes = [16, 8], strides = [1, 1]} : vector<16x32xf32> to vector<16x8xf32>
    %cst_86 = arith.constant dense<0.000000e+00> : vector<16x16xf32>
    %202 = tpu.matmul %199, %200, %cst_86 {dimension_numbers = #tpu.dot_dimension_numbers<[1], [1], [0], [0], [0, 0, 1, 0], [], []>} : vector<16x8xf32>, vector<16x8xf32>, vector<16x16xf32> -> vector<16x16xf32>
    %cst_87 = arith.constant 0.353553385 : f32
    %203 = vector.broadcast %cst_87 : f32 to vector<16x16xf32>
    %204 = arith.mulf %202, %203 : vector<16x16xf32>
    %205 = arith.addf %204, %2 : vector<16x16xf32>
    %cst_88 = arith.constant dense<0xFF800000> : vector<16xf32>
    %206 = vector.multi_reduction <maximumf>, %205, %cst_88 [1] : vector<16x16xf32> to vector<16xf32>
    %207 = vector.shape_cast %206 : vector<16xf32> to vector<16x1xf32>
    %208 = vector.broadcast %207 : vector<16x1xf32> to vector<16x16xf32>
    %209 = arith.subf %205, %208 : vector<16x16xf32>
    %210 = math.exp %209 : vector<16x16xf32>
    %cst_89 = arith.constant dense<0.000000e+00> : vector<16xf32>
    %211 = vector.multi_reduction <add>, %210, %cst_89 [1] : vector<16x16xf32> to vector<16xf32>
    %212 = vector.shape_cast %211 : vector<16xf32> to vector<16x1xf32>
    %213 = tpu.reciprocal %212 {approx = true} : vector<16x1xf32> -> vector<16x1xf32>
    %214 = vector.broadcast %213 : vector<16x1xf32> to vector<16x16xf32>
    %215 = arith.mulf %210, %214 : vector<16x16xf32>
    %cst_90 = arith.constant dense<0.000000e+00> : vector<16x8xf32>
    %216 = tpu.matmul %215, %201, %cst_90 {dimension_numbers = #tpu.dot_dimension_numbers<[1], [0], [0], [1], [0, 0, 1, 1], [], []>} : vector<16x16xf32>, vector<16x8xf32>, vector<16x8xf32> -> vector<16x8xf32>
    %217 = vector.extract_strided_slice %154 {offsets = [16, 0], sizes = [8, 32], strides = [1, 1]} : vector<32x32xf32> to vector<8x32xf32>
    %cst_91 = arith.constant dense<0.000000e+00> : vector<16x32xf32>
    %218 = tpu.matmul %216, %217, %cst_91 {dimension_numbers = #tpu.dot_dimension_numbers<[1], [0], [0], [1], [0, 0, 1, 1], [], []>} : vector<16x8xf32>, vector<8x32xf32>, vector<16x32xf32> -> vector<16x32xf32>
    %219 = arith.addf %198, %218 : vector<16x32xf32>
    %220 = vector.extract_strided_slice %145 {offsets = [0, 24], sizes = [16, 8], strides = [1, 1]} : vector<16x32xf32> to vector<16x8xf32>
    %221 = vector.extract_strided_slice %151 {offsets = [0, 24], sizes = [16, 8], strides = [1, 1]} : vector<16x32xf32> to vector<16x8xf32>
    %222 = vector.extract_strided_slice %152 {offsets = [0, 24], sizes = [16, 8], strides = [1, 1]} : vector<16x32xf32> to vector<16x8xf32>
    %cst_92 = arith.constant dense<0.000000e+00> : vector<16x16xf32>
    %223 = tpu.matmul %220, %221, %cst_92 {dimension_numbers = #tpu.dot_dimension_numbers<[1], [1], [0], [0], [0, 0, 1, 0], [], []>} : vector<16x8xf32>, vector<16x8xf32>, vector<16x16xf32> -> vector<16x16xf32>
    %cst_93 = arith.constant 0.353553385 : f32
    %224 = vector.broadcast %cst_93 : f32 to vector<16x16xf32>
    %225 = arith.mulf %223, %224 : vector<16x16xf32>
    %226 = arith.addf %225, %2 : vector<16x16xf32>
    %cst_94 = arith.constant dense<0xFF800000> : vector<16xf32>
    %227 = vector.multi_reduction <maximumf>, %226, %cst_94 [1] : vector<16x16xf32> to vector<16xf32>
    %228 = vector.shape_cast %227 : vector<16xf32> to vector<16x1xf32>
    %229 = vector.broadcast %228 : vector<16x1xf32> to vector<16x16xf32>
    %230 = arith.subf %226, %229 : vector<16x16xf32>
    %231 = math.exp %230 : vector<16x16xf32>
    %cst_95 = arith.constant dense<0.000000e+00> : vector<16xf32>
    %232 = vector.multi_reduction <add>, %231, %cst_95 [1] : vector<16x16xf32> to vector<16xf32>
    %233 = vector.shape_cast %232 : vector<16xf32> to vector<16x1xf32>
    %234 = tpu.reciprocal %233 {approx = true} : vector<16x1xf32> -> vector<16x1xf32>
    %235 = vector.broadcast %234 : vector<16x1xf32> to vector<16x16xf32>
    %236 = arith.mulf %231, %235 : vector<16x16xf32>
    %cst_96 = arith.constant dense<0.000000e+00> : vector<16x8xf32>
    %237 = tpu.matmul %236, %222, %cst_96 {dimension_numbers = #tpu.dot_dimension_numbers<[1], [0], [0], [1], [0, 0, 1, 1], [], []>} : vector<16x16xf32>, vector<16x8xf32>, vector<16x8xf32> -> vector<16x8xf32>
    %238 = vector.extract_strided_slice %154 {offsets = [24, 0], sizes = [8, 32], strides = [1, 1]} : vector<32x32xf32> to vector<8x32xf32>
    %cst_97 = arith.constant dense<0.000000e+00> : vector<16x32xf32>
    %239 = tpu.matmul %237, %238, %cst_97 {dimension_numbers = #tpu.dot_dimension_numbers<[1], [0], [0], [1], [0, 0, 1, 1], [], []>} : vector<16x8xf32>, vector<8x32xf32>, vector<16x32xf32> -> vector<16x32xf32>
    %240 = arith.addf %219, %239 : vector<16x32xf32>
    %241 = vector.broadcast %155 : vector<1x32xf32> to vector<16x32xf32>
    %242 = arith.addf %240, %241 : vector<16x32xf32>
    %243 = arith.addf %138, %242 : vector<16x32xf32>
    %244 = vector.extract_strided_slice %11 {offsets = [0, 0], sizes = [1, 32], strides = [1, 1]} : vector<2x32xf32> to vector<1x32xf32>
    %245 = vector.extract_strided_slice %12 {offsets = [0, 0], sizes = [1, 32], strides = [1, 1]} : vector<2x32xf32> to vector<1x32xf32>
    %cst_98 = arith.constant dense<0.000000e+00> : vector<16xf32>
    %246 = vector.multi_reduction <add>, %243, %cst_98 [1] : vector<16x32xf32> to vector<16xf32>
    %247 = vector.shape_cast %246 : vector<16xf32> to vector<16x1xf32>
    %cst_99 = arith.constant 3.200000e+01 : f32
    %248 = vector.broadcast %cst_99 : f32 to vector<16x1xf32>
    %249 = arith.divf %247, %248 : vector<16x1xf32>
    %250 = vector.broadcast %249 : vector<16x1xf32> to vector<16x32xf32>
    %251 = arith.subf %243, %250 : vector<16x32xf32>
    %252 = arith.mulf %251, %251 : vector<16x32xf32>
    %cst_100 = arith.constant dense<0.000000e+00> : vector<16xf32>
    %253 = vector.multi_reduction <add>, %252, %cst_100 [1] : vector<16x32xf32> to vector<16xf32>
    %254 = vector.shape_cast %253 : vector<16xf32> to vector<16x1xf32>
    %cst_101 = arith.constant 3.200000e+01 : f32
    %255 = vector.broadcast %cst_101 : f32 to vector<16x1xf32>
    %256 = arith.divf %254, %255 : vector<16x1xf32>
    %257 = vector.broadcast %249 : vector<16x1xf32> to vector<16x32xf32>
    %258 = arith.subf %243, %257 : vector<16x32xf32>
    %cst_102 = arith.constant 9.99999974E-6 : f32
    %259 = vector.broadcast %cst_102 : f32 to vector<16x1xf32>
    %260 = arith.addf %256, %259 : vector<16x1xf32>
    %261 = math.rsqrt %260 : vector<16x1xf32>
    %262 = vector.broadcast %261 : vector<16x1xf32> to vector<16x32xf32>
    %263 = arith.mulf %258, %262 : vector<16x32xf32>
    %264 = vector.broadcast %244 : vector<1x32xf32> to vector<16x32xf32>
    %265 = arith.mulf %263, %264 : vector<16x32xf32>
    %266 = vector.broadcast %245 : vector<1x32xf32> to vector<16x32xf32>
    %267 = arith.addf %265, %266 : vector<16x32xf32>
    %c0_103 = arith.constant 0 : index
    %c0_104 = arith.constant 0 : index
    %c0_105 = arith.constant 0 : index
    %268 = vector.load %arg12[%c0_103, %c0_104, %c0_105] : memref<2x32x64xf32, #tpu.memory_space<vmem>>, vector<1x32x64xf32>
    %269 = vector.shape_cast %268 : vector<1x32x64xf32> to vector<32x64xf32>
    %cst_106 = arith.constant dense<0.000000e+00> : vector<16x64xf32>
    %270 = tpu.matmul %267, %269, %cst_106 {dimension_numbers = #tpu.dot_dimension_numbers<[1], [0], [0], [1], [0, 0, 1, 1], [], []>} : vector<16x32xf32>, vector<32x64xf32>, vector<16x64xf32> -> vector<16x64xf32>
    %271 = vector.extract_strided_slice %7 {offsets = [0, 0], sizes = [1, 64], strides = [1, 1]} : vector<2x64xf32> to vector<1x64xf32>
    %272 = vector.broadcast %271 : vector<1x64xf32> to vector<16x64xf32>
    %273 = arith.addf %270, %272 : vector<16x64xf32>
    %cst_107 = arith.constant 0.000000e+00 : f32
    %274 = vector.broadcast %cst_107 : f32 to vector<16x64xf32>
    %275 = arith.maximumf %273, %274 : vector<16x64xf32>
    %c0_108 = arith.constant 0 : index
    %c0_109 = arith.constant 0 : index
    %c0_110 = arith.constant 0 : index
    %276 = vector.load %arg14[%c0_108, %c0_109, %c0_110] : memref<2x64x32xf32, #tpu.memory_space<vmem>>, vector<1x64x32xf32>
    %277 = vector.shape_cast %276 : vector<1x64x32xf32> to vector<64x32xf32>
    %cst_111 = arith.constant dense<0.000000e+00> : vector<16x32xf32>
    %278 = tpu.matmul %275, %277, %cst_111 {dimension_numbers = #tpu.dot_dimension_numbers<[1], [0], [0], [1], [0, 0, 1, 1], [], []>} : vector<16x64xf32>, vector<64x32xf32>, vector<16x32xf32> -> vector<16x32xf32>
    %279 = vector.extract_strided_slice %8 {offsets = [0, 0], sizes = [1, 32], strides = [1, 1]} : vector<2x32xf32> to vector<1x32xf32>
    %280 = vector.broadcast %279 : vector<1x32xf32> to vector<16x32xf32>
    %281 = arith.addf %278, %280 : vector<16x32xf32>
    %282 = arith.addf %267, %281 : vector<16x32xf32>
    %283 = vector.extract_strided_slice %13 {offsets = [0, 0], sizes = [1, 32], strides = [1, 1]} : vector<2x32xf32> to vector<1x32xf32>
    %284 = vector.extract_strided_slice %14 {offsets = [0, 0], sizes = [1, 32], strides = [1, 1]} : vector<2x32xf32> to vector<1x32xf32>
    %cst_112 = arith.constant dense<0.000000e+00> : vector<16xf32>
    %285 = vector.multi_reduction <add>, %282, %cst_112 [1] : vector<16x32xf32> to vector<16xf32>
    %286 = vector.shape_cast %285 : vector<16xf32> to vector<16x1xf32>
    %cst_113 = arith.constant 3.200000e+01 : f32
    %287 = vector.broadcast %cst_113 : f32 to vector<16x1xf32>
    %288 = arith.divf %286, %287 : vector<16x1xf32>
    %289 = vector.broadcast %288 : vector<16x1xf32> to vector<16x32xf32>
    %290 = arith.subf %282, %289 : vector<16x32xf32>
    %291 = arith.mulf %290, %290 : vector<16x32xf32>
    %cst_114 = arith.constant dense<0.000000e+00> : vector<16xf32>
    %292 = vector.multi_reduction <add>, %291, %cst_114 [1] : vector<16x32xf32> to vector<16xf32>
    %293 = vector.shape_cast %292 : vector<16xf32> to vector<16x1xf32>
    %cst_115 = arith.constant 3.200000e+01 : f32
    %294 = vector.broadcast %cst_115 : f32 to vector<16x1xf32>
    %295 = arith.divf %293, %294 : vector<16x1xf32>
    %296 = vector.broadcast %288 : vector<16x1xf32> to vector<16x32xf32>
    %297 = arith.subf %282, %296 : vector<16x32xf32>
    %cst_116 = arith.constant 9.99999974E-6 : f32
    %298 = vector.broadcast %cst_116 : f32 to vector<16x1xf32>
    %299 = arith.addf %295, %298 : vector<16x1xf32>
    %300 = math.rsqrt %299 : vector<16x1xf32>
    %301 = vector.broadcast %300 : vector<16x1xf32> to vector<16x32xf32>
    %302 = arith.mulf %297, %301 : vector<16x32xf32>
    %303 = vector.broadcast %283 : vector<1x32xf32> to vector<16x32xf32>
    %304 = arith.mulf %302, %303 : vector<16x32xf32>
    %305 = vector.broadcast %284 : vector<1x32xf32> to vector<16x32xf32>
    %306 = arith.addf %304, %305 : vector<16x32xf32>
    %c1 = arith.constant 1 : index
    %c0_117 = arith.constant 0 : index
    %c0_118 = arith.constant 0 : index
    %307 = vector.load %arg4[%c1, %c0_117, %c0_118] : memref<2x32x96xf32, #tpu.memory_space<vmem>>, vector<1x32x96xf32>
    %308 = vector.shape_cast %307 : vector<1x32x96xf32> to vector<32x96xf32>
    %cst_119 = arith.constant dense<0.000000e+00> : vector<16x96xf32>
    %309 = tpu.matmul %306, %308, %cst_119 {dimension_numbers = #tpu.dot_dimension_numbers<[1], [0], [0], [1], [0, 0, 1, 1], [], []>} : vector<16x32xf32>, vector<32x96xf32>, vector<16x96xf32> -> vector<16x96xf32>
    %310 = vector.extract_strided_slice %3 {offsets = [1, 0], sizes = [1, 96], strides = [1, 1]} : vector<2x96xf32> to vector<1x96xf32>
    %311 = vector.broadcast %310 : vector<1x96xf32> to vector<16x96xf32>
    %312 = arith.addf %309, %311 : vector<16x96xf32>
    %313 = vector.extract_strided_slice %312 {offsets = [0, 0], sizes = [16, 32], strides = [1, 1]} : vector<16x96xf32> to vector<16x32xf32>
    %314 = vector.extract_strided_slice %312 {offsets = [0, 32], sizes = [16, 32], strides = [1, 1]} : vector<16x96xf32> to vector<16x32xf32>
    %315 = vector.extract_strided_slice %312 {offsets = [0, 64], sizes = [16, 32], strides = [1, 1]} : vector<16x96xf32> to vector<16x32xf32>
    %c1_120 = arith.constant 1 : index
    %c0_121 = arith.constant 0 : index
    %c0_122 = arith.constant 0 : index
    %316 = vector.load %arg6[%c1_120, %c0_121, %c0_122] : memref<2x32x32xf32, #tpu.memory_space<vmem>>, vector<1x32x32xf32>
    %317 = vector.shape_cast %316 : vector<1x32x32xf32> to vector<32x32xf32>
    %318 = vector.extract_strided_slice %4 {offsets = [1, 0], sizes = [1, 32], strides = [1, 1]} : vector<2x32xf32> to vector<1x32xf32>
    %cst_123 = arith.constant 0.000000e+00 : f32
    %319 = vector.broadcast %cst_123 : f32 to vector<16x32xf32>
    %320 = vector.extract_strided_slice %313 {offsets = [0, 0], sizes = [16, 8], strides = [1, 1]} : vector<16x32xf32> to vector<16x8xf32>
    %321 = vector.extract_strided_slice %314 {offsets = [0, 0], sizes = [16, 8], strides = [1, 1]} : vector<16x32xf32> to vector<16x8xf32>
    %322 = vector.extract_strided_slice %315 {offsets = [0, 0], sizes = [16, 8], strides = [1, 1]} : vector<16x32xf32> to vector<16x8xf32>
    %cst_124 = arith.constant dense<0.000000e+00> : vector<16x16xf32>
    %323 = tpu.matmul %320, %321, %cst_124 {dimension_numbers = #tpu.dot_dimension_numbers<[1], [1], [0], [0], [0, 0, 1, 0], [], []>} : vector<16x8xf32>, vector<16x8xf32>, vector<16x16xf32> -> vector<16x16xf32>
    %cst_125 = arith.constant 0.353553385 : f32
    %324 = vector.broadcast %cst_125 : f32 to vector<16x16xf32>
    %325 = arith.mulf %323, %324 : vector<16x16xf32>
    %326 = arith.addf %325, %1 : vector<16x16xf32>
    %cst_126 = arith.constant dense<0xFF800000> : vector<16xf32>
    %327 = vector.multi_reduction <maximumf>, %326, %cst_126 [1] : vector<16x16xf32> to vector<16xf32>
    %328 = vector.shape_cast %327 : vector<16xf32> to vector<16x1xf32>
    %329 = vector.broadcast %328 : vector<16x1xf32> to vector<16x16xf32>
    %330 = arith.subf %326, %329 : vector<16x16xf32>
    %331 = math.exp %330 : vector<16x16xf32>
    %cst_127 = arith.constant dense<0.000000e+00> : vector<16xf32>
    %332 = vector.multi_reduction <add>, %331, %cst_127 [1] : vector<16x16xf32> to vector<16xf32>
    %333 = vector.shape_cast %332 : vector<16xf32> to vector<16x1xf32>
    %334 = tpu.reciprocal %333 {approx = true} : vector<16x1xf32> -> vector<16x1xf32>
    %335 = vector.broadcast %334 : vector<16x1xf32> to vector<16x16xf32>
    %336 = arith.mulf %331, %335 : vector<16x16xf32>
    %cst_128 = arith.constant dense<0.000000e+00> : vector<16x8xf32>
    %337 = tpu.matmul %336, %322, %cst_128 {dimension_numbers = #tpu.dot_dimension_numbers<[1], [0], [0], [1], [0, 0, 1, 1], [], []>} : vector<16x16xf32>, vector<16x8xf32>, vector<16x8xf32> -> vector<16x8xf32>
    %338 = vector.extract_strided_slice %317 {offsets = [0, 0], sizes = [8, 32], strides = [1, 1]} : vector<32x32xf32> to vector<8x32xf32>
    %cst_129 = arith.constant dense<0.000000e+00> : vector<16x32xf32>
    %339 = tpu.matmul %337, %338, %cst_129 {dimension_numbers = #tpu.dot_dimension_numbers<[1], [0], [0], [1], [0, 0, 1, 1], [], []>} : vector<16x8xf32>, vector<8x32xf32>, vector<16x32xf32> -> vector<16x32xf32>
    %340 = arith.addf %319, %339 : vector<16x32xf32>
    %341 = vector.extract_strided_slice %313 {offsets = [0, 8], sizes = [16, 8], strides = [1, 1]} : vector<16x32xf32> to vector<16x8xf32>
    %342 = vector.extract_strided_slice %314 {offsets = [0, 8], sizes = [16, 8], strides = [1, 1]} : vector<16x32xf32> to vector<16x8xf32>
    %343 = vector.extract_strided_slice %315 {offsets = [0, 8], sizes = [16, 8], strides = [1, 1]} : vector<16x32xf32> to vector<16x8xf32>
    %cst_130 = arith.constant dense<0.000000e+00> : vector<16x16xf32>
    %344 = tpu.matmul %341, %342, %cst_130 {dimension_numbers = #tpu.dot_dimension_numbers<[1], [1], [0], [0], [0, 0, 1, 0], [], []>} : vector<16x8xf32>, vector<16x8xf32>, vector<16x16xf32> -> vector<16x16xf32>
    %cst_131 = arith.constant 0.353553385 : f32
    %345 = vector.broadcast %cst_131 : f32 to vector<16x16xf32>
    %346 = arith.mulf %344, %345 : vector<16x16xf32>
    %347 = arith.addf %346, %1 : vector<16x16xf32>
    %cst_132 = arith.constant dense<0xFF800000> : vector<16xf32>
    %348 = vector.multi_reduction <maximumf>, %347, %cst_132 [1] : vector<16x16xf32> to vector<16xf32>
    %349 = vector.shape_cast %348 : vector<16xf32> to vector<16x1xf32>
    %350 = vector.broadcast %349 : vector<16x1xf32> to vector<16x16xf32>
    %351 = arith.subf %347, %350 : vector<16x16xf32>
    %352 = math.exp %351 : vector<16x16xf32>
    %cst_133 = arith.constant dense<0.000000e+00> : vector<16xf32>
    %353 = vector.multi_reduction <add>, %352, %cst_133 [1] : vector<16x16xf32> to vector<16xf32>
    %354 = vector.shape_cast %353 : vector<16xf32> to vector<16x1xf32>
    %355 = tpu.reciprocal %354 {approx = true} : vector<16x1xf32> -> vector<16x1xf32>
    %356 = vector.broadcast %355 : vector<16x1xf32> to vector<16x16xf32>
    %357 = arith.mulf %352, %356 : vector<16x16xf32>
    %cst_134 = arith.constant dense<0.000000e+00> : vector<16x8xf32>
    %358 = tpu.matmul %357, %343, %cst_134 {dimension_numbers = #tpu.dot_dimension_numbers<[1], [0], [0], [1], [0, 0, 1, 1], [], []>} : vector<16x16xf32>, vector<16x8xf32>, vector<16x8xf32> -> vector<16x8xf32>
    %359 = vector.extract_strided_slice %317 {offsets = [8, 0], sizes = [8, 32], strides = [1, 1]} : vector<32x32xf32> to vector<8x32xf32>
    %cst_135 = arith.constant dense<0.000000e+00> : vector<16x32xf32>
    %360 = tpu.matmul %358, %359, %cst_135 {dimension_numbers = #tpu.dot_dimension_numbers<[1], [0], [0], [1], [0, 0, 1, 1], [], []>} : vector<16x8xf32>, vector<8x32xf32>, vector<16x32xf32> -> vector<16x32xf32>
    %361 = arith.addf %340, %360 : vector<16x32xf32>
    %362 = vector.extract_strided_slice %313 {offsets = [0, 16], sizes = [16, 8], strides = [1, 1]} : vector<16x32xf32> to vector<16x8xf32>
    %363 = vector.extract_strided_slice %314 {offsets = [0, 16], sizes = [16, 8], strides = [1, 1]} : vector<16x32xf32> to vector<16x8xf32>
    %364 = vector.extract_strided_slice %315 {offsets = [0, 16], sizes = [16, 8], strides = [1, 1]} : vector<16x32xf32> to vector<16x8xf32>
    %cst_136 = arith.constant dense<0.000000e+00> : vector<16x16xf32>
    %365 = tpu.matmul %362, %363, %cst_136 {dimension_numbers = #tpu.dot_dimension_numbers<[1], [1], [0], [0], [0, 0, 1, 0], [], []>} : vector<16x8xf32>, vector<16x8xf32>, vector<16x16xf32> -> vector<16x16xf32>
    %cst_137 = arith.constant 0.353553385 : f32
    %366 = vector.broadcast %cst_137 : f32 to vector<16x16xf32>
    %367 = arith.mulf %365, %366 : vector<16x16xf32>
    %368 = arith.addf %367, %1 : vector<16x16xf32>
    %cst_138 = arith.constant dense<0xFF800000> : vector<16xf32>
    %369 = vector.multi_reduction <maximumf>, %368, %cst_138 [1] : vector<16x16xf32> to vector<16xf32>
    %370 = vector.shape_cast %369 : vector<16xf32> to vector<16x1xf32>
    %371 = vector.broadcast %370 : vector<16x1xf32> to vector<16x16xf32>
    %372 = arith.subf %368, %371 : vector<16x16xf32>
    %373 = math.exp %372 : vector<16x16xf32>
    %cst_139 = arith.constant dense<0.000000e+00> : vector<16xf32>
    %374 = vector.multi_reduction <add>, %373, %cst_139 [1] : vector<16x16xf32> to vector<16xf32>
    %375 = vector.shape_cast %374 : vector<16xf32> to vector<16x1xf32>
    %376 = tpu.reciprocal %375 {approx = true} : vector<16x1xf32> -> vector<16x1xf32>
    %377 = vector.broadcast %376 : vector<16x1xf32> to vector<16x16xf32>
    %378 = arith.mulf %373, %377 : vector<16x16xf32>
    %cst_140 = arith.constant dense<0.000000e+00> : vector<16x8xf32>
    %379 = tpu.matmul %378, %364, %cst_140 {dimension_numbers = #tpu.dot_dimension_numbers<[1], [0], [0], [1], [0, 0, 1, 1], [], []>} : vector<16x16xf32>, vector<16x8xf32>, vector<16x8xf32> -> vector<16x8xf32>
    %380 = vector.extract_strided_slice %317 {offsets = [16, 0], sizes = [8, 32], strides = [1, 1]} : vector<32x32xf32> to vector<8x32xf32>
    %cst_141 = arith.constant dense<0.000000e+00> : vector<16x32xf32>
    %381 = tpu.matmul %379, %380, %cst_141 {dimension_numbers = #tpu.dot_dimension_numbers<[1], [0], [0], [1], [0, 0, 1, 1], [], []>} : vector<16x8xf32>, vector<8x32xf32>, vector<16x32xf32> -> vector<16x32xf32>
    %382 = arith.addf %361, %381 : vector<16x32xf32>
    %383 = vector.extract_strided_slice %313 {offsets = [0, 24], sizes = [16, 8], strides = [1, 1]} : vector<16x32xf32> to vector<16x8xf32>
    %384 = vector.extract_strided_slice %314 {offsets = [0, 24], sizes = [16, 8], strides = [1, 1]} : vector<16x32xf32> to vector<16x8xf32>
    %385 = vector.extract_strided_slice %315 {offsets = [0, 24], sizes = [16, 8], strides = [1, 1]} : vector<16x32xf32> to vector<16x8xf32>
    %cst_142 = arith.constant dense<0.000000e+00> : vector<16x16xf32>
    %386 = tpu.matmul %383, %384, %cst_142 {dimension_numbers = #tpu.dot_dimension_numbers<[1], [1], [0], [0], [0, 0, 1, 0], [], []>} : vector<16x8xf32>, vector<16x8xf32>, vector<16x16xf32> -> vector<16x16xf32>
    %cst_143 = arith.constant 0.353553385 : f32
    %387 = vector.broadcast %cst_143 : f32 to vector<16x16xf32>
    %388 = arith.mulf %386, %387 : vector<16x16xf32>
    %389 = arith.addf %388, %1 : vector<16x16xf32>
    %cst_144 = arith.constant dense<0xFF800000> : vector<16xf32>
    %390 = vector.multi_reduction <maximumf>, %389, %cst_144 [1] : vector<16x16xf32> to vector<16xf32>
    %391 = vector.shape_cast %390 : vector<16xf32> to vector<16x1xf32>
    %392 = vector.broadcast %391 : vector<16x1xf32> to vector<16x16xf32>
    %393 = arith.subf %389, %392 : vector<16x16xf32>
    %394 = math.exp %393 : vector<16x16xf32>
    %cst_145 = arith.constant dense<0.000000e+00> : vector<16xf32>
    %395 = vector.multi_reduction <add>, %394, %cst_145 [1] : vector<16x16xf32> to vector<16xf32>
    %396 = vector.shape_cast %395 : vector<16xf32> to vector<16x1xf32>
    %397 = tpu.reciprocal %396 {approx = true} : vector<16x1xf32> -> vector<16x1xf32>
    %398 = vector.broadcast %397 : vector<16x1xf32> to vector<16x16xf32>
    %399 = arith.mulf %394, %398 : vector<16x16xf32>
    %cst_146 = arith.constant dense<0.000000e+00> : vector<16x8xf32>
    %400 = tpu.matmul %399, %385, %cst_146 {dimension_numbers = #tpu.dot_dimension_numbers<[1], [0], [0], [1], [0, 0, 1, 1], [], []>} : vector<16x16xf32>, vector<16x8xf32>, vector<16x8xf32> -> vector<16x8xf32>
    %401 = vector.extract_strided_slice %317 {offsets = [24, 0], sizes = [8, 32], strides = [1, 1]} : vector<32x32xf32> to vector<8x32xf32>
    %cst_147 = arith.constant dense<0.000000e+00> : vector<16x32xf32>
    %402 = tpu.matmul %400, %401, %cst_147 {dimension_numbers = #tpu.dot_dimension_numbers<[1], [0], [0], [1], [0, 0, 1, 1], [], []>} : vector<16x8xf32>, vector<8x32xf32>, vector<16x32xf32> -> vector<16x32xf32>
    %403 = arith.addf %382, %402 : vector<16x32xf32>
    %404 = vector.broadcast %318 : vector<1x32xf32> to vector<16x32xf32>
    %405 = arith.addf %403, %404 : vector<16x32xf32>
    %406 = arith.addf %306, %405 : vector<16x32xf32>
    %407 = vector.extract_strided_slice %9 {offsets = [1, 0], sizes = [1, 32], strides = [1, 1]} : vector<2x32xf32> to vector<1x32xf32>
    %408 = vector.extract_strided_slice %10 {offsets = [1, 0], sizes = [1, 32], strides = [1, 1]} : vector<2x32xf32> to vector<1x32xf32>
    %cst_148 = arith.constant dense<0.000000e+00> : vector<16xf32>
    %409 = vector.multi_reduction <add>, %406, %cst_148 [1] : vector<16x32xf32> to vector<16xf32>
    %410 = vector.shape_cast %409 : vector<16xf32> to vector<16x1xf32>
    %cst_149 = arith.constant 3.200000e+01 : f32
    %411 = vector.broadcast %cst_149 : f32 to vector<16x1xf32>
    %412 = arith.divf %410, %411 : vector<16x1xf32>
    %413 = vector.broadcast %412 : vector<16x1xf32> to vector<16x32xf32>
    %414 = arith.subf %406, %413 : vector<16x32xf32>
    %415 = arith.mulf %414, %414 : vector<16x32xf32>
    %cst_150 = arith.constant dense<0.000000e+00> : vector<16xf32>
    %416 = vector.multi_reduction <add>, %415, %cst_150 [1] : vector<16x32xf32> to vector<16xf32>
    %417 = vector.shape_cast %416 : vector<16xf32> to vector<16x1xf32>
    %cst_151 = arith.constant 3.200000e+01 : f32
    %418 = vector.broadcast %cst_151 : f32 to vector<16x1xf32>
    %419 = arith.divf %417, %418 : vector<16x1xf32>
    %420 = vector.broadcast %412 : vector<16x1xf32> to vector<16x32xf32>
    %421 = arith.subf %406, %420 : vector<16x32xf32>
    %cst_152 = arith.constant 9.99999974E-6 : f32
    %422 = vector.broadcast %cst_152 : f32 to vector<16x1xf32>
    %423 = arith.addf %419, %422 : vector<16x1xf32>
    %424 = math.rsqrt %423 : vector<16x1xf32>
    %425 = vector.broadcast %424 : vector<16x1xf32> to vector<16x32xf32>
    %426 = arith.mulf %421, %425 : vector<16x32xf32>
    %427 = vector.broadcast %407 : vector<1x32xf32> to vector<16x32xf32>
    %428 = arith.mulf %426, %427 : vector<16x32xf32>
    %429 = vector.broadcast %408 : vector<1x32xf32> to vector<16x32xf32>
    %430 = arith.addf %428, %429 : vector<16x32xf32>
    %c1_153 = arith.constant 1 : index
    %c0_154 = arith.constant 0 : index
    %c0_155 = arith.constant 0 : index
    %431 = vector.load %arg8[%c1_153, %c0_154, %c0_155] : memref<2x32x96xf32, #tpu.memory_space<vmem>>, vector<1x32x96xf32>
    %432 = vector.shape_cast %431 : vector<1x32x96xf32> to vector<32x96xf32>
    %433 = vector.extract_strided_slice %432 {offsets = [0, 0], sizes = [32, 32], strides = [1, 1]} : vector<32x96xf32> to vector<32x32xf32>
    %cst_156 = arith.constant dense<0.000000e+00> : vector<16x32xf32>
    %434 = tpu.matmul %430, %433, %cst_156 {dimension_numbers = #tpu.dot_dimension_numbers<[1], [0], [0], [1], [0, 0, 1, 1], [], []>} : vector<16x32xf32>, vector<32x32xf32>, vector<16x32xf32> -> vector<16x32xf32>
    %435 = vector.extract_strided_slice %5 {offsets = [1, 0], sizes = [1, 32], strides = [1, 1]} : vector<2x96xf32> to vector<1x32xf32>
    %436 = vector.broadcast %435 : vector<1x32xf32> to vector<16x32xf32>
    %437 = arith.addf %434, %436 : vector<16x32xf32>
    %438 = vector.extract_strided_slice %432 {offsets = [0, 32], sizes = [32, 64], strides = [1, 1]} : vector<32x96xf32> to vector<32x64xf32>
    %cst_157 = arith.constant dense<0.000000e+00> : vector<16x64xf32>
    %439 = tpu.matmul %0, %438, %cst_157 {dimension_numbers = #tpu.dot_dimension_numbers<[1], [0], [0], [1], [0, 0, 1, 1], [], []>} : vector<16x32xf32>, vector<32x64xf32>, vector<16x64xf32> -> vector<16x64xf32>
    %440 = vector.extract_strided_slice %5 {offsets = [1, 32], sizes = [1, 64], strides = [1, 1]} : vector<2x96xf32> to vector<1x64xf32>
    %441 = vector.broadcast %440 : vector<1x64xf32> to vector<16x64xf32>
    %442 = arith.addf %439, %441 : vector<16x64xf32>
    %443 = vector.extract_strided_slice %442 {offsets = [0, 0], sizes = [16, 32], strides = [1, 1]} : vector<16x64xf32> to vector<16x32xf32>
    %444 = vector.extract_strided_slice %442 {offsets = [0, 32], sizes = [16, 32], strides = [1, 1]} : vector<16x64xf32> to vector<16x32xf32>
    %c1_158 = arith.constant 1 : index
    %c0_159 = arith.constant 0 : index
    %c0_160 = arith.constant 0 : index
    %445 = vector.load %arg10[%c1_158, %c0_159, %c0_160] : memref<2x32x32xf32, #tpu.memory_space<vmem>>, vector<1x32x32xf32>
    %446 = vector.shape_cast %445 : vector<1x32x32xf32> to vector<32x32xf32>
    %447 = vector.extract_strided_slice %6 {offsets = [1, 0], sizes = [1, 32], strides = [1, 1]} : vector<2x32xf32> to vector<1x32xf32>
    %cst_161 = arith.constant 0.000000e+00 : f32
    %448 = vector.broadcast %cst_161 : f32 to vector<16x32xf32>
    %449 = vector.extract_strided_slice %437 {offsets = [0, 0], sizes = [16, 8], strides = [1, 1]} : vector<16x32xf32> to vector<16x8xf32>
    %450 = vector.extract_strided_slice %443 {offsets = [0, 0], sizes = [16, 8], strides = [1, 1]} : vector<16x32xf32> to vector<16x8xf32>
    %451 = vector.extract_strided_slice %444 {offsets = [0, 0], sizes = [16, 8], strides = [1, 1]} : vector<16x32xf32> to vector<16x8xf32>
    %cst_162 = arith.constant dense<0.000000e+00> : vector<16x16xf32>
    %452 = tpu.matmul %449, %450, %cst_162 {dimension_numbers = #tpu.dot_dimension_numbers<[1], [1], [0], [0], [0, 0, 1, 0], [], []>} : vector<16x8xf32>, vector<16x8xf32>, vector<16x16xf32> -> vector<16x16xf32>
    %cst_163 = arith.constant 0.353553385 : f32
    %453 = vector.broadcast %cst_163 : f32 to vector<16x16xf32>
    %454 = arith.mulf %452, %453 : vector<16x16xf32>
    %455 = arith.addf %454, %2 : vector<16x16xf32>
    %cst_164 = arith.constant dense<0xFF800000> : vector<16xf32>
    %456 = vector.multi_reduction <maximumf>, %455, %cst_164 [1] : vector<16x16xf32> to vector<16xf32>
    %457 = vector.shape_cast %456 : vector<16xf32> to vector<16x1xf32>
    %458 = vector.broadcast %457 : vector<16x1xf32> to vector<16x16xf32>
    %459 = arith.subf %455, %458 : vector<16x16xf32>
    %460 = math.exp %459 : vector<16x16xf32>
    %cst_165 = arith.constant dense<0.000000e+00> : vector<16xf32>
    %461 = vector.multi_reduction <add>, %460, %cst_165 [1] : vector<16x16xf32> to vector<16xf32>
    %462 = vector.shape_cast %461 : vector<16xf32> to vector<16x1xf32>
    %463 = tpu.reciprocal %462 {approx = true} : vector<16x1xf32> -> vector<16x1xf32>
    %464 = vector.broadcast %463 : vector<16x1xf32> to vector<16x16xf32>
    %465 = arith.mulf %460, %464 : vector<16x16xf32>
    %cst_166 = arith.constant dense<0.000000e+00> : vector<16x8xf32>
    %466 = tpu.matmul %465, %451, %cst_166 {dimension_numbers = #tpu.dot_dimension_numbers<[1], [0], [0], [1], [0, 0, 1, 1], [], []>} : vector<16x16xf32>, vector<16x8xf32>, vector<16x8xf32> -> vector<16x8xf32>
    %467 = vector.extract_strided_slice %446 {offsets = [0, 0], sizes = [8, 32], strides = [1, 1]} : vector<32x32xf32> to vector<8x32xf32>
    %cst_167 = arith.constant dense<0.000000e+00> : vector<16x32xf32>
    %468 = tpu.matmul %466, %467, %cst_167 {dimension_numbers = #tpu.dot_dimension_numbers<[1], [0], [0], [1], [0, 0, 1, 1], [], []>} : vector<16x8xf32>, vector<8x32xf32>, vector<16x32xf32> -> vector<16x32xf32>
    %469 = arith.addf %448, %468 : vector<16x32xf32>
    %470 = vector.extract_strided_slice %437 {offsets = [0, 8], sizes = [16, 8], strides = [1, 1]} : vector<16x32xf32> to vector<16x8xf32>
    %471 = vector.extract_strided_slice %443 {offsets = [0, 8], sizes = [16, 8], strides = [1, 1]} : vector<16x32xf32> to vector<16x8xf32>
    %472 = vector.extract_strided_slice %444 {offsets = [0, 8], sizes = [16, 8], strides = [1, 1]} : vector<16x32xf32> to vector<16x8xf32>
    %cst_168 = arith.constant dense<0.000000e+00> : vector<16x16xf32>
    %473 = tpu.matmul %470, %471, %cst_168 {dimension_numbers = #tpu.dot_dimension_numbers<[1], [1], [0], [0], [0, 0, 1, 0], [], []>} : vector<16x8xf32>, vector<16x8xf32>, vector<16x16xf32> -> vector<16x16xf32>
    %cst_169 = arith.constant 0.353553385 : f32
    %474 = vector.broadcast %cst_169 : f32 to vector<16x16xf32>
    %475 = arith.mulf %473, %474 : vector<16x16xf32>
    %476 = arith.addf %475, %2 : vector<16x16xf32>
    %cst_170 = arith.constant dense<0xFF800000> : vector<16xf32>
    %477 = vector.multi_reduction <maximumf>, %476, %cst_170 [1] : vector<16x16xf32> to vector<16xf32>
    %478 = vector.shape_cast %477 : vector<16xf32> to vector<16x1xf32>
    %479 = vector.broadcast %478 : vector<16x1xf32> to vector<16x16xf32>
    %480 = arith.subf %476, %479 : vector<16x16xf32>
    %481 = math.exp %480 : vector<16x16xf32>
    %cst_171 = arith.constant dense<0.000000e+00> : vector<16xf32>
    %482 = vector.multi_reduction <add>, %481, %cst_171 [1] : vector<16x16xf32> to vector<16xf32>
    %483 = vector.shape_cast %482 : vector<16xf32> to vector<16x1xf32>
    %484 = tpu.reciprocal %483 {approx = true} : vector<16x1xf32> -> vector<16x1xf32>
    %485 = vector.broadcast %484 : vector<16x1xf32> to vector<16x16xf32>
    %486 = arith.mulf %481, %485 : vector<16x16xf32>
    %cst_172 = arith.constant dense<0.000000e+00> : vector<16x8xf32>
    %487 = tpu.matmul %486, %472, %cst_172 {dimension_numbers = #tpu.dot_dimension_numbers<[1], [0], [0], [1], [0, 0, 1, 1], [], []>} : vector<16x16xf32>, vector<16x8xf32>, vector<16x8xf32> -> vector<16x8xf32>
    %488 = vector.extract_strided_slice %446 {offsets = [8, 0], sizes = [8, 32], strides = [1, 1]} : vector<32x32xf32> to vector<8x32xf32>
    %cst_173 = arith.constant dense<0.000000e+00> : vector<16x32xf32>
    %489 = tpu.matmul %487, %488, %cst_173 {dimension_numbers = #tpu.dot_dimension_numbers<[1], [0], [0], [1], [0, 0, 1, 1], [], []>} : vector<16x8xf32>, vector<8x32xf32>, vector<16x32xf32> -> vector<16x32xf32>
    %490 = arith.addf %469, %489 : vector<16x32xf32>
    %491 = vector.extract_strided_slice %437 {offsets = [0, 16], sizes = [16, 8], strides = [1, 1]} : vector<16x32xf32> to vector<16x8xf32>
    %492 = vector.extract_strided_slice %443 {offsets = [0, 16], sizes = [16, 8], strides = [1, 1]} : vector<16x32xf32> to vector<16x8xf32>
    %493 = vector.extract_strided_slice %444 {offsets = [0, 16], sizes = [16, 8], strides = [1, 1]} : vector<16x32xf32> to vector<16x8xf32>
    %cst_174 = arith.constant dense<0.000000e+00> : vector<16x16xf32>
    %494 = tpu.matmul %491, %492, %cst_174 {dimension_numbers = #tpu.dot_dimension_numbers<[1], [1], [0], [0], [0, 0, 1, 0], [], []>} : vector<16x8xf32>, vector<16x8xf32>, vector<16x16xf32> -> vector<16x16xf32>
    %cst_175 = arith.constant 0.353553385 : f32
    %495 = vector.broadcast %cst_175 : f32 to vector<16x16xf32>
    %496 = arith.mulf %494, %495 : vector<16x16xf32>
    %497 = arith.addf %496, %2 : vector<16x16xf32>
    %cst_176 = arith.constant dense<0xFF800000> : vector<16xf32>
    %498 = vector.multi_reduction <maximumf>, %497, %cst_176 [1] : vector<16x16xf32> to vector<16xf32>
    %499 = vector.shape_cast %498 : vector<16xf32> to vector<16x1xf32>
    %500 = vector.broadcast %499 : vector<16x1xf32> to vector<16x16xf32>
    %501 = arith.subf %497, %500 : vector<16x16xf32>
    %502 = math.exp %501 : vector<16x16xf32>
    %cst_177 = arith.constant dense<0.000000e+00> : vector<16xf32>
    %503 = vector.multi_reduction <add>, %502, %cst_177 [1] : vector<16x16xf32> to vector<16xf32>
    %504 = vector.shape_cast %503 : vector<16xf32> to vector<16x1xf32>
    %505 = tpu.reciprocal %504 {approx = true} : vector<16x1xf32> -> vector<16x1xf32>
    %506 = vector.broadcast %505 : vector<16x1xf32> to vector<16x16xf32>
    %507 = arith.mulf %502, %506 : vector<16x16xf32>
    %cst_178 = arith.constant dense<0.000000e+00> : vector<16x8xf32>
    %508 = tpu.matmul %507, %493, %cst_178 {dimension_numbers = #tpu.dot_dimension_numbers<[1], [0], [0], [1], [0, 0, 1, 1], [], []>} : vector<16x16xf32>, vector<16x8xf32>, vector<16x8xf32> -> vector<16x8xf32>
    %509 = vector.extract_strided_slice %446 {offsets = [16, 0], sizes = [8, 32], strides = [1, 1]} : vector<32x32xf32> to vector<8x32xf32>
    %cst_179 = arith.constant dense<0.000000e+00> : vector<16x32xf32>
    %510 = tpu.matmul %508, %509, %cst_179 {dimension_numbers = #tpu.dot_dimension_numbers<[1], [0], [0], [1], [0, 0, 1, 1], [], []>} : vector<16x8xf32>, vector<8x32xf32>, vector<16x32xf32> -> vector<16x32xf32>
    %511 = arith.addf %490, %510 : vector<16x32xf32>
    %512 = vector.extract_strided_slice %437 {offsets = [0, 24], sizes = [16, 8], strides = [1, 1]} : vector<16x32xf32> to vector<16x8xf32>
    %513 = vector.extract_strided_slice %443 {offsets = [0, 24], sizes = [16, 8], strides = [1, 1]} : vector<16x32xf32> to vector<16x8xf32>
    %514 = vector.extract_strided_slice %444 {offsets = [0, 24], sizes = [16, 8], strides = [1, 1]} : vector<16x32xf32> to vector<16x8xf32>
    %cst_180 = arith.constant dense<0.000000e+00> : vector<16x16xf32>
    %515 = tpu.matmul %512, %513, %cst_180 {dimension_numbers = #tpu.dot_dimension_numbers<[1], [1], [0], [0], [0, 0, 1, 0], [], []>} : vector<16x8xf32>, vector<16x8xf32>, vector<16x16xf32> -> vector<16x16xf32>
    %cst_181 = arith.constant 0.353553385 : f32
    %516 = vector.broadcast %cst_181 : f32 to vector<16x16xf32>
    %517 = arith.mulf %515, %516 : vector<16x16xf32>
    %518 = arith.addf %517, %2 : vector<16x16xf32>
    %cst_182 = arith.constant dense<0xFF800000> : vector<16xf32>
    %519 = vector.multi_reduction <maximumf>, %518, %cst_182 [1] : vector<16x16xf32> to vector<16xf32>
    %520 = vector.shape_cast %519 : vector<16xf32> to vector<16x1xf32>
    %521 = vector.broadcast %520 : vector<16x1xf32> to vector<16x16xf32>
    %522 = arith.subf %518, %521 : vector<16x16xf32>
    %523 = math.exp %522 : vector<16x16xf32>
    %cst_183 = arith.constant dense<0.000000e+00> : vector<16xf32>
    %524 = vector.multi_reduction <add>, %523, %cst_183 [1] : vector<16x16xf32> to vector<16xf32>
    %525 = vector.shape_cast %524 : vector<16xf32> to vector<16x1xf32>
    %526 = tpu.reciprocal %525 {approx = true} : vector<16x1xf32> -> vector<16x1xf32>
    %527 = vector.broadcast %526 : vector<16x1xf32> to vector<16x16xf32>
    %528 = arith.mulf %523, %527 : vector<16x16xf32>
    %cst_184 = arith.constant dense<0.000000e+00> : vector<16x8xf32>
    %529 = tpu.matmul %528, %514, %cst_184 {dimension_numbers = #tpu.dot_dimension_numbers<[1], [0], [0], [1], [0, 0, 1, 1], [], []>} : vector<16x16xf32>, vector<16x8xf32>, vector<16x8xf32> -> vector<16x8xf32>
    %530 = vector.extract_strided_slice %446 {offsets = [24, 0], sizes = [8, 32], strides = [1, 1]} : vector<32x32xf32> to vector<8x32xf32>
    %cst_185 = arith.constant dense<0.000000e+00> : vector<16x32xf32>
    %531 = tpu.matmul %529, %530, %cst_185 {dimension_numbers = #tpu.dot_dimension_numbers<[1], [0], [0], [1], [0, 0, 1, 1], [], []>} : vector<16x8xf32>, vector<8x32xf32>, vector<16x32xf32> -> vector<16x32xf32>
    %532 = arith.addf %511, %531 : vector<16x32xf32>
    %533 = vector.broadcast %447 : vector<1x32xf32> to vector<16x32xf32>
    %534 = arith.addf %532, %533 : vector<16x32xf32>
    %535 = arith.addf %430, %534 : vector<16x32xf32>
    %536 = vector.extract_strided_slice %11 {offsets = [1, 0], sizes = [1, 32], strides = [1, 1]} : vector<2x32xf32> to vector<1x32xf32>
    %537 = vector.extract_strided_slice %12 {offsets = [1, 0], sizes = [1, 32], strides = [1, 1]} : vector<2x32xf32> to vector<1x32xf32>
    %cst_186 = arith.constant dense<0.000000e+00> : vector<16xf32>
    %538 = vector.multi_reduction <add>, %535, %cst_186 [1] : vector<16x32xf32> to vector<16xf32>
    %539 = vector.shape_cast %538 : vector<16xf32> to vector<16x1xf32>
    %cst_187 = arith.constant 3.200000e+01 : f32
    %540 = vector.broadcast %cst_187 : f32 to vector<16x1xf32>
    %541 = arith.divf %539, %540 : vector<16x1xf32>
    %542 = vector.broadcast %541 : vector<16x1xf32> to vector<16x32xf32>
    %543 = arith.subf %535, %542 : vector<16x32xf32>
    %544 = arith.mulf %543, %543 : vector<16x32xf32>
    %cst_188 = arith.constant dense<0.000000e+00> : vector<16xf32>
    %545 = vector.multi_reduction <add>, %544, %cst_188 [1] : vector<16x32xf32> to vector<16xf32>
    %546 = vector.shape_cast %545 : vector<16xf32> to vector<16x1xf32>
    %cst_189 = arith.constant 3.200000e+01 : f32
    %547 = vector.broadcast %cst_189 : f32 to vector<16x1xf32>
    %548 = arith.divf %546, %547 : vector<16x1xf32>
    %549 = vector.broadcast %541 : vector<16x1xf32> to vector<16x32xf32>
    %550 = arith.subf %535, %549 : vector<16x32xf32>
    %cst_190 = arith.constant 9.99999974E-6 : f32
    %551 = vector.broadcast %cst_190 : f32 to vector<16x1xf32>
    %552 = arith.addf %548, %551 : vector<16x1xf32>
    %553 = math.rsqrt %552 : vector<16x1xf32>
    %554 = vector.broadcast %553 : vector<16x1xf32> to vector<16x32xf32>
    %555 = arith.mulf %550, %554 : vector<16x32xf32>
    %556 = vector.broadcast %536 : vector<1x32xf32> to vector<16x32xf32>
    %557 = arith.mulf %555, %556 : vector<16x32xf32>
    %558 = vector.broadcast %537 : vector<1x32xf32> to vector<16x32xf32>
    %559 = arith.addf %557, %558 : vector<16x32xf32>
    %c1_191 = arith.constant 1 : index
    %c0_192 = arith.constant 0 : index
    %c0_193 = arith.constant 0 : index
    %560 = vector.load %arg12[%c1_191, %c0_192, %c0_193] : memref<2x32x64xf32, #tpu.memory_space<vmem>>, vector<1x32x64xf32>
    %561 = vector.shape_cast %560 : vector<1x32x64xf32> to vector<32x64xf32>
    %cst_194 = arith.constant dense<0.000000e+00> : vector<16x64xf32>
    %562 = tpu.matmul %559, %561, %cst_194 {dimension_numbers = #tpu.dot_dimension_numbers<[1], [0], [0], [1], [0, 0, 1, 1], [], []>} : vector<16x32xf32>, vector<32x64xf32>, vector<16x64xf32> -> vector<16x64xf32>
    %563 = vector.extract_strided_slice %7 {offsets = [1, 0], sizes = [1, 64], strides = [1, 1]} : vector<2x64xf32> to vector<1x64xf32>
    %564 = vector.broadcast %563 : vector<1x64xf32> to vector<16x64xf32>
    %565 = arith.addf %562, %564 : vector<16x64xf32>
    %cst_195 = arith.constant 0.000000e+00 : f32
    %566 = vector.broadcast %cst_195 : f32 to vector<16x64xf32>
    %567 = arith.maximumf %565, %566 : vector<16x64xf32>
    %c1_196 = arith.constant 1 : index
    %c0_197 = arith.constant 0 : index
    %c0_198 = arith.constant 0 : index
    %568 = vector.load %arg14[%c1_196, %c0_197, %c0_198] : memref<2x64x32xf32, #tpu.memory_space<vmem>>, vector<1x64x32xf32>
    %569 = vector.shape_cast %568 : vector<1x64x32xf32> to vector<64x32xf32>
    %cst_199 = arith.constant dense<0.000000e+00> : vector<16x32xf32>
    %570 = tpu.matmul %567, %569, %cst_199 {dimension_numbers = #tpu.dot_dimension_numbers<[1], [0], [0], [1], [0, 0, 1, 1], [], []>} : vector<16x64xf32>, vector<64x32xf32>, vector<16x32xf32> -> vector<16x32xf32>
    %571 = vector.extract_strided_slice %8 {offsets = [1, 0], sizes = [1, 32], strides = [1, 1]} : vector<2x32xf32> to vector<1x32xf32>
    %572 = vector.broadcast %571 : vector<1x32xf32> to vector<16x32xf32>
    %573 = arith.addf %570, %572 : vector<16x32xf32>
    %574 = arith.addf %559, %573 : vector<16x32xf32>
    %575 = vector.extract_strided_slice %13 {offsets = [1, 0], sizes = [1, 32], strides = [1, 1]} : vector<2x32xf32> to vector<1x32xf32>
    %576 = vector.extract_strided_slice %14 {offsets = [1, 0], sizes = [1, 32], strides = [1, 1]} : vector<2x32xf32> to vector<1x32xf32>
    %cst_200 = arith.constant dense<0.000000e+00> : vector<16xf32>
    %577 = vector.multi_reduction <add>, %574, %cst_200 [1] : vector<16x32xf32> to vector<16xf32>
    %578 = vector.shape_cast %577 : vector<16xf32> to vector<16x1xf32>
    %cst_201 = arith.constant 3.200000e+01 : f32
    %579 = vector.broadcast %cst_201 : f32 to vector<16x1xf32>
    %580 = arith.divf %578, %579 : vector<16x1xf32>
    %581 = vector.broadcast %580 : vector<16x1xf32> to vector<16x32xf32>
    %582 = arith.subf %574, %581 : vector<16x32xf32>
    %583 = arith.mulf %582, %582 : vector<16x32xf32>
    %cst_202 = arith.constant dense<0.000000e+00> : vector<16xf32>
    %584 = vector.multi_reduction <add>, %583, %cst_202 [1] : vector<16x32xf32> to vector<16xf32>
    %585 = vector.shape_cast %584 : vector<16xf32> to vector<16x1xf32>
    %cst_203 = arith.constant 3.200000e+01 : f32
    %586 = vector.broadcast %cst_203 : f32 to vector<16x1xf32>
    %587 = arith.divf %585, %586 : vector<16x1xf32>
    %588 = vector.broadcast %580 : vector<16x1xf32> to vector<16x32xf32>
    %589 = arith.subf %574, %588 : vector<16x32xf32>
    %cst_204 = arith.constant 9.99999974E-6 : f32
    %590 = vector.broadcast %cst_204 : f32 to vector<16x1xf32>
    %591 = arith.addf %587, %590 : vector<16x1xf32>
    %592 = math.rsqrt %591 : vector<16x1xf32>
    %593 = vector.broadcast %592 : vector<16x1xf32> to vector<16x32xf32>
    %594 = arith.mulf %589, %593 : vector<16x32xf32>
    %595 = vector.broadcast %575 : vector<1x32xf32> to vector<16x32xf32>
    %596 = arith.mulf %594, %595 : vector<16x32xf32>
    %597 = vector.broadcast %576 : vector<1x32xf32> to vector<16x32xf32>
    %598 = arith.addf %596, %597 : vector<16x32xf32>
    %c0_205 = arith.constant 0 : index
    %c0_206 = arith.constant 0 : index
    %599 = vector.load %arg22[%c0_205, %c0_206] : memref<32x128xf32, #tpu.memory_space<vmem>>, vector<32x128xf32>
    %cst_207 = arith.constant dense<0.000000e+00> : vector<16x128xf32>
    %600 = tpu.matmul %598, %599, %cst_207 {dimension_numbers = #tpu.dot_dimension_numbers<[1], [0], [0], [1], [0, 0, 1, 1], [], []>} : vector<16x32xf32>, vector<32x128xf32>, vector<16x128xf32> -> vector<16x128xf32>
    %c0_208 = arith.constant 0 : index
    %c0_209 = arith.constant 0 : index
    %601 = vector.load %arg23[%c0_208, %c0_209] : memref<1x128xf32, #tpu.memory_space<vmem>>, vector<1x128xf32>
    %602 = vector.broadcast %601 : vector<1x128xf32> to vector<16x128xf32>
    %603 = arith.addf %600, %602 : vector<16x128xf32>
    %c0_210 = arith.constant 0 : index
    %c0_211 = arith.constant 0 : index
    %604 = vector.load %arg24[%c0_210, %c0_211] : memref<16x128xf32, #tpu.memory_space<vmem>>, vector<16x128xf32>
    tpu.vector_store %arg24[%c0_210, %c0_211], %603 {strides = array<i32>} : memref<16x128xf32, #tpu.memory_space<vmem>>, vector<16x128xf32>,
    return
  }
  func.func @transform_0(%arg0: i32) -> (i32, i32) {
    %c0_i32 = arith.constant 0 : i32
    %c0_i32_0 = arith.constant 0 : i32
    %c0_i32_1 = arith.constant 0 : i32
    return %c0_i32, %c0_i32_0 : i32, i32
  }
  func.func @transform_1(%arg0: i32) -> (i32, i32) {
    %c0_i32 = arith.constant 0 : i32
    %c0_i32_0 = arith.constant 0 : i32
    %c0_i32_1 = arith.constant 0 : i32
    return %c0_i32, %c0_i32_0 : i32, i32
  }
  func.func @transform_2(%arg0: i32) -> (i32, i32) {
    %c0_i32 = arith.constant 0 : i32
    %c0_i32_0 = arith.constant 0 : i32
    %c0_i32_1 = arith.constant 0 : i32
    return %c0_i32, %c0_i32_0 : i32, i32
  }
  func.func @transform_3(%arg0: i32) -> (i32, i32, i32) {
    %c0_i32 = arith.constant 0 : i32
    %c0_i32_0 = arith.constant 0 : i32
    %c0_i32_1 = arith.constant 0 : i32
    %c0_i32_2 = arith.constant 0 : i32
    return %c0_i32, %c0_i32_0, %c0_i32_1 : i32, i32, i32
  }
  func.func @transform_4(%arg0: i32) -> (i32, i32) {
    %c0_i32 = arith.constant 0 : i32
    %c0_i32_0 = arith.constant 0 : i32
    %c0_i32_1 = arith.constant 0 : i32
    return %c0_i32, %c0_i32_0 : i32, i32
  }
  func.func @transform_5(%arg0: i32) -> (i32, i32, i32) {
    %c0_i32 = arith.constant 0 : i32
    %c0_i32_0 = arith.constant 0 : i32
    %c0_i32_1 = arith.constant 0 : i32
    %c0_i32_2 = arith.constant 0 : i32
    return %c0_i32, %c0_i32_0, %c0_i32_1 : i32, i32, i32
  }
  func.func @transform_6(%arg0: i32) -> (i32, i32) {
    %c0_i32 = arith.constant 0 : i32
    %c0_i32_0 = arith.constant 0 : i32
    %c0_i32_1 = arith.constant 0 : i32
    return %c0_i32, %c0_i32_0 : i32, i32
  }
  func.func @transform_7(%arg0: i32) -> (i32, i32, i32) {
    %c0_i32 = arith.constant 0 : i32
    %c0_i32_0 = arith.constant 0 : i32
    %c0_i32_1 = arith.constant 0 : i32
    %c0_i32_2 = arith.constant 0 : i32
    return %c0_i32, %c0_i32_0, %c0_i32_1 : i32, i32, i32
  }
  func.func @transform_8(%arg0: i32) -> (i32, i32) {
    %c0_i32 = arith.constant 0 : i32
    %c0_i32_0 = arith.constant 0 : i32
    %c0_i32_1 = arith.constant 0 : i32
    return %c0_i32, %c0_i32_0 : i32, i32
  }
  func.func @transform_9(%arg0: i32) -> (i32, i32, i32) {
    %c0_i32 = arith.constant 0 : i32
    %c0_i32_0 = arith.constant 0 : i32
    %c0_i32_1 = arith.constant 0 : i32
    %c0_i32_2 = arith.constant 0 : i32
    return %c0_i32, %c0_i32_0, %c0_i32_1 : i32, i32, i32
  }
  func.func @transform_10(%arg0: i32) -> (i32, i32) {
    %c0_i32 = arith.constant 0 : i32
    %c0_i32_0 = arith.constant 0 : i32
    %c0_i32_1 = arith.constant 0 : i32
    return %c0_i32, %c0_i32_0 : i32, i32
  }
  func.func @transform_11(%arg0: i32) -> (i32, i32, i32) {
    %c0_i32 = arith.constant 0 : i32
    %c0_i32_0 = arith.constant 0 : i32
    %c0_i32_1 = arith.constant 0 : i32
    %c0_i32_2 = arith.constant 0 : i32
    return %c0_i32, %c0_i32_0, %c0_i32_1 : i32, i32, i32
  }
  func.func @transform_12(%arg0: i32) -> (i32, i32) {
    %c0_i32 = arith.constant 0 : i32
    %c0_i32_0 = arith.constant 0 : i32
    %c0_i32_1 = arith.constant 0 : i32
    return %c0_i32, %c0_i32_0 : i32, i32
  }
  func.func @transform_13(%arg0: i32) -> (i32, i32, i32) {
    %c0_i32 = arith.constant 0 : i32
    %c0_i32_0 = arith.constant 0 : i32
    %c0_i32_1 = arith.constant 0 : i32
    %c0_i32_2 = arith.constant 0 : i32
    return %c0_i32, %c0_i32_0, %c0_i32_1 : i32, i32, i32
  }
  func.func @transform_14(%arg0: i32) -> (i32, i32) {
    %c0_i32 = arith.constant 0 : i32
    %c0_i32_0 = arith.constant 0 : i32
    %c0_i32_1 = arith.constant 0 : i32
    return %c0_i32, %c0_i32_0 : i32, i32
  }
  func.func @transform_15(%arg0: i32) -> (i32, i32) {
    %c0_i32 = arith.constant 0 : i32
    %c0_i32_0 = arith.constant 0 : i32
    %c0_i32_1 = arith.constant 0 : i32
    return %c0_i32, %c0_i32_0 : i32, i32
  }
  func.func @transform_16(%arg0: i32) -> (i32, i32) {
    %c0_i32 = arith.constant 0 : i32
    %c0_i32_0 = arith.constant 0 : i32
    %c0_i32_1 = arith.constant 0 : i32
    return %c0_i32, %c0_i32_0 : i32, i32
  }
  func.func @transform_17(%arg0: i32) -> (i32, i32) {
    %c0_i32 = arith.constant 0 : i32
    %c0_i32_0 = arith.constant 0 : i32
    %c0_i32_1 = arith.constant 0 : i32
    return %c0_i32, %c0_i32_0 : i32, i32
  }
  func.func @transform_18(%arg0: i32) -> (i32, i32) {
    %c0_i32 = arith.constant 0 : i32
    %c0_i32_0 = arith.constant 0 : i32
    %c0_i32_1 = arith.constant 0 : i32
    return %c0_i32, %c0_i32_0 : i32, i32
  }
  func.func @transform_19(%arg0: i32) -> (i32, i32) {
    %c0_i32 = arith.constant 0 : i32
    %c0_i32_0 = arith.constant 0 : i32
    %c0_i32_1 = arith.constant 0 : i32
    return %c0_i32, %c0_i32_0 : i32, i32
  }
  func.func @transform_20(%arg0: i32) -> (i32, i32) {
    %c0_i32 = arith.constant 0 : i32
    %c0_i32_0 = arith.constant 0 : i32
    %c0_i32_1 = arith.constant 0 : i32
    return %c0_i32, %c0_i32_0 : i32, i32
  }
  func.func @transform_21(%arg0: i32) -> (i32, i32) {
    %c0_i32 = arith.constant 0 : i32
    %c0_i32_0 = arith.constant 0 : i32
    %c0_i32_1 = arith.constant 0 : i32
    return %c0_i32, %c0_i32_0 : i32, i32
  }
  func.func @transform_22(%arg0: i32) -> (i32, i32) {
    %c0_i32 = arith.constant 0 : i32
    %c0_i32_0 = arith.constant 0 : i32
    %c0_i32_1 = arith.constant 0 : i32
    return %c0_i32, %c0_i32_0 : i32, i32
  }
  func.func @transform_23(%arg0: i32) -> (i32, i32) {
    %c0_i32 = arith.constant 0 : i32
    %c0_i32_0 = arith.constant 0 : i32
    %c0_i32_1 = arith.constant 0 : i32
    return %c0_i32, %c0_i32_0 : i32, i32
  }
}

</mosaic_0001>

<bundles_post_ra>
// kernel: outline_transformer_forward.1
= control target key start
LH: loop header
LB: loop body
LE: loop exit
PB: predicated region body
PF: predicated region fallthrough
CT: control target
= control target key end

     0   :  { %s8491_s0 = inlined_call_operand.vmem [shape: f32[16,32], index: 0, kind: input, shape index: {}]   ;;  %s8492_s1 = inlined_call_operand.vmem [shape: f32[16,16], index: 1, kind: input, shape index: {}]   ;;  %s8493_s2 = inlined_call_operand.vmem [shape: f32[16,16], index: 2, kind: input, shape index: {}]   ;;  %s8494_s3 = inlined_call_operand.vmem [shape: f32[2,32,96], index: 3, kind: input, shape index: {}]   ;;  %s8495_s4 = inlined_call_operand.vmem [shape: f32[2,96], index: 4, kind: input, shape index: {}]   ;;  %s8496_s5 = inlined_call_operand.vmem [shape: f32[2,32,32], index: 5, kind: input, shape index: {}]   ;;  %s8497_s6 = inlined_call_operand.vmem [shape: f32[2,32], index: 6, kind: input, shape index: {}]   ;;  %s8498_s7 = inlined_call_operand.vmem [shape: f32[2,32,96], index: 7, kind: input, shape index: {}]   ;;  %s8499_s8 = inlined_call_operand.vmem [shape: f32[2,96], index: 8, kind: input, shape index: {}]   ;;  %s8500_s9 = inlined_call_operand.vmem [shape: f32[2,32,32], index: 9, kind: input, shape index: {}]   ;;  %s8501_s10 = inlined_call_operand.vmem [shape: f32[2,32], index: 10, kind: input, shape index: {}]   ;;  %s8502_s11 = inlined_call_operand.vmem [shape: f32[2,32,64], index: 11, kind: input, shape index: {}]   ;;  %s8503_s12 = inlined_call_operand.vmem [shape: f32[2,64], index: 12, kind: input, shape index: {}]   ;;  %s8504_s13 = inlined_call_operand.vmem [shape: f32[2,64,32], index: 13, kind: input, shape index: {}]   ;;  %s8505_s14 = inlined_call_operand.vmem [shape: f32[2,32], index: 14, kind: input, shape index: {}]   ;;  %s8506_s15 = inlined_call_operand.vmem [shape: f32[2,32], index: 15, kind: input, shape index: {}]   ;;  %s8507_s16 = inlined_call_operand.vmem [shape: f32[2,32], index: 16, kind: input, shape index: {}]   ;;  %s8508_s17 = inlined_call_operand.vmem [shape: f32[2,32], index: 17, kind: input, shape index: {}]   ;;  %s8509_s18 = inlined_call_operand.vmem [shape: f32[2,32], index: 18, kind: input, shape index: {}]   ;;  %s8510_s19 = inlined_call_operand.vmem [shape: f32[2,32], index: 19, kind: input, shape index: {}]   ;;  %s8511_s20 = inlined_call_operand.vmem [shape: f32[2,32], index: 20, kind: input, shape index: {}]   ;;  %s8512_s21 = inlined_call_operand.vmem [shape: f32[32,128], index: 21, kind: input, shape index: {}]   ;;  %s8513_s22 = inlined_call_operand.vmem [shape: f32[1,128], index: 22, kind: input, shape index: {}]   ;;  %s8514_s23 = inlined_call_operand.hbm [shape: f32[16,128], index: 23, kind: output, shape index: {}]  }
   0x1   :  { %8549 = sst [smem:[#allocation5_spill]] %s8491_s0 }
   0x2   :  { %8550 = sst [smem:[#allocation6_spill]] %s8492_s1 }
   0x3   :  { %8551 = sst [smem:[#allocation7_spill]] %s8493_s2 }
   0x4   :  { %8552 = sst [smem:[#allocation8_spill]] %s8494_s3 }
   0x5   :  { %8553 = sst [smem:[#allocation9_spill]] %s8495_s4 }
   0x6   :  { %8554 = sst [smem:[#allocation10_spill]] %s8496_s5 }
   0x7   :  { %8555 = sst [smem:[#allocation11_spill]] %s8497_s6 }
   0x8   :  { %8556 = sst [smem:[#allocation12_spill]] %s8498_s7 }
   0x9   :  { %8557 = sst [smem:[#allocation13_spill]] %s8500_s9 }
   0xa   :  { %8558 = sst [smem:[#allocation14_spill]] %s8501_s10 }
   0xb   :  { %8559 = sst [smem:[#allocation15_spill]] %s8506_s15 }
   0xc   :  { %8560 = sst [smem:[#allocation16_spill]] %s8507_s16 }
   0xd   :  { %8561 = sst [smem:[#allocation17_spill]] %s8512_s21 }
   0xe   :  { %8562 = sst [smem:[#allocation18_spill]] %s8513_s22 }
   0xf   :  { %8563 = sst [smem:[#allocation19_spill]] %s8514_s23 }
  0x10   :  { %s8564_s24 = sld [smem:[#allocation8_spill]]  ;;  %vm101_vm0 = vcmask 261120   ;;  %s8565_s28 = sld [smem:[#allocation5_spill]] }
  0x16   :  { %v93_v0 = vld [vmem:[%s8564_s24] sm:$0xff]  ;;  %v94_v1 = vld [vmem:[%s8564_s24 + $0x8] sm:$0xff]  ;;  %v95_v2 = vld [vmem:[%s8564_s24 + $0x10] sm:$0xff] }
  0x17   :  { %v6842_v3 = vpack.c.bf16 %v94_v1, %v93_v0  ;;  %v96_v4 = vld [vmem:[%s8564_s24 + $0x18] sm:$0xff]  ;;  %v7657_v5 = vld [vmem:[%s8565_s28] sm:$0xff] }
  0x18   :  { %v6846_v6 = vpack.c.bf16 %v96_v4, %v95_v2  ;;  %6409 = vmatprep.mubr.msk.f32.mxu0 %vm101_vm0, %v7657_v5 }
  0x19   :  { %28 = vsyncpa [#allocation3], 0  ;;  %6843 = vmatprep.subr.bf16.mxu0 %v6842_v3  ;;  %v7664_v7 = vld [vmem:[%s8565_s28 + $0x8] sm:$0xff]  ;;  %v97_v8 = vlaneseq  ;;  %s8566_s30 = sld [smem:[#allocation9_spill]]  ;;  %vm193_vm1 = vcmask 64512   ;;  %s8539_s25 = smov 96  }
  0x1a   :  { %6845 = vmatpush3.bf16.msra.mxu0 %v6842_v3  ;;  %vm7691_vm2 = vmpackc.low %vm193_vm1, %vm193_vm1  ;;  %s8569_s26 = sld [smem:[#allocation6_spill]]  ;;  %vm281_vm3 = vcmask 130048   ;;  %s8526_s27 = smov 64   ;;  %vm2855_vm4 = vcmask 523264  }
  0x1b   :  { %6847 = vmatprep.subr.bf16.mxu0 %v6846_v6  ;;  %v7668_v9 = vshrl.u32 %v97_v8, 7  ;;  %s8531_s7 = smov 88   ;;  %s8537_s29 = smov 120  }
  0x1c   :  { %s8529_s3 = smov 80   ;;  %s8535_s0 = smov 112  }
  0x1d   :  { %v7671_v10 = vsub.s32 0, %v7668_v9  ;;  %s8525_s4 = smov 56   ;;  %s8527_s5 = smov 72  }
  0x1e   :  { %6849 = vmatpush3.bf16.msra.mxu0 %v6846_v6  ;;  %s8533_s1 = smov 104   ;;  %s8524_s2 = smov 48  }
  0x1f   :  { %v81_v11 = vld [vmem:[%s8566_s30] sm:$0x3]  ;;  %s8523_s6 = smov 40   ;;  %s8579_s21 = smov 96  }
  0x20   :  { %v100_v12 = vrot.slane %v81_v11, %v7671_v10  ;;  %v7704_v24 = vld [vmem:[%s8569_s26 + $0x8] sm:$0xff]  ;;  %v7709_v27 = vld [vmem:[%s8569_s26] sm:$0xff]  ;;  %s8584_s23 = smov 40  }
  0x21   :  { %6410 = vmatmul.mubr.msk.f32.vlgmr.msra.gmra.mrb[0].mxu0 %vm101_vm0, %v7664_v7 }
  0xf4   :  { %v6411_v13 = vpop.f32.mrb[0].mxu0 }
  0xf5   :  { %v7677_v14 = vadd.f32 %v6411_v13, %v100_v12  ;;  %v174_v15 = vpop.f32.mrb[1].mxu0 }
  0xf6   :  { %v7679_v16 = vadd.f32 %v174_v15, %v100_v12 }
  0xf8   :  { %6416 = vmatprep.mubr.msk.f32.mxu1 %vm193_vm1, %v7679_v16  ;;  %v7685_v17 = vpack.i.bf16 %v7677_v14, %v7679_v16 }
  0xfa   :  { %7145 = vrot.lane.b32.xlu0 %v7685_v17, %s8539_s25 }
 0x16c   :  { %v7146_v18 = vpop.permute.xlu0 %7145 }
 0x16d   :  { %v7148_v19 = vunpack.i.h.bf16 %v7146_v18  ;;  %v7147_v20 = vunpack.i.l.bf16 %v7146_v18 }
 0x16f   :  { %v6850_v22 = vpack.c.bf16 %v7148_v19, %v7147_v20 }
 0x171   :  { %6852 = vmatprep.subr.msk.bf16.mxu1 %vm7691_vm2, %v6850_v22 }
 0x172   :  { %6855 = vmatpush3.bf16.xpose.msk.msra.mxu1 %vm7691_vm2, %v6850_v22 }
 0x179   :  { %6417 = vmatmul.mubr.msk.f32.vlgmr.msra.gmra.mrb[0].mxu1 %vm193_vm1, %v7677_v14 }
 0x24c   :  { %v6418_v23 = vpop.f32.mrb[0].mxu1 }
 0x24d   :  { %v278_v25 = vmul.f32 0.35355338, %v6418_v23  ;;  %v268_v26 = vpop.f32.mrb[1].mxu1 }
 0x24e   :  { %v277_v28 = vmul.f32 0.35355338, %v268_v26 }
 0x24f   :  { %v280_v29 = vadd.f32 %v278_v25, %v7704_v24 }
 0x250   :  { %v279_v30 = vadd.f32 %v277_v28, %v7709_v27 }
 0x251   :  { %v285_v31 = vsel %vm281_vm3, %v280_v29, -inf }
 0x252   :  { %286 = vmax.xlane.f32.xlu1 %v285_v31  ;;  %v282_v32 = vsel %vm281_vm3, %v279_v30, -inf }
 0x253   :  { %283 = vmax.xlane.f32.xlu0 %v282_v32 }
 0x263   :  { %7150 = vrot.lane.b32.xlu1 %v7685_v17, %s8526_s27  ;;  %s8572_s27 = sld [smem:[#allocation12_spill]] }
 0x267   :  { %7155 = vrot.lane.b32.xlu1 %v7685_v17, %s8531_s7  ;;  %s8577_s7 = smov 80  }
 0x269   :  { %393 = vrot.lane.b32.xlu0 %v7677_v14, %s8537_s29 }
 0x2df   :  { %v287_v33 = vpop.xlane.xlu1 %286 }
 0x2e0   :  { %v289_v34 = vsub.f32 %v280_v29, %v287_v33  ;;  %v284_v35 = vpop.xlane.xlu0 %283 }
 0x2e1   :  { %v288_v36 = vsub.f32 %v279_v30, %v284_v35 }
 0x2e2   :  { %v292_v37 = vmul.f32 1.442695, %v289_v34 }
 0x2e3   :  { %v290_v38 = vmul.f32 1.442695, %v288_v36  ;;  %v7151_v39 = vpop.permute.xlu1 %7150 }
 0x2e4   :  { %7314 = vpow2.f32 %v292_v37  ;;  %v7153_v40 = vunpack.i.h.bf16 %v7151_v39  ;;  %v7152_v41 = vunpack.i.l.bf16 %v7151_v39  ;;  %v394_v62 = vpop.permute.xlu0 %393 }
 0x2e5   :  { %7316 = vpow2.f32 %v290_v38 }
 0x2e6   :  { %v6856_v42 = vpack.c.bf16 %v7153_v40, %v7152_v41 }
 0x2e7   :  { %v7156_v43 = vpop.permute.xlu1 %7155 }
 0x2e8   :  { %v7158_v44 = vunpack.i.h.bf16 %v7156_v43  ;;  %v7157_v45 = vunpack.i.l.bf16 %v7156_v43  ;;  %6857 = vmatprep.subr.bf16.mxu1 %v6856_v42 }
 0x2e9   :  { %6859 = vmatpush3.bf16.msra.mxu1 %v6856_v42 }
 0x2ea   :  { %v6860_v46 = vpack.c.bf16 %v7158_v44, %v7157_v45 }
 0x2ec   :  { %6862 = vmatprep.subr.msk.bf16.mxu1 %vm7691_vm2, %v6860_v46 }
 0x2ee   :  { %v7315_v47 = vpop.eup %7314 }
 0x2ef   :  { %v297_v48 = vsel %vm281_vm3, %v7315_v47, 0.0  ;;  %v7317_v49 = vpop.eup %7316 }
 0x2f0   :  { %298 = vadd.xlane.f32.xlu1 %v297_v48  ;;  %v294_v50 = vsel %vm281_vm3, %v7317_v49, 0.0 }
 0x2f4   :  { %295 = vadd.xlane.f32.xlu1 %v294_v50 }
 0x305   :  { %391 = vrot.lane.b32.xlu1 %v7679_v16, %s8537_s29 }
 0x309   :  { %7160 = vrot.lane.b32.xlu1 %v7685_v17, %s8529_s3 }
 0x30d   :  { %757 = vrot.lane.b32.xlu1 %v7679_v16, %s8535_s0 }
 0x311   :  { %759 = vrot.lane.b32.xlu1 %v7677_v14, %s8535_s0  ;;  %s8576_s0 = smov 88  }
 0x37d   :  { %v299_v51 = vpop.xlane.xlu1 %298 }
 0x37e   :  { %7318 = vrcp.f32 %v299_v51 }
 0x381   :  { %v296_v52 = vpop.xlane.xlu1 %295 }
 0x382   :  { %7320 = vrcp.f32 %v296_v52 }
 0x385   :  { %v392_v53 = vpop.permute.xlu1 %391 }
 0x388   :  { %v7319_v55 = vpop.eup %7318 }
 0x389   :  { %v7161_v54 = vpop.permute.xlu1 %7160  ;;  %v303_v60 = vmul.f32 %v7319_v55, %v7315_v47 }
 0x38a   :  { %v7163_v57 = vunpack.i.h.bf16 %v7161_v54  ;;  %v7162_v58 = vunpack.i.l.bf16 %v7161_v54 }
 0x38c   :  { %v7321_v56 = vpop.eup %7320  ;;  %v6870_v61 = vpack.c.bf16 %v7163_v57, %v7162_v58 }
 0x38d   :  { %v302_v59 = vmul.f32 %v7321_v56, %v7317_v49  ;;  %v758_v63 = vpop.permute.xlu1 %757 }
 0x38f   :  { %6423 = vmatprep.mubr.msk.f32.mxu1 %vm281_vm3, %v302_v59 }
 0x390   :  { %6424 = vmatmul.mubr.msk.f32.vlgmr.msra.gmra.mrb[2].mxu1 %vm281_vm3, %v303_v60 }
 0x391   :  { %6865 = vmatpush3.bf16.xpose.msk.msra.mxu1 %vm7691_vm2, %v6860_v46  ;;  %6430 = vmatprep.mubr.msk.f32.mxu1 %vm193_vm1, %v392_v53  ;;  %v760_v0 = vpop.permute.xlu1 %759 }
 0x392   :  { %6872 = vmatprep.subr.msk.bf16.mxu1 %vm7691_vm2, %v6870_v61 }
 0x398   :  { %6431 = vmatmul.mubr.msk.f32.vlgmr.msra.gmra.mrb[4].mxu1 %vm193_vm1, %v394_v62 }
 0x399   :  { %6875 = vmatpush3.bf16.xpose.msk.msra.mxu1 %vm7691_vm2, %v6870_v61  ;;  %6454 = vmatprep.mubr.msk.f32.mxu1 %vm193_vm1, %v758_v63 }
 0x3a0   :  { %6455 = vmatmul.mubr.msk.f32.vlgmr.msra.gmra.mrb[6].mxu1 %vm193_vm1, %v760_v0 }
 0x463   :  { %v7745_v1 = vpop.f32.mrb[2].mxu1 }
 0x464   :  { %v7747_v2 = vpop.f32.mrb[3].mxu1 }
 0x46b   :  { %v6432_v3 = vpop.f32.mrb[4].mxu1 }
 0x46c   :  { %v483_v4 = vmul.f32 0.35355338, %v6432_v3  ;;  %v473_v6 = vpop.f32.mrb[5].mxu1 }
 0x46d   :  { %v482_v8 = vmul.f32 0.35355338, %v473_v6 }
 0x46e   :  { %v485_v11 = vadd.f32 %v483_v4, %v7704_v24 }
 0x46f   :  { %v484_v12 = vadd.f32 %v482_v8, %v7709_v27 }
 0x470   :  { %v489_v13 = vsel %vm281_vm3, %v485_v11, -inf }
 0x471   :  { %490 = vmax.xlane.f32.xlu0 %v489_v13  ;;  %v486_v15 = vsel %vm281_vm3, %v484_v12, -inf }
 0x472   :  { %487 = vmax.xlane.f32.xlu1 %v486_v15 }
 0x473   :  { %v6456_v18 = vpop.f32.mrb[6].mxu1 }
 0x474   :  { %v839_v19 = vpop.f32.mrb[7].mxu1  ;;  %v849_v36 = vmul.f32 0.35355338, %v6456_v18 }
 0x475   :  { %v848_v33 = vmul.f32 0.35355338, %v839_v19 }
 0x476   :  { %v851_v37 = vadd.f32 %v849_v36, %v7704_v24 }
 0x477   :  { %v850_v34 = vadd.f32 %v848_v33, %v7709_v27 }
 0x478   :  { %v855_v38 = vsel %vm281_vm3, %v851_v37, -inf }
 0x479   :  { %v852_v35 = vsel %vm281_vm3, %v850_v34, -inf }
 0x4fe   :  { %v491_v20 = vpop.xlane.xlu0 %490 }
 0x4ff   :  { %v493_v22 = vsub.f32 %v485_v11, %v491_v20  ;;  %v488_v23 = vpop.xlane.xlu1 %487 }
 0x500   :  { %v492_v25 = vsub.f32 %v484_v12, %v488_v23 }
 0x501   :  { %v496_v26 = vmul.f32 1.442695, %v493_v22 }
 0x502   :  { %v494_v28 = vmul.f32 1.442695, %v492_v25 }
 0x503   :  { %7322 = vpow2.f32 %v496_v26 }
 0x504   :  { %7324 = vpow2.f32 %v494_v28 }
 0x50d   :  { %v7323_v29 = vpop.eup %7322 }
 0x50e   :  { %v7325_v30 = vpop.eup %7324  ;;  %v501_v31 = vsel %vm281_vm3, %v7323_v29, 0.0 }
 0x50f   :  { %502 = vadd.xlane.f32.xlu0 %v501_v31  ;;  %v498_v32 = vsel %vm281_vm3, %v7325_v30, 0.0 }
 0x510   :  { %499 = vadd.xlane.f32.xlu1 %v498_v32 }
 0x521   :  { %7165 = vrot.lane.b32.xlu1 %v7685_v17, %s8525_s4  ;;  %s8570_s4 = sld [smem:[#allocation10_spill]] }
 0x525   :  { %7170 = vrot.lane.b32.xlu0 %v7685_v17, %s8527_s5  ;;  %1044 = vrot.lane.b32.xlu1 %v7679_v16, %s8533_s1  ;;  %s8575_s5 = smov 104  }
 0x527   :  { %v184_v62 = vld [vmem:[%s8570_s4 + $0x8] sm:$0xff]  ;;  %v183_v63 = vld [vmem:[%s8570_s4] sm:$0xff] }
 0x529   :  { %1046 = vrot.lane.b32.xlu1 %v7677_v14, %s8533_s1  ;;  %s8574_s1 = sld [smem:[#allocation7_spill]] }
 0x544   :  { %853 = vmax.xlane.f32.xlu0 %v852_v35 }
 0x54d   :  { %856 = vmax.xlane.f32.xlu1 %v855_v38 }
 0x55e   :  { %7175 = vrot.lane.b32.xlu1 %v7685_v17, %s8524_s2  ;;  %s8571_s2 = sld [smem:[#allocation11_spill]] }
 0x562   :  { %7180 = vrot.lane.b32.xlu1 %v7685_v17, %s8523_s6  ;;  %s8573_s6 = smov 112  }
 0x59c   :  { %v503_v14 = vpop.xlane.xlu0 %502 }
 0x59d   :  { %7326 = vrcp.f32 %v503_v14  ;;  %v500_v16 = vpop.xlane.xlu1 %499 }
 0x59e   :  { %7328 = vrcp.f32 %v500_v16 }
 0x5a0   :  { %v7171_v39 = vpop.permute.xlu0 %7170 }
 0x5a1   :  { %v7173_v40 = vunpack.i.h.bf16 %v7171_v39  ;;  %v7172_v41 = vunpack.i.l.bf16 %v7171_v39  ;;  %v7166_v42 = vpop.permute.xlu1 %7165 }
 0x5a2   :  { %v7168_v43 = vunpack.i.h.bf16 %v7166_v42  ;;  %v7167_v44 = vunpack.i.l.bf16 %v7166_v42 }
 0x5a3   :  { %v6880_v45 = vpack.c.bf16 %v7173_v40, %v7172_v41 }
 0x5a4   :  { %v6866_v46 = vpack.c.bf16 %v7168_v43, %v7167_v44  ;;  %v186_v43 = vld [vmem:[%s8570_s4 + $0x18] sm:$0xff] }
 0x5a5   :  { %6882 = vmatprep.subr.msk.bf16.mxu1 %vm7691_vm2, %v6880_v45  ;;  %v1045_v47 = vpop.permute.xlu1 %1044 }
 0x5a6   :  { %6867 = vmatprep.subr.bf16.mxu0 %v6866_v46  ;;  %6885 = vmatpush3.bf16.xpose.msk.msra.mxu1 %vm7691_vm2, %v6880_v45 }
 0x5a7   :  { %v7327_v17 = vpop.eup %7326  ;;  %6473 = vmatprep.mubr.msk.f32.mxu1 %vm193_vm1, %v1045_v47  ;;  %6869 = vmatpush3.bf16.msra.mxu0 %v6866_v46 }
 0x5a8   :  { %v7329_v48 = vpop.eup %7328  ;;  %v507_v50 = vmul.f32 %v7327_v17, %v7323_v29  ;;  %6440 = vmatprep.subr.mxu0 %v184_v62 }
 0x5a9   :  { %v506_v49 = vmul.f32 %v7329_v48, %v7325_v30  ;;  %v1047_v51 = vpop.permute.xlu1 %1046  ;;  %v185_v30 = vld [vmem:[%s8570_s4 + $0x10] sm:$0xff] }
 0x5ab   :  { %6437 = vmatprep.mubr.msk.f32.mxu0 %vm281_vm3, %v506_v49 }
 0x5ac   :  { %6438 = vmatmul.mubr.msk.f32.vlgmr.msra.gmra.mrb[2].mxu0 %vm281_vm3, %v507_v50 }
 0x5ad   :  { %6474 = vmatmul.mubr.msk.f32.vlgmr.msra.gmra.mrb[8].mxu1 %vm193_vm1, %v1047_v51  ;;  %6441 = vmatpush3.msra.mxu0 %v184_v62  ;;  %v82_v51 = vld [vmem:[%s8571_s2] sm:$0x3]  ;;  %v1379_v62 = vld [vmem:[%s8572_s27 + $0x8] sm:$0xff] }
 0x5ae   :  { %6445 = vmatprep.subr.mxu0 %v183_v63 }
 0x5d1   :  { %v854_v52 = vpop.xlane.xlu0 %853 }
 0x5d2   :  { %v858_v53 = vsub.f32 %v850_v34, %v854_v52  ;;  %v1334_v52 = vrot.slane %v82_v51, %v7671_v10 }
 0x5d4   :  { %v860_v54 = vmul.f32 1.442695, %v858_v53 }
 0x5d6   :  { %7330 = vpow2.f32 %v860_v54 }
 0x5da   :  { %v857_v55 = vpop.xlane.xlu1 %856 }
 0x5db   :  { %v859_v56 = vsub.f32 %v851_v37, %v857_v55 }
 0x5dd   :  { %v862_v57 = vmul.f32 1.442695, %v859_v56 }
 0x5de   :  { %v7176_v3 = vpop.permute.xlu1 %7175 }
 0x5df   :  { %7332 = vpow2.f32 %v862_v57  ;;  %v7178_v6 = vunpack.i.h.bf16 %v7176_v3  ;;  %v7177_v8 = vunpack.i.l.bf16 %v7176_v3 }
 0x5e0   :  { %v7331_v58 = vpop.eup %7330 }
 0x5e1   :  { %v864_v59 = vsel %vm281_vm3, %v7331_v58, 0.0  ;;  %v6876_v20 = vpack.c.bf16 %v7178_v6, %v7177_v8 }
 0x5e2   :  { %865 = vadd.xlane.f32.xlu0 %v864_v59  ;;  %v7181_v28 = vpop.permute.xlu1 %7180 }
 0x5e3   :  { %v7183_v31 = vunpack.i.h.bf16 %v7181_v28  ;;  %v7182_v32 = vunpack.i.l.bf16 %v7181_v28 }
 0x5e5   :  { %v6886_v33 = vpack.c.bf16 %v7183_v31, %v7182_v32 }
 0x5e9   :  { %v7333_v60 = vpop.eup %7332 }
 0x5ea   :  { %v867_v61 = vsel %vm281_vm3, %v7333_v60, 0.0 }
 0x5eb   :  { %868 = vadd.xlane.f32.xlu0 %v867_v61  ;;  %v1378_v61 = vld [vmem:[%s8572_s27] sm:$0xff] }
 0x5ec   :  { %v6890_v28 = vpack.c.bf16 %v1379_v62, %v1378_v61 }
 0x5ee   :  { %6891 = vmatprep.subr.bf16.mxu1 %v6890_v28 }
 0x5ef   :  { %6893 = vmatpush3.bf16.msra.mxu1 %v6890_v28 }
 0x66f   :  { %v866_v0 = vpop.xlane.xlu0 %865 }
 0x670   :  { %7334 = vrcp.f32 %v866_v0 }
 0x678   :  { %v869_v4 = vpop.xlane.xlu0 %868 }
 0x679   :  { %7336 = vrcp.f32 %v869_v4 }
 0x67a   :  { %v7335_v26 = vpop.eup %7334 }
 0x67f   :  { %v6439_v11 = vpop.f32.mrb[2].mxu0 }
 0x680   :  { %v586_v12 = vpop.f32.mrb[3].mxu0  ;;  %v6475_v13 = vpop.f32.mrb[8].mxu1 }
 0x681   :  { %6442 = vmatprep.mubr.msk.f32.mxu0 %vm193_vm1, %v586_v12  ;;  %v1126_v15 = vpop.f32.mrb[9].mxu1  ;;  %v1136_v18 = vmul.f32 0.35355338, %v6475_v13 }
 0x682   :  { %v1135_v19 = vmul.f32 0.35355338, %v1126_v15  ;;  %6443 = vmatmul.mubr.msk.f32.vlgmr.msra.gmra.mrb[4].mxu0 %vm193_vm1, %v6439_v11 }
 0x683   :  { %6446 = vmatpush3.msra.mxu0 %v183_v63  ;;  %6447 = vmatprep.mubr.msk.f32.mxu0 %vm193_vm1, %v7747_v2  ;;  %v1138_v25 = vadd.f32 %v1136_v18, %v7704_v24  ;;  %v7337_v29 = vpop.eup %7336  ;;  %v7184_v63 = vpack.i.bf16 %v1379_v62, %v1378_v61 }
 0x684   :  { %6877 = vmatprep.subr.bf16.mxu0 %v6876_v20  ;;  %v1137_v22 = vadd.f32 %v1135_v19, %v7709_v27  ;;  %v872_v27 = vmul.f32 %v7335_v26, %v7331_v58  ;;  %v873_v24 = vmul.f32 %v7337_v29, %v7333_v60 }
 0x685   :  { %v1142_v2 = vsel %vm281_vm3, %v1138_v25, -inf }
 0x686   :  { %v1139_v23 = vsel %vm281_vm3, %v1137_v22, -inf }
 0x687   :  { %1140 = vmax.xlane.f32.xlu0 %v1139_v23  ;;  %v1380_v23 = vld [vmem:[%s8572_s27 + $0x10] sm:$0xff] }
 0x68a   :  { %6448 = vmatmul.mubr.msk.f32.vlgmr.msra.gmra.mrb[4].mxu0 %vm193_vm1, %v7745_v1 }
 0x68b   :  { %6879 = vmatpush3.bf16.msra.mxu0 %v6876_v20  ;;  %1143 = vmax.xlane.f32.xlu0 %v1142_v2 }
 0x68c   :  { %6461 = vmatprep.mubr.msk.f32.mxu0 %vm281_vm3, %v872_v27  ;;  %6464 = vmatprep.subr.mxu0 %v185_v30 }
 0x68e   :  { %6462 = vmatmul.mubr.msk.f32.vlgmr.msra.gmra.mrb[6].mxu0 %vm281_vm3, %v873_v24 }
 0x68f   :  { %6465 = vmatpush3.msra.mxu0 %v185_v30  ;;  %v83_v30 = vld [vmem:[%s8499_s8] sm:$0x3] }
 0x690   :  { %6887 = vmatprep.subr.bf16.mxu0 %v6886_v33  ;;  %v1385_v31 = vrot.slane %v83_v30, %v7671_v10 }
 0x714   :  { %v1141_v34 = vpop.xlane.xlu0 %1140 }
 0x715   :  { %v1145_v35 = vsub.f32 %v1137_v22, %v1141_v34 }
 0x717   :  { %v1147_v36 = vmul.f32 1.442695, %v1145_v35 }
 0x718   :  { %v1144_v37 = vpop.xlane.xlu0 %1143 }
 0x719   :  { %7338 = vpow2.f32 %v1147_v36  ;;  %v1146_v1 = vsub.f32 %v1138_v25, %v1144_v37  ;;  %v1381_v25 = vld [vmem:[%s8572_s27 + $0x18] sm:$0xff] }
 0x71a   :  { %v7189_v26 = vpack.i.bf16 %v1381_v25, %v1380_v23  ;;  %v6894_v29 = vpack.c.bf16 %v1381_v25, %v1380_v23 }
 0x71b   :  { %v1149_v38 = vmul.f32 1.442695, %v1146_v1 }
 0x71c   :  { %6895 = vmatprep.subr.bf16.mxu1 %v6894_v29 }
 0x71d   :  { %7340 = vpow2.f32 %v1149_v38  ;;  %6897 = vmatpush3.bf16.msra.mxu1 %v6894_v29  ;;  %v87_v38 = vld [vmem:[%s8506_s15] sm:$0x3]  ;;  %s8582_s15 = smov 56  }
 0x723   :  { %v7339_v14 = vpop.eup %7338 }
 0x724   :  { %v1151_v16 = vsel %vm281_vm3, %v7339_v14, 0.0 }
 0x725   :  { %1152 = vadd.xlane.f32.xlu0 %v1151_v16 }
 0x727   :  { %v7341_v39 = vpop.eup %7340 }
 0x728   :  { %v1154_v40 = vsel %vm281_vm3, %v7341_v39, 0.0 }
 0x729   :  { %1155 = vadd.xlane.f32.xlu0 %v1154_v40  ;;  %v88_v40 = vld [vmem:[%s8507_s16] sm:$0x3]  ;;  %s8583_s16 = smov 48  }
 0x761   :  { %v6463_v41 = vpop.f32.mrb[6].mxu0 }
 0x762   :  { %v952_v42 = vpop.f32.mrb[7].mxu0 }
 0x763   :  { %6466 = vmatprep.mubr.msk.f32.mxu0 %vm193_vm1, %v952_v42 }
 0x764   :  { %6467 = vmatmul.mubr.msk.f32.vlgmr.msra.gmra.mrb[4].mxu0 %vm193_vm1, %v6463_v41 }
 0x765   :  { %6889 = vmatpush3.bf16.msra.mxu0 %v6886_v33 }
 0x766   :  { %6483 = vmatprep.subr.mxu0 %v186_v43 }
 0x7b2   :  { %v1153_v44 = vpop.xlane.xlu0 %1152 }
 0x7b3   :  { %7342 = vrcp.f32 %v1153_v44  ;;  %v1375_v44 = vrot.slane %v88_v40, %v7671_v10 }
 0x7b6   :  { %v1156_v45 = vpop.xlane.xlu0 %1155 }
 0x7b7   :  { %7344 = vrcp.f32 %v1156_v45 }
 0x7bd   :  { %v7343_v46 = vpop.eup %7342 }
 0x7be   :  { %v1159_v47 = vmul.f32 %v7343_v46, %v7339_v14 }
 0x7c0   :  { %6480 = vmatprep.mubr.msk.f32.mxu0 %vm281_vm3, %v1159_v47 }
 0x7c1   :  { %v7345_v17 = vpop.eup %7344 }
 0x7c2   :  { %v1160_v48 = vmul.f32 %v7345_v17, %v7341_v39  ;;  %v1369_v39 = vrot.slane %v87_v38, %v7671_v10 }
 0x7c4   :  { %6481 = vmatmul.mubr.msk.f32.vlgmr.msra.gmra.mrb[8].mxu0 %vm281_vm3, %v1160_v48 }
 0x7c5   :  { %6484 = vmatpush3.msra.mxu0 %v186_v43 }
 0x897   :  { %v6482_v49 = vpop.f32.mrb[8].mxu0 }
 0x898   :  { %v1239_v50 = vpop.f32.mrb[9].mxu0 }
 0x899   :  { %6485 = vmatprep.mubr.msk.f32.mxu0 %vm193_vm1, %v1239_v50 }
 0x89a   :  { %6486 = vmatmul.mubr.msk.f32.vlgmr.msra.gmra.mrb[4].mxu0 %vm193_vm1, %v6482_v49 }
 0x89b   :  { %6507 = vmatprep.mubr.msk.f32.mxu0 %vm101_vm0, %v7657_v5 }
 0x96d   :  { %v6487_v53 = vpop.f32.mrb[4].mxu0 }
 0x96e   :  { %v1336_v54 = vadd.f32 %v6487_v53, %v1334_v52  ;;  %v1320_v55 = vpop.f32.mrb[5].mxu0 }
 0x96f   :  { %v1335_v56 = vadd.f32 %v1334_v52, %v1320_v55 }
 0x970   :  { %v1338_v57 = vadd.f32 %v1336_v54, %v7664_v7 }
 0x971   :  { %v1337_v58 = vadd.f32 %v1335_v56, %v7657_v5 }
 0x972   :  { %v1342_v59 = vsel %vm101_vm0, %v1338_v57, 0.0 }
 0x973   :  { %1343 = vadd.xlane.f32.xlu1 %v1342_v59  ;;  %v1339_v60 = vsel %vm101_vm0, %v1337_v58, 0.0 }
 0x974   :  { %1340 = vadd.xlane.f32.xlu0 %v1339_v60 }
 0x98a   :  { %7185 = vrot.lane.b32.xlu0 %v7184_v63, %s8539_s25 }
 0xa00   :  { %v1344_v0 = vpop.xlane.xlu1 %1343 }
 0xa01   :  { %v1347_v3 = vmul.f32 0.03125, %v1344_v0  ;;  %v1341_v5 = vpop.xlane.xlu0 %1340 }
 0xa02   :  { %v1346_v4 = vmul.f32 0.03125, %v1341_v5 }
 0xa03   :  { %v1349_v6 = vsub.f32 %v1338_v57, %v1347_v3 }
 0xa04   :  { %v1348_v8 = vsub.f32 %v1337_v58, %v1346_v4 }
 0xa05   :  { %v1351_v11 = vmul.f32 %v1349_v6, %v1349_v6  ;;  %v7186_v12 = vpop.permute.xlu0 %7185 }
 0xa06   :  { %v7188_v13 = vunpack.i.h.bf16 %v7186_v12  ;;  %v7187_v15 = vunpack.i.l.bf16 %v7186_v12  ;;  %v1350_v19 = vmul.f32 %v1348_v8, %v1348_v8 }
 0xa07   :  { %v1355_v18 = vsel %vm101_vm0, %v1351_v11, 0.0  ;;  %v7903_v11 = vld [vmem:[%s8574_s1 + $0x8] sm:$0xff] }
 0xa08   :  { %1356 = vadd.xlane.f32.xlu0 %v1355_v18  ;;  %v6898_v20 = vpack.c.bf16 %v7188_v13, %v7187_v15  ;;  %v1352_v22 = vsel %vm101_vm0, %v1350_v19, 0.0  ;;  %v7908_v15 = vld [vmem:[%s8574_s1] sm:$0xff] }
 0xa0a   :  { %6899 = vmatprep.subr.bf16.mxu0 %v6898_v20 }
 0xa0b   :  { %6901 = vmatpush3.bf16.msra.mxu0 %v6898_v20 }
 0xa0c   :  { %1353 = vadd.xlane.f32.xlu0 %v1352_v22 }
 0xa22   :  { %7190 = vrot.lane.b32.xlu0 %v7189_v26, %s8539_s25 }
 0xa26   :  { %1484 = vrot.lane.b32.xlu0 %v1385_v31, %s8539_s25 }
 0xa95   :  { %v1357_v32 = vpop.xlane.xlu0 %1356 }
 0xa96   :  { %v1359_v2 = vmul.f32 0.03125, %v1357_v32 }
 0xa98   :  { %v1361_v27 = vadd.f32 1e-05, %v1359_v2 }
 0xa99   :  { %v1354_v24 = vpop.xlane.xlu0 %1353 }
 0xa9a   :  { %7346 = vrsqrt.f32 %v1361_v27  ;;  %v1358_v33 = vmul.f32 0.03125, %v1354_v24 }
 0xa9c   :  { %v1360_v34 = vadd.f32 1e-05, %v1358_v33 }
 0xa9d   :  { %v7191_v35 = vpop.permute.xlu0 %7190 }
 0xa9e   :  { %7348 = vrsqrt.f32 %v1360_v34  ;;  %v7193_v36 = vunpack.i.h.bf16 %v7191_v35  ;;  %v7192_v37 = vunpack.i.l.bf16 %v7191_v35 }
 0xaa0   :  { %v6902_v1 = vpack.c.bf16 %v7193_v36, %v7192_v37 }
 0xaa2   :  { %6903 = vmatprep.subr.bf16.mxu0 %v6902_v1 }
 0xaa3   :  { %6905 = vmatpush3.bf16.msra.mxu0 %v6902_v1 }
 0xaa4   :  { %v7347_v14 = vpop.eup %7346 }
 0xaa5   :  { %v1365_v16 = vmul.f32 %v7347_v14, %v1349_v6 }
 0xaa6   :  { %6508 = vmatmul.mubr.msk.f32.vlgmr.msra.gmra.mrb[10].mxu0 %vm101_vm0, %v7664_v7  ;;  %v1485_v7 = vpop.permute.xlu0 %1484 }
 0xaa7   :  { %v1371_v43 = vmul.f32 %v1369_v39, %v1365_v16 }
 0xaa8   :  { %v7349_v41 = vpop.eup %7348 }
 0xaa9   :  { %v1364_v42 = vmul.f32 %v7349_v41, %v1348_v8  ;;  %v7856_v47 = vadd.f32 %v1375_v44, %v1371_v43 }
 0xaab   :  { %v1370_v45 = vmul.f32 %v1369_v39, %v1364_v42 }
 0xaad   :  { %v7854_v46 = vadd.f32 %v1375_v44, %v1370_v45 }
 0xaaf   :  { %6496 = vmatprep.mubr.msk.f32.mxu1 %vm101_vm0, %v7854_v46 }
 0xab0   :  { %6497 = vmatmul.mubr.msk.f32.vlgmr.msra.gmra.mrb[10].mxu1 %vm101_vm0, %v7856_v47 }
 0xb79   :  { %v6509_v17 = vpop.f32.mrb[10].mxu0 }
 0xb7a   :  { %v1559_v48 = vadd.f32 %v6509_v17, %v1485_v7  ;;  %v1553_v49 = vpop.f32.mrb[11].mxu0 }
 0xb7b   :  { %v1554_v50 = vadd.f32 %v1553_v49, %v1485_v7 }
 0xb7d   :  { %v7862_v51 = vpack.i.bf16 %v1559_v48, %v1554_v50  ;;  %v6906_v52 = vpack.c.bf16 %v1559_v48, %v1554_v50 }
 0xb7f   :  { %7195 = vrot.lane.b32.xlu1 %v7862_v51, %s8537_s29  ;;  %6908 = vmatprep.subr.msk.bf16.mxu1 %vm7691_vm2, %v6906_v52 }
 0xb80   :  { %6911 = vmatpush3.bf16.xpose.msk.msra.mxu1 %vm7691_vm2, %v6906_v52 }
 0xb83   :  { %v6498_v53 = vpop.f32.mrb[10].mxu1 }
 0xb84   :  { %v7870_v54 = vadd.f32 %v6498_v53, %v1385_v31  ;;  %v1458_v55 = vpop.f32.mrb[11].mxu1 }
 0xb85   :  { %v7872_v56 = vadd.f32 %v1458_v55, %v1385_v31 }
 0xb86   :  { %2134 = vrot.lane.b32.xlu1 %v7870_v54, %s8573_s6 }
 0xb87   :  { %1766 = vrot.lane.b32.xlu0 %v7872_v56, %s8537_s29  ;;  %6514 = vmatprep.mubr.msk.f32.mxu1 %vm193_vm1, %v7872_v56 }
 0xb88   :  { %6515 = vmatmul.mubr.msk.f32.vlgmr.msra.gmra.mrb[12].mxu1 %vm193_vm1, %v7870_v54 }
 0xb8b   :  { %1768 = vrot.lane.b32.xlu0 %v7870_v54, %s8537_s29  ;;  %s8578_s29 = smov 72  }
 0xb8f   :  { %7200 = vrot.lane.b32.xlu0 %v7862_v51, %s8573_s6 }
 0xb93   :  { %2132 = vrot.lane.b32.xlu0 %v7872_v56, %s8573_s6 }
 0xbf1   :  { %v7196_v57 = vpop.permute.xlu1 %7195 }
 0xbf2   :  { %v7198_v58 = vunpack.i.h.bf16 %v7196_v57  ;;  %v7197_v59 = vunpack.i.l.bf16 %v7196_v57 }
 0xbf4   :  { %v6916_v60 = vpack.c.bf16 %v7198_v58, %v7197_v59 }
 0xbf6   :  { %6918 = vmatprep.subr.msk.bf16.mxu1 %vm7691_vm2, %v6916_v60 }
 0xbf7   :  { %6921 = vmatpush3.bf16.xpose.msk.msra.mxu1 %vm7691_vm2, %v6916_v60 }
 0xbf8   :  { %v2135_v6 = vpop.permute.xlu1 %2134 }
 0xbf9   :  { %v1767_v61 = vpop.permute.xlu0 %1766 }
 0xbfa   :  { %6528 = vmatprep.mubr.msk.f32.mxu1 %vm193_vm1, %v1767_v61 }
 0xbfd   :  { %v1769_v62 = vpop.permute.xlu0 %1768 }
 0xbfe   :  { %6529 = vmatmul.mubr.msk.f32.vlgmr.msra.gmra.mrb[14].mxu1 %vm193_vm1, %v1769_v62 }
 0xc01   :  { %v7201_v63 = vpop.permute.xlu0 %7200 }
 0xc02   :  { %v7203_v0 = vunpack.i.h.bf16 %v7201_v63  ;;  %v7202_v3 = vunpack.i.l.bf16 %v7201_v63 }
 0xc04   :  { %v6926_v5 = vpack.c.bf16 %v7203_v0, %v7202_v3 }
 0xc05   :  { %v2133_v4 = vpop.permute.xlu0 %2132 }
 0xc06   :  { %6928 = vmatprep.subr.msk.bf16.mxu1 %vm7691_vm2, %v6926_v5  ;;  %6552 = vmatprep.mubr.msk.f32.mxu1 %vm193_vm1, %v2133_v4 }
 0xc07   :  { %6931 = vmatpush3.bf16.xpose.msk.msra.mxu1 %vm7691_vm2, %v6926_v5 }
 0xc0e   :  { %6553 = vmatmul.mubr.msk.f32.vlgmr.msra.gmra.mrb[16].mxu1 %vm193_vm1, %v2135_v6 }
 0xc5b   :  { %v6516_v8 = vpop.f32.mrb[12].mxu1 }
 0xc5c   :  { %v1654_v12 = vmul.f32 0.35355338, %v6516_v8  ;;  %v1644_v13 = vpop.f32.mrb[13].mxu1 }
 0xc5d   :  { %v1653_v18 = vmul.f32 0.35355338, %v1644_v13 }
 0xc5e   :  { %v1656_v19 = vadd.f32 %v1654_v12, %v7903_v11 }
 0xc5f   :  { %v1655_v20 = vadd.f32 %v1653_v18, %v7908_v15 }
 0xc60   :  { %v1660_v22 = vsel %vm281_vm3, %v1656_v19, -inf }
 0xc61   :  { %1661 = vmax.xlane.f32.xlu1 %v1660_v22  ;;  %v1657_v23 = vsel %vm281_vm3, %v1655_v20, -inf }
 0xc62   :  { %1658 = vmax.xlane.f32.xlu0 %v1657_v23 }
 0xcd1   :  { %v6530_v25 = vpop.f32.mrb[14].mxu1 }
 0xcd2   :  { %v1848_v26 = vpop.f32.mrb[15].mxu1  ;;  %v1858_v28 = vmul.f32 0.35355338, %v6530_v25 }
 0xcd3   :  { %v1857_v29 = vmul.f32 0.35355338, %v1848_v26 }
 0xcd4   :  { %v1860_v32 = vadd.f32 %v1858_v28, %v7903_v11 }
 0xcd5   :  { %v1859_v30 = vadd.f32 %v1857_v29, %v7908_v15 }
 0xcd6   :  { %v1864_v2 = vsel %vm281_vm3, %v1860_v32, -inf }
 0xcd7   :  { %v1861_v31 = vsel %vm281_vm3, %v1859_v30, -inf }
 0xcd8   :  { %1862 = vmax.xlane.f32.xlu0 %v1861_v31 }
 0xcdc   :  { %1865 = vmax.xlane.f32.xlu0 %v1864_v2 }
 0xce1   :  { %v6554_v27 = vpop.f32.mrb[16].mxu1 }
 0xce2   :  { %v2214_v24 = vpop.f32.mrb[17].mxu1  ;;  %v2224_v55 = vmul.f32 0.35355338, %v6554_v27 }
 0xce3   :  { %v2223_v57 = vmul.f32 0.35355338, %v2214_v24 }
 0xce4   :  { %v2226_v59 = vadd.f32 %v2224_v55, %v7903_v11 }
 0xce5   :  { %v2225_v58 = vadd.f32 %v2223_v57, %v7908_v15 }
 0xce7   :  { %v2227_v60 = vsel %vm281_vm3, %v2225_v58, -inf }
 0xcee   :  { %v1662_v33 = vpop.xlane.xlu1 %1661 }
 0xcef   :  { %v1664_v34 = vsub.f32 %v1656_v19, %v1662_v33  ;;  %v1659_v35 = vpop.xlane.xlu0 %1658 }
 0xcf0   :  { %v1663_v36 = vsub.f32 %v1655_v20, %v1659_v35 }
 0xcf1   :  { %v1667_v37 = vmul.f32 1.442695, %v1664_v34 }
 0xcf2   :  { %v1665_v1 = vmul.f32 1.442695, %v1663_v36 }
 0xcf3   :  { %7350 = vpow2.f32 %v1667_v37 }
 0xcf4   :  { %7352 = vpow2.f32 %v1665_v1 }
 0xcfd   :  { %v7351_v38 = vpop.eup %7350 }
 0xcfe   :  { %v7353_v14 = vpop.eup %7352  ;;  %v1672_v16 = vsel %vm281_vm3, %v7351_v38, 0.0 }
 0xcff   :  { %1673 = vadd.xlane.f32.xlu0 %v1672_v16  ;;  %v1669_v39 = vsel %vm281_vm3, %v7353_v14, 0.0 }
 0xd00   :  { %1670 = vadd.xlane.f32.xlu1 %v1669_v39 }
 0xd65   :  { %v1863_v40 = vpop.xlane.xlu0 %1862 }
 0xd66   :  { %v1867_v41 = vsub.f32 %v1859_v30, %v1863_v40 }
 0xd68   :  { %v1869_v42 = vmul.f32 1.442695, %v1867_v41 }
 0xd69   :  { %v1866_v43 = vpop.xlane.xlu0 %1865 }
 0xd6a   :  { %7354 = vpow2.f32 %v1869_v42  ;;  %v1868_v44 = vsub.f32 %v1860_v32, %v1866_v43 }
 0xd6c   :  { %v1871_v45 = vmul.f32 1.442695, %v1868_v44 }
 0xd6e   :  { %7356 = vpow2.f32 %v1871_v45 }
 0xd74   :  { %v7355_v7 = vpop.eup %7354 }
 0xd75   :  { %v1873_v17 = vsel %vm281_vm3, %v7355_v7, 0.0 }
 0xd76   :  { %1874 = vadd.xlane.f32.xlu1 %v1873_v17 }
 0xd78   :  { %v7357_v48 = vpop.eup %7356 }
 0xd79   :  { %v1876_v49 = vsel %vm281_vm3, %v7357_v48, 0.0 }
 0xd7a   :  { %1877 = vadd.xlane.f32.xlu0 %v1876_v49 }
 0xd87   :  { %7205 = vrot.lane.b32.xlu1 %v7862_v51, %s8539_s25  ;;  %s7519_s25 = smov [#allocation2]  }
 0xd8b   :  { %7215 = vrot.lane.b32.xlu1 %v7862_v51, %s8575_s5 }
 0xd8c   :  { %v1674_v61 = vpop.xlane.xlu0 %1673 }
 0xd8d   :  { %v1671_v50 = vpop.xlane.xlu1 %1670 }
 0xd8e   :  { %7358 = vrcp.f32 %v1671_v50 }
 0xd8f   :  { %2419 = vrot.lane.b32.xlu1 %v7872_v56, %s8575_s5  ;;  %v2230_v56 = vsel %vm281_vm3, %v2226_v59, -inf  ;;  %7360 = vrcp.f32 %v1674_v61 }
 0xd90   :  { %7210 = vrot.lane.b32.xlu0 %v7862_v51, %s8576_s0 }
 0xd94   :  { %2421 = vrot.lane.b32.xlu0 %v7870_v54, %s8575_s5 }
 0xd98   :  { %v7359_v52 = vpop.eup %7358 }
 0xd99   :  { %v1677_v53 = vmul.f32 %v7359_v52, %v7353_v14  ;;  %v7361_v4 = vpop.eup %7360  ;;  %v1562_v14 = vld [vmem:[%s8500_s9] sm:$0xff] }
 0xd9a   :  { %v1678_v25 = vmul.f32 %v7361_v4, %v7351_v38  ;;  %v1563_v38 = vld [vmem:[%s8500_s9 + $0x8] sm:$0xff] }
 0xd9b   :  { %6521 = vmatprep.mubr.msk.f32.mxu0 %vm281_vm3, %v1677_v53 }
 0xdb3   :  { %2228 = vmax.xlane.f32.xlu1 %v2227_v60  ;;  %2231 = vmax.xlane.f32.xlu0 %v2230_v56 }
 0xe03   :  { %v1875_v62 = vpop.xlane.xlu1 %1874 }
 0xe04   :  { %7362 = vrcp.f32 %v1875_v62 }
 0xe07   :  { %v7206_v54 = vpop.permute.xlu1 %7205  ;;  %v1878_v63 = vpop.xlane.xlu0 %1877 }
 0xe08   :  { %v7208_v0 = vunpack.i.h.bf16 %v7206_v54  ;;  %v7207_v3 = vunpack.i.l.bf16 %v7206_v54  ;;  %7364 = vrcp.f32 %v1878_v63 }
 0xe0a   :  { %v6912_v5 = vpack.c.bf16 %v7208_v0, %v7207_v3 }
 0xe0b   :  { %v7216_v6 = vpop.permute.xlu1 %7215  ;;  %v7211_v8 = vpop.permute.xlu0 %7210 }
 0xe0c   :  { %v7218_v12 = vunpack.i.h.bf16 %v7216_v6  ;;  %v7217_v13 = vunpack.i.l.bf16 %v7216_v6  ;;  %v7213_v18 = vunpack.i.h.bf16 %v7211_v8  ;;  %v7212_v19 = vunpack.i.l.bf16 %v7211_v8  ;;  %6913 = vmatprep.subr.bf16.mxu0 %v6912_v5 }
 0xe0d   :  { %6915 = vmatpush3.bf16.msra.mxu0 %v6912_v5 }
 0xe0e   :  { %v7363_v20 = vpop.eup %7362  ;;  %v6936_v22 = vpack.c.bf16 %v7218_v12, %v7217_v13  ;;  %v6922_v23 = vpack.c.bf16 %v7213_v18, %v7212_v19 }
 0xe0f   :  { %v2420_v26 = vpop.permute.xlu1 %2419  ;;  %v1881_v28 = vmul.f32 %v7363_v20, %v7355_v7  ;;  %v2422_v31 = vpop.permute.xlu0 %2421 }
 0xe10   :  { %6522 = vmatmul.mubr.msk.f32.vlgmr.msra.gmra.mrb[12].mxu0 %vm281_vm3, %v1678_v25  ;;  %6923 = vmatprep.subr.bf16.mxu0 %v6922_v23 }
 0xe11   :  { %6938 = vmatprep.subr.msk.bf16.mxu1 %vm7691_vm2, %v6936_v22  ;;  %6571 = vmatprep.mubr.msk.f32.mxu1 %vm193_vm1, %v2420_v26  ;;  %v1565_v26 = vld [vmem:[%s8500_s9 + $0x18] sm:$0xff] }
 0xe12   :  { %v7365_v29 = vpop.eup %7364  ;;  %6925 = vmatpush3.bf16.msra.mxu0 %v6922_v23  ;;  %6535 = vmatprep.mubr.msk.f32.mxu0 %vm281_vm3, %v1881_v28 }
 0xe13   :  { %v1882_v30 = vmul.f32 %v7365_v29, %v7357_v48  ;;  %6941 = vmatpush3.bf16.xpose.msk.msra.mxu1 %vm7691_vm2, %v6936_v22  ;;  %6538 = vmatprep.subr.mxu0 %v1563_v38 }
 0xe15   :  { %6536 = vmatmul.mubr.msk.f32.vlgmr.msra.gmra.mrb[14].mxu0 %vm281_vm3, %v1882_v30 }
 0xe16   :  { %6539 = vmatpush3.msra.mxu0 %v1563_v38 }
 0xe17   :  { %6543 = vmatprep.subr.mxu0 %v1562_v14 }
 0xe1a   :  { %6572 = vmatmul.mubr.msk.f32.vlgmr.msra.gmra.mrb[18].mxu1 %vm193_vm1, %v2422_v31 }
 0xe40   :  { %v2229_v32 = vpop.xlane.xlu1 %2228  ;;  %v2232_v2 = vpop.xlane.xlu0 %2231 }
 0xe41   :  { %v2233_v27 = vsub.f32 %v2225_v58, %v2229_v32  ;;  %v2234_v24 = vsub.f32 %v2226_v59, %v2232_v2  ;;  %v84_v2 = vld [vmem:[%s8501_s10] sm:$0x3] }
 0xe43   :  { %v2235_v33 = vmul.f32 1.442695, %v2233_v27  ;;  %v2237_v34 = vmul.f32 1.442695, %v2234_v24  ;;  %v2709_v27 = vrot.slane %v84_v2, %v7671_v10 }
 0xe45   :  { %7366 = vpow2.f32 %v2235_v33 }
 0xe46   :  { %7368 = vpow2.f32 %v2237_v34 }
 0xe4f   :  { %v7367_v35 = vpop.eup %7366 }
 0xe50   :  { %v7369_v36 = vpop.eup %7368  ;;  %v2239_v37 = vsel %vm281_vm3, %v7367_v35, 0.0 }
 0xe51   :  { %2240 = vadd.xlane.f32.xlu0 %v2239_v37  ;;  %v2242_v1 = vsel %vm281_vm3, %v7369_v36, 0.0 }
 0xe52   :  { %2243 = vadd.xlane.f32.xlu1 %v2242_v1 }
 0xe67   :  { %7220 = vrot.lane.b32.xlu0 %v7862_v51, %s8577_s7 }
 0xede   :  { %v2241_v16 = vpop.xlane.xlu0 %2240 }
 0xedf   :  { %v2244_v42 = vpop.xlane.xlu1 %2243  ;;  %7370 = vrcp.f32 %v2241_v16 }
 0xee0   :  { %7372 = vrcp.f32 %v2244_v42 }
 0xee2   :  { %v7221_v40 = vpop.permute.xlu0 %7220 }
 0xee3   :  { %v6523_v39 = vpop.f32.mrb[12].mxu0  ;;  %v7223_v43 = vunpack.i.h.bf16 %v7221_v40  ;;  %v7222_v44 = vunpack.i.l.bf16 %v7221_v40 }
 0xee4   :  { %v1757_v41 = vpop.f32.mrb[13].mxu0 }
 0xee5   :  { %v6932_v17 = vpack.c.bf16 %v7223_v43, %v7222_v44 }
 0xee8   :  { %v6537_v45 = vpop.f32.mrb[14].mxu0 }
 0xee9   :  { %v1961_v7 = vpop.f32.mrb[15].mxu0  ;;  %v7371_v53 = vpop.eup %7370 }
 0xeea   :  { %6540 = vmatprep.mubr.msk.f32.mxu0 %vm193_vm1, %v1961_v7  ;;  %v7373_v57 = vpop.eup %7372  ;;  %v2247_v59 = vmul.f32 %v7371_v53, %v7367_v35  ;;  %v2753_v7 = vld [vmem:[%s8502_s11 + $0x8] sm:$0xff] }
 0xeeb   :  { %6541 = vmatmul.mubr.msk.f32.vlgmr.msra.gmra.mrb[16].mxu0 %vm193_vm1, %v6537_v45  ;;  %v2248_v56 = vmul.f32 %v7373_v57, %v7369_v36  ;;  %v2844_v53 = vld [vmem:[%s8504_s13 + $0x8] sm:$0xff] }
 0xeec   :  { %6544 = vmatpush3.msra.mxu0 %v1562_v14  ;;  %6545 = vmatprep.mubr.msk.f32.mxu0 %vm193_vm1, %v1757_v41 }
 0xeed   :  { %v6573_v48 = vpop.f32.mrb[18].mxu1  ;;  %6933 = vmatprep.subr.bf16.mxu0 %v6932_v17 }
 0xeee   :  { %v2501_v49 = vpop.f32.mrb[19].mxu1  ;;  %v2511_v50 = vmul.f32 0.35355338, %v6573_v48  ;;  %v2754_v48 = vld [vmem:[%s8502_s11 + $0x10] sm:$0xff] }
 0xeef   :  { %v2510_v52 = vmul.f32 0.35355338, %v2501_v49  ;;  %v2755_v49 = vld [vmem:[%s8502_s11 + $0x18] sm:$0xff] }
 0xef0   :  { %v2513_v60 = vadd.f32 %v2511_v50, %v7903_v11  ;;  %v6950_v50 = vpack.c.bf16 %v2755_v49, %v2754_v48  ;;  %v6046_v48 = vld [vmem:[%s8564_s24 + $0x20] sm:$0xff]  ;;  %v6047_v49 = vld [vmem:[%s8564_s24 + $0x28] sm:$0xff] }
 0xef1   :  { %v2512_v55 = vadd.f32 %v2510_v52, %v7908_v15  ;;  %v1564_v15 = vld [vmem:[%s8500_s9 + $0x10] sm:$0xff]  ;;  %v2843_v52 = vld [vmem:[%s8504_s13] sm:$0xff] }
 0xef2   :  { %v2517_v61 = vsel %vm281_vm3, %v2513_v60, -inf  ;;  %v6954_v57 = vpack.c.bf16 %v2844_v53, %v2843_v52  ;;  %v6048_v52 = vld [vmem:[%s8564_s24 + $0x30] sm:$0xff]  ;;  %v6049_v53 = vld [vmem:[%s8564_s24 + $0x38] sm:$0xff] }
 0xef3   :  { %v2514_v58 = vsel %vm281_vm3, %v2512_v55, -inf  ;;  %6546 = vmatmul.mubr.msk.f32.vlgmr.msra.gmra.mrb[16].mxu0 %vm193_vm1, %v6523_v39 }
 0xef4   :  { %2515 = vmax.xlane.f32.xlu1 %v2514_v58  ;;  %6935 = vmatpush3.bf16.msra.mxu0 %v6932_v17  ;;  %v2846_v58 = vld [vmem:[%s8504_s13 + $0x18] sm:$0xff] }
 0xef5   :  { %6559 = vmatprep.mubr.msk.f32.mxu0 %vm281_vm3, %v2247_v59  ;;  %6562 = vmatprep.subr.mxu0 %v1564_v15 }
 0xef7   :  { %6560 = vmatmul.mubr.msk.f32.vlgmr.msra.gmra.mrb[18].mxu0 %vm281_vm3, %v2248_v56  ;;  %v2848_v56 = vld [vmem:[%s8504_s13 + $0x28] sm:$0xff] }
 0xef8   :  { %2518 = vmax.xlane.f32.xlu1 %v2517_v61  ;;  %6563 = vmatpush3.msra.mxu0 %v1564_v15 }
 0xf81   :  { %v2516_v62 = vpop.xlane.xlu1 %2515 }
 0xf82   :  { %v2520_v54 = vsub.f32 %v2512_v55, %v2516_v62  ;;  %v2845_v55 = vld [vmem:[%s8504_s13 + $0x10] sm:$0xff] }
 0xf83   :  { %v6958_v59 = vpack.c.bf16 %v2846_v58, %v2845_v55  ;;  %v6974_v55 = vpack.c.bf16 %v6049_v53, %v6048_v52 }
 0xf84   :  { %v2522_v0 = vmul.f32 1.442695, %v2520_v54 }
 0xf85   :  { %v2519_v63 = vpop.xlane.xlu1 %2518 }
 0xf86   :  { %v2521_v11 = vsub.f32 %v2513_v60, %v2519_v63  ;;  %v2847_v60 = vld [vmem:[%s8504_s13 + $0x20] sm:$0xff] }
 0xf87   :  { %v6962_v61 = vpack.c.bf16 %v2848_v56, %v2847_v60 }
 0xf88   :  { %v2524_v3 = vmul.f32 1.442695, %v2521_v11 }
 0xf8a   :  { %7374 = vpow2.f32 %v2524_v3  ;;  %v89_v3 = vld [vmem:[%s8508_s17] sm:$0x3] }
 0xf8b   :  { %7376 = vpow2.f32 %v2522_v0 }
 0xf94   :  { %v7375_v5 = vpop.eup %7374 }
 0xf95   :  { %v2529_v4 = vsel %vm281_vm3, %v7375_v5, 0.0  ;;  %v7377_v6 = vpop.eup %7376 }
 0xf96   :  { %2530 = vadd.xlane.f32.xlu1 %v2529_v4  ;;  %v2526_v8 = vsel %vm281_vm3, %v7377_v6, 0.0  ;;  %v2743_v4 = vrot.slane %v89_v3, %v7671_v10 }
 0xf9a   :  { %2527 = vadd.xlane.f32.xlu1 %v2526_v8 }
 0xfab   :  { %7225 = vrot.lane.b32.xlu1 %v7862_v51, %s8578_s29 }
 0xfca   :  { %v6561_v12 = vpop.f32.mrb[18].mxu0 }
 0xfcb   :  { %v2327_v13 = vpop.f32.mrb[19].mxu0 }
 0xfcc   :  { %6564 = vmatprep.mubr.msk.f32.mxu0 %vm193_vm1, %v2327_v13 }
 0xfcd   :  { %6565 = vmatmul.mubr.msk.f32.vlgmr.msra.gmra.mrb[16].mxu0 %vm193_vm1, %v6561_v12 }
0x1023   :  { %v2531_v18 = vpop.xlane.xlu1 %2530 }
0x1024   :  { %7378 = vrcp.f32 %v2531_v18 }
0x1027   :  { %v2528_v19 = vpop.xlane.xlu1 %2527 }
0x1028   :  { %7380 = vrcp.f32 %v2528_v19 }
0x102b   :  { %v7226_v20 = vpop.permute.xlu1 %7225 }
0x102c   :  { %v7228_v22 = vunpack.i.h.bf16 %v7226_v20  ;;  %v7227_v23 = vunpack.i.l.bf16 %v7226_v20 }
0x102e   :  { %v6942_v25 = vpack.c.bf16 %v7228_v22, %v7227_v23  ;;  %v7379_v51 = vpop.eup %7378 }
0x102f   :  { %v2535_v30 = vmul.f32 %v7379_v51, %v7375_v5  ;;  %v90_v5 = vld [vmem:[%s8509_s18] sm:$0x3] }
0x1030   :  { %6943 = vmatprep.subr.bf16.mxu0 %v6942_v25  ;;  %v2749_v12 = vrot.slane %v90_v5, %v7671_v10 }
0x1031   :  { %6945 = vmatpush3.bf16.msra.mxu0 %v6942_v25  ;;  %v2849_v25 = vld [vmem:[%s8504_s13 + $0x30] sm:$0xff] }
0x1032   :  { %v7381_v28 = vpop.eup %7380  ;;  %6581 = vmatprep.subr.mxu0 %v1565_v26 }
0x1033   :  { %v2534_v29 = vmul.f32 %v7381_v28, %v7377_v6  ;;  %v85_v28 = vld [vmem:[%s8503_s12] sm:$0x3] }
0x1035   :  { %6578 = vmatprep.mubr.msk.f32.mxu0 %vm281_vm3, %v2534_v29  ;;  %v2759_v29 = vrot.slane %v85_v28, %v7671_v10 }
0x1036   :  { %6579 = vmatmul.mubr.msk.f32.vlgmr.msra.gmra.mrb[20].mxu0 %vm281_vm3, %v2535_v30 }
0x1037   :  { %6582 = vmatpush3.msra.mxu0 %v1565_v26  ;;  %v2850_v26 = vld [vmem:[%s8504_s13 + $0x38] sm:$0xff] }
0x1038   :  { %6955 = vmatprep.subr.bf16.mxu0 %v6954_v57  ;;  %v6966_v51 = vpack.c.bf16 %v2850_v26, %v2849_v25 }
0x1109   :  { %v6580_v31 = vpop.f32.mrb[20].mxu0 }
0x110a   :  { %v2614_v32 = vpop.f32.mrb[21].mxu0 }
0x110b   :  { %6583 = vmatprep.mubr.msk.f32.mxu0 %vm193_vm1, %v2614_v32 }
0x110c   :  { %6584 = vmatmul.mubr.msk.f32.vlgmr.msra.gmra.mrb[16].mxu0 %vm193_vm1, %v6580_v31 }
0x110d   :  { %6957 = vmatpush3.bf16.msra.mxu0 %v6954_v57 }
0x110e   :  { %6959 = vmatprep.subr.bf16.mxu0 %v6958_v59 }
0x1111   :  { %6961 = vmatpush3.bf16.msra.mxu0 %v6958_v59 }
0x1112   :  { %6963 = vmatprep.subr.bf16.mxu0 %v6962_v61 }
0x1115   :  { %6965 = vmatpush3.bf16.msra.mxu0 %v6962_v61 }
0x1116   :  { %6967 = vmatprep.subr.bf16.mxu0 %v6966_v51 }
0x1119   :  { %6969 = vmatpush3.bf16.msra.mxu0 %v6966_v51 }
0x11df   :  { %v6585_v24 = vpop.f32.mrb[16].mxu0 }
0x11e0   :  { %v2711_v33 = vadd.f32 %v6585_v24, %v2709_v27  ;;  %v2695_v34 = vpop.f32.mrb[17].mxu0 }
0x11e1   :  { %v2710_v35 = vadd.f32 %v2709_v27, %v2695_v34 }
0x11e2   :  { %v2713_v36 = vadd.f32 %v2711_v33, %v7856_v47  ;;  %v86_v33 = vld [vmem:[%s8505_s14] sm:$0x3] }
0x11e3   :  { %v2712_v37 = vadd.f32 %v2710_v35, %v7854_v46  ;;  %v2752_v46 = vld [vmem:[%s8502_s11] sm:$0xff]  ;;  %v2854_v34 = vrot.slane %v86_v33, %v7671_v10 }
0x11e4   :  { %v2717_v1 = vsel %vm101_vm0, %v2713_v36, 0.0  ;;  %v6946_v17 = vpack.c.bf16 %v2753_v7, %v2752_v46 }
0x11e5   :  { %2718 = vadd.xlane.f32.xlu1 %v2717_v1  ;;  %v2714_v38 = vsel %vm101_vm0, %v2712_v37, 0.0 }
0x11e6   :  { %2715 = vadd.xlane.f32.xlu0 %v2714_v38  ;;  %6947 = vmatprep.subr.bf16.mxu1 %v6946_v17 }
0x11e7   :  { %6949 = vmatpush3.bf16.msra.mxu1 %v6946_v17 }
0x11e8   :  { %6951 = vmatprep.subr.bf16.mxu1 %v6950_v50 }
0x11eb   :  { %6953 = vmatpush3.bf16.msra.mxu1 %v6950_v50  ;;  %v6970_v50 = vpack.c.bf16 %v6047_v49, %v6046_v48 }
0x11ed   :  { %6971 = vmatprep.subr.bf16.mxu1 %v6970_v50 }
0x1272   :  { %v2719_v14 = vpop.xlane.xlu1 %2718 }
0x1273   :  { %v2721_v16 = vmul.f32 0.03125, %v2719_v14  ;;  %v2716_v39 = vpop.xlane.xlu0 %2715 }
0x1274   :  { %v2720_v40 = vmul.f32 0.03125, %v2716_v39 }
0x1275   :  { %v2723_v41 = vsub.f32 %v2713_v36, %v2721_v16 }
0x1276   :  { %v2722_v42 = vsub.f32 %v2712_v37, %v2720_v40 }
0x1277   :  { %v2725_v45 = vmul.f32 %v2723_v41, %v2723_v41 }
0x1278   :  { %v2724_v43 = vmul.f32 %v2722_v42, %v2722_v42 }
0x1279   :  { %v2729_v47 = vsel %vm101_vm0, %v2725_v45, 0.0 }
0x127a   :  { %v2726_v44 = vsel %vm101_vm0, %v2724_v43, 0.0 }
0x127b   :  { %2727 = vadd.xlane.f32.xlu0 %v2726_v44 }
0x127f   :  { %2730 = vadd.xlane.f32.xlu0 %v2729_v47 }
0x1308   :  { %v2728_v15 = vpop.xlane.xlu0 %2727 }
0x1309   :  { %v2732_v62 = vmul.f32 0.03125, %v2728_v15  ;;  %v91_v15 = vld [vmem:[%s8510_s19] sm:$0x3] }
0x130b   :  { %v2734_v54 = vadd.f32 1e-05, %v2732_v62  ;;  %v92_v62 = vld [vmem:[%s8511_s20] sm:$0x3] }
0x130c   :  { %v2731_v63 = vpop.xlane.xlu0 %2730 }
0x130d   :  { %7382 = vrsqrt.f32 %v2734_v54  ;;  %v2733_v11 = vmul.f32 0.03125, %v2731_v63  ;;  %v2968_v54 = vrot.slane %v91_v15, %v7671_v10 }
0x130f   :  { %v2735_v0 = vadd.f32 1e-05, %v2733_v11 }
0x1311   :  { %7384 = vrsqrt.f32 %v2735_v0  ;;  %v2974_v0 = vrot.slane %v92_v62, %v7671_v10  ;;  %v7466_v10 = vld [vmem:[%s8566_s30] sm:$0x3]  ;;  %s8580_s30 = smov 120  }
0x1317   :  { %v7383_v6 = vpop.eup %7382 }
0x1318   :  { %v2738_v8 = vmul.f32 %v7383_v6, %v2722_v42 }
0x131a   :  { %v2744_v13 = vmul.f32 %v2743_v4, %v2738_v8 }
0x131b   :  { %v7385_v18 = vpop.eup %7384 }
0x131c   :  { %v2739_v19 = vmul.f32 %v7385_v18, %v2723_v41  ;;  %v2750_v20 = vadd.f32 %v2749_v12, %v2744_v13  ;;  %v8081_v13 = vsub.s32 1, %v7668_v9 }
0x131e   :  { %v2745_v22 = vmul.f32 %v2743_v4, %v2739_v19  ;;  %6594 = vmatprep.mubr.msk.f32.mxu1 %vm101_vm0, %v2750_v20  ;;  %v2985_v18 = vrot.slane %v7466_v10, %v8081_v13 }
0x1320   :  { %v2751_v23 = vadd.f32 %v2749_v12, %v2745_v22 }
0x1322   :  { %6595 = vmatmul.mubr.msk.f32.vlgmr.msra.gmra.mrb[20].mxu1 %vm101_vm0, %v2751_v23 }
0x1323   :  { %6973 = vmatpush3.bf16.msra.mxu1 %v6970_v50 }
0x1324   :  { %6975 = vmatprep.subr.bf16.mxu1 %v6974_v55 }
0x1327   :  { %6977 = vmatpush3.bf16.msra.mxu1 %v6974_v55 }
0x13f5   :  { %v6596_v30 = vpop.f32.mrb[20].mxu1 }
0x13f6   :  { %v2838_v31 = vadd.f32 %v6596_v30, %v2759_v29  ;;  %v2832_v32 = vpop.f32.mrb[21].mxu1 }
0x13f7   :  { %v2833_v2 = vadd.f32 %v2832_v32, %v2759_v29 }
0x13f8   :  { %v2842_v24 = vmax.f32 %v2838_v31, 0.0 }
0x13f9   :  { %v2841_v27 = vmax.f32 %v2833_v2, 0.0 }
0x13fb   :  { %6613 = vmatprep.mubr.msk.f32.mxu0 %vm2855_vm4, %v2841_v27 }
0x13fc   :  { %6614 = vmatmul.mubr.msk.f32.vlgmr.msra.gmra.mrb[22].mxu0 %vm2855_vm4, %v2842_v24 }
0x14cf   :  { %v6615_v35 = vpop.f32.mrb[22].mxu0 }
0x14d0   :  { %v2928_v36 = vpop.f32.mrb[23].mxu0  ;;  %v2934_v37 = vadd.f32 %v6615_v35, %v2854_v34 }
0x14d1   :  { %v2929_v1 = vadd.f32 %v2928_v36, %v2854_v34 }
0x14d2   :  { %v2938_v16 = vadd.f32 %v2934_v37, %v2751_v23 }
0x14d3   :  { %v2937_v38 = vadd.f32 %v2929_v1, %v2750_v20 }
0x14d4   :  { %v2942_v39 = vsel %vm101_vm0, %v2938_v16, 0.0 }
0x14d5   :  { %v2939_v14 = vsel %vm101_vm0, %v2937_v38, 0.0 }
0x14d6   :  { %2940 = vadd.xlane.f32.xlu0 %v2939_v14 }
0x14da   :  { %2943 = vadd.xlane.f32.xlu0 %v2942_v39  ;;  %v8132_v39 = vld [vmem:[%s8569_s26 + $0x8] sm:$0xff] }
0x1563   :  { %v2941_v40 = vpop.xlane.xlu0 %2940 }
0x1564   :  { %v2945_v41 = vmul.f32 0.03125, %v2941_v40 }
0x1566   :  { %v2947_v42 = vsub.f32 %v2937_v38, %v2945_v41  ;;  %v8138_v41 = vld [vmem:[%s8569_s26] sm:$0xff]  ;;  %s8581_s26 = smov 64  }
0x1567   :  { %v2944_v43 = vpop.xlane.xlu0 %2943 }
0x1568   :  { %v2946_v44 = vmul.f32 0.03125, %v2944_v43  ;;  %v2949_v45 = vmul.f32 %v2947_v42, %v2947_v42 }
0x156a   :  { %v2948_v47 = vsub.f32 %v2938_v16, %v2946_v44  ;;  %v2951_v46 = vsel %vm101_vm0, %v2949_v45, 0.0 }
0x156b   :  { %2952 = vadd.xlane.f32.xlu0 %v2951_v46 }
0x156c   :  { %v2950_v7 = vmul.f32 %v2948_v47, %v2948_v47 }
0x156e   :  { %v2954_v17 = vsel %vm101_vm0, %v2950_v7, 0.0 }
0x156f   :  { %2955 = vadd.xlane.f32.xlu1 %v2954_v17 }
0x15f8   :  { %v2953_v57 = vpop.xlane.xlu0 %2952 }
0x15f9   :  { %v2957_v58 = vmul.f32 0.03125, %v2953_v57 }
0x15fb   :  { %v2959_v59 = vadd.f32 1e-05, %v2957_v58 }
0x15fc   :  { %v2956_v60 = vpop.xlane.xlu1 %2955 }
0x15fd   :  { %7386 = vrsqrt.f32 %v2959_v59  ;;  %v2958_v56 = vmul.f32 0.03125, %v2956_v60 }
0x15ff   :  { %v2960_v61 = vadd.f32 1e-05, %v2958_v56 }
0x1601   :  { %7388 = vrsqrt.f32 %v2960_v61 }
0x1607   :  { %v7387_v63 = vpop.eup %7386 }
0x1608   :  { %v2963_v11 = vmul.f32 %v7387_v63, %v2947_v42 }
0x160a   :  { %v2969_v3 = vmul.f32 %v2968_v54, %v2963_v11 }
0x160b   :  { %v7389_v5 = vpop.eup %7388 }
0x160c   :  { %v2964_v4 = vmul.f32 %v7389_v5, %v2948_v47  ;;  %v8072_v6 = vadd.f32 %v2974_v0, %v2969_v3 }
0x160e   :  { %v2970_v8 = vmul.f32 %v2968_v54, %v2964_v4  ;;  %6624 = vmatprep.mubr.msk.f32.mxu1 %vm101_vm0, %v8072_v6 }
0x1610   :  { %v8076_v12 = vadd.f32 %v2974_v0, %v2970_v8 }
0x1612   :  { %6625 = vmatmul.mubr.msk.f32.vlgmr.msra.gmra.mrb[22].mxu1 %vm101_vm0, %v8076_v12 }
0x16e5   :  { %v6626_v19 = vpop.f32.mrb[22].mxu1 }
0x16e6   :  { %v8087_v20 = vadd.f32 %v6626_v19, %v2985_v18  ;;  %v3058_v22 = vpop.f32.mrb[23].mxu1 }
0x16e7   :  { %v8089_v23 = vadd.f32 %v3058_v22, %v2985_v18 }
0x16e9   :  { %6631 = vmatprep.mubr.msk.f32.mxu1 %vm193_vm1, %v8089_v23  ;;  %v8095_v25 = vpack.i.bf16 %v8087_v20, %v8089_v23 }
0x16eb   :  { %7235 = vrot.lane.b32.xlu1 %v8095_v25, %s8576_s0  ;;  %7230 = vrot.lane.b32.xlu0 %v8095_v25, %s8579_s21 }
0x16ef   :  { %3274 = vrot.lane.b32.xlu1 %v8089_v23, %s8580_s30  ;;  %3276 = vrot.lane.b32.xlu0 %v8087_v20, %s8580_s30 }
0x16f3   :  { %7240 = vrot.lane.b32.xlu1 %v8095_v25, %s8577_s7  ;;  %3640 = vrot.lane.b32.xlu0 %v8089_v23, %s8573_s6 }
0x16f7   :  { %3642 = vrot.lane.b32.xlu1 %v8087_v20, %s8573_s6 }
0x175d   :  { %v7236_v9 = vpop.permute.xlu1 %7235  ;;  %v7231_v26 = vpop.permute.xlu0 %7230 }
0x175e   :  { %v7238_v51 = vunpack.i.h.bf16 %v7236_v9  ;;  %v7237_v28 = vunpack.i.l.bf16 %v7236_v9  ;;  %v7233_v29 = vunpack.i.h.bf16 %v7231_v26  ;;  %v7232_v30 = vunpack.i.l.bf16 %v7231_v26 }
0x1760   :  { %v6978_v31 = vpack.c.bf16 %v7233_v29, %v7232_v30  ;;  %v6988_v2 = vpack.c.bf16 %v7238_v51, %v7237_v28 }
0x1761   :  { %v3275_v32 = vpop.permute.xlu1 %3274  ;;  %v3277_v35 = vpop.permute.xlu0 %3276 }
0x1762   :  { %6980 = vmatprep.subr.msk.bf16.mxu1 %vm7691_vm2, %v6978_v31 }
0x1763   :  { %6983 = vmatpush3.bf16.xpose.msk.msra.mxu1 %vm7691_vm2, %v6978_v31 }
0x1764   :  { %6990 = vmatprep.subr.msk.bf16.mxu1 %vm7691_vm2, %v6988_v2 }
0x1765   :  { %v7241_v27 = vpop.permute.xlu1 %7240  ;;  %v3641_v36 = vpop.permute.xlu0 %3640 }
0x1766   :  { %v7243_v24 = vunpack.i.h.bf16 %v7241_v27  ;;  %v7242_v33 = vunpack.i.l.bf16 %v7241_v27 }
0x1768   :  { %v6998_v34 = vpack.c.bf16 %v7243_v24, %v7242_v33 }
0x1769   :  { %v3643_v37 = vpop.permute.xlu1 %3642 }
0x176a   :  { %6632 = vmatmul.mubr.msk.f32.vlgmr.msra.gmra.mrb[24].mxu1 %vm193_vm1, %v8087_v20 }
0x176b   :  { %6993 = vmatpush3.bf16.xpose.msk.msra.mxu1 %vm7691_vm2, %v6988_v2  ;;  %6645 = vmatprep.mubr.msk.f32.mxu1 %vm193_vm1, %v3275_v32 }
0x176c   :  { %7000 = vmatprep.subr.msk.bf16.mxu1 %vm7691_vm2, %v6998_v34 }
0x1772   :  { %6646 = vmatmul.mubr.msk.f32.vlgmr.msra.gmra.mrb[26].mxu1 %vm193_vm1, %v3277_v35 }
0x1773   :  { %7003 = vmatpush3.bf16.xpose.msk.msra.mxu1 %vm7691_vm2, %v6998_v34  ;;  %6669 = vmatprep.mubr.msk.f32.mxu1 %vm193_vm1, %v3641_v36 }
0x177a   :  { %6670 = vmatmul.mubr.msk.f32.vlgmr.msra.gmra.mrb[28].mxu1 %vm193_vm1, %v3643_v37 }
0x183d   :  { %v6633_v1 = vpop.f32.mrb[24].mxu1 }
0x183e   :  { %v3162_v38 = vmul.f32 0.35355338, %v6633_v1  ;;  %v3152_v14 = vpop.f32.mrb[25].mxu1 }
0x183f   :  { %v3161_v16 = vmul.f32 0.35355338, %v3152_v14 }
0x1840   :  { %v3164_v40 = vadd.f32 %v8132_v39, %v3162_v38 }
0x1841   :  { %v3163_v42 = vadd.f32 %v8138_v41, %v3161_v16 }
0x1842   :  { %v3168_v43 = vsel %vm281_vm3, %v3164_v40, -inf }
0x1843   :  { %3169 = vmax.xlane.f32.xlu1 %v3168_v43  ;;  %v3165_v44 = vsel %vm281_vm3, %v3163_v42, -inf }
0x1844   :  { %3166 = vmax.xlane.f32.xlu0 %v3165_v44 }
0x1845   :  { %v6647_v45 = vpop.f32.mrb[26].mxu1 }
0x1846   :  { %v3356_v47 = vpop.f32.mrb[27].mxu1  ;;  %v3366_v46 = vmul.f32 0.35355338, %v6647_v45 }
0x1847   :  { %v3365_v7 = vmul.f32 0.35355338, %v3356_v47 }
0x1848   :  { %v3368_v49 = vadd.f32 %v8132_v39, %v3366_v46 }
0x1849   :  { %v3367_v17 = vadd.f32 %v8138_v41, %v3365_v7 }
0x184a   :  { %v3372_v53 = vsel %vm281_vm3, %v3368_v49, -inf }
0x184b   :  { %v3369_v48 = vsel %vm281_vm3, %v3367_v17, -inf }
0x184c   :  { %3370 = vmax.xlane.f32.xlu0 %v3369_v48 }
0x184d   :  { %v6671_v50 = vpop.f32.mrb[28].mxu1 }
0x184e   :  { %v3722_v52 = vpop.f32.mrb[29].mxu1  ;;  %v3732_v22 = vmul.f32 0.35355338, %v6671_v50 }
0x184f   :  { %v3731_v9 = vmul.f32 0.35355338, %v3722_v52 }
0x1850   :  { %3373 = vmax.xlane.f32.xlu0 %v3372_v53  ;;  %v3734_v26 = vadd.f32 %v8132_v39, %v3732_v22 }
0x1851   :  { %v3733_v51 = vadd.f32 %v8138_v41, %v3731_v9 }
0x1852   :  { %v3738_v29 = vsel %vm281_vm3, %v3734_v26, -inf }
0x1853   :  { %v3735_v28 = vsel %vm281_vm3, %v3733_v51, -inf }
0x18d0   :  { %v3170_v55 = vpop.xlane.xlu1 %3169 }
0x18d1   :  { %v3172_v57 = vsub.f32 %v3164_v40, %v3170_v55  ;;  %v3167_v58 = vpop.xlane.xlu0 %3166 }
0x18d2   :  { %v3171_v59 = vsub.f32 %v3163_v42, %v3167_v58 }
0x18d3   :  { %v3175_v60 = vmul.f32 1.442695, %v3172_v57 }
0x18d4   :  { %v3173_v56 = vmul.f32 1.442695, %v3171_v59 }
0x18d5   :  { %7390 = vpow2.f32 %v3175_v60 }
0x18d6   :  { %7392 = vpow2.f32 %v3173_v56  ;;  %v6053_v56 = vld [vmem:[%s8570_s4 + $0x28] sm:$0xff] }
0x18d9   :  { %v3371_v61 = vpop.xlane.xlu0 %3370 }
0x18da   :  { %v3375_v15 = vsub.f32 %v3367_v17, %v3371_v61  ;;  %v6052_v61 = vld [vmem:[%s8570_s4 + $0x20] sm:$0xff] }
0x18dc   :  { %v3377_v62 = vmul.f32 1.442695, %v3375_v15 }
0x18dd   :  { %v3374_v54 = vpop.xlane.xlu0 %3373 }
0x18de   :  { %7394 = vpow2.f32 %v3377_v62  ;;  %v3376_v63 = vsub.f32 %v3368_v49, %v3374_v54 }
0x18df   :  { %v7391_v11 = vpop.eup %7390 }
0x18e0   :  { %v7393_v0 = vpop.eup %7392  ;;  %v3379_v3 = vmul.f32 1.442695, %v3376_v63  ;;  %v3180_v5 = vsel %vm281_vm3, %v7391_v11, 0.0 }
0x18e1   :  { %3181 = vadd.xlane.f32.xlu0 %v3180_v5  ;;  %v3177_v4 = vsel %vm281_vm3, %v7393_v0, 0.0 }
0x18e2   :  { %7396 = vpow2.f32 %v3379_v3  ;;  %3178 = vadd.xlane.f32.xlu1 %v3177_v4 }
0x18e8   :  { %v7395_v8 = vpop.eup %7394 }
0x18e9   :  { %v3381_v10 = vsel %vm281_vm3, %v7395_v8, 0.0 }
0x18ea   :  { %3382 = vadd.xlane.f32.xlu1 %v3381_v10 }
0x18ec   :  { %v7397_v18 = vpop.eup %7396 }
0x18ed   :  { %v3384_v19 = vsel %vm281_vm3, %v7397_v18, 0.0 }
0x18ee   :  { %3385 = vadd.xlane.f32.xlu0 %v3384_v19 }
0x18fb   :  { %7245 = vrot.lane.b32.xlu1 %v8095_v25, %s8581_s26  ;;  %s5961_s26 = sshll.u32 %s7519_s25, 4  ;;  %s5962_s26 = int_to_ptr.vmem [resolvable:$true] %s5961_s26 }
0x18fc   :  { %p7489_p1 = scmp.lt.s32.totalorder %s5962_s26, %s5962_s26 }
0x18ff   :  { %7255 = vrot.lane.b32.xlu1 %v8095_v25, %s8578_s29 }
0x1903   :  { %3927 = vrot.lane.b32.xlu1 %v8089_v23, %s8575_s5 }
0x1904   :  { %7250 = vrot.lane.b32.xlu0 %v8095_v25, %s8582_s15 }
0x1908   :  { %3929 = vrot.lane.b32.xlu0 %v8087_v20, %s8575_s5 }
0x1927   :  { %3736 = vmax.xlane.f32.xlu1 %v3735_v28  ;;  %3739 = vmax.xlane.f32.xlu0 %v3738_v29 }
0x196e   :  { %v3182_v23 = vpop.xlane.xlu0 %3181 }
0x196f   :  { %v3179_v30 = vpop.xlane.xlu1 %3178 }
0x1970   :  { %7398 = vrcp.f32 %v3179_v30 }
0x1971   :  { %7400 = vrcp.f32 %v3182_v23 }
0x1977   :  { %v3383_v31 = vpop.xlane.xlu1 %3382 }
0x1978   :  { %7402 = vrcp.f32 %v3383_v31 }
0x197a   :  { %v7399_v32 = vpop.eup %7398 }
0x197b   :  { %v7246_v20 = vpop.permute.xlu1 %7245  ;;  %v3386_v2 = vpop.xlane.xlu0 %3385  ;;  %v3185_v27 = vmul.f32 %v7399_v32, %v7393_v0 }
0x197c   :  { %v7248_v24 = vunpack.i.h.bf16 %v7246_v20  ;;  %v7247_v33 = vunpack.i.l.bf16 %v7246_v20  ;;  %7404 = vrcp.f32 %v3386_v2  ;;  %v7401_v35 = vpop.eup %7400 }
0x197d   :  { %6638 = vmatprep.mubr.msk.f32.mxu0 %vm281_vm3, %v3185_v27  ;;  %v3186_v42 = vmul.f32 %v7401_v35, %v7391_v11 }
0x197e   :  { %v6984_v34 = vpack.c.bf16 %v7248_v24, %v7247_v33 }
0x197f   :  { %v7256_v36 = vpop.permute.xlu1 %7255  ;;  %v7251_v37 = vpop.permute.xlu0 %7250 }
0x1980   :  { %v7258_v1 = vunpack.i.h.bf16 %v7256_v36  ;;  %v7257_v38 = vunpack.i.l.bf16 %v7256_v36  ;;  %v7253_v14 = vunpack.i.h.bf16 %v7251_v37  ;;  %v7252_v16 = vunpack.i.l.bf16 %v7251_v37  ;;  %6985 = vmatprep.subr.bf16.mxu0 %v6984_v34 }
0x1981   :  { %6987 = vmatpush3.bf16.msra.mxu0 %v6984_v34 }
0x1982   :  { %v7403_v40 = vpop.eup %7402  ;;  %v7008_v43 = vpack.c.bf16 %v7258_v1, %v7257_v38  ;;  %v6994_v44 = vpack.c.bf16 %v7253_v14, %v7252_v16 }
0x1983   :  { %v3928_v45 = vpop.permute.xlu1 %3927  ;;  %v3389_v47 = vmul.f32 %v7403_v40, %v7395_v8  ;;  %v3930_v17 = vpop.permute.xlu0 %3929 }
0x1984   :  { %6639 = vmatmul.mubr.msk.f32.vlgmr.msra.gmra.mrb[24].mxu0 %vm281_vm3, %v3186_v42  ;;  %6995 = vmatprep.subr.bf16.mxu0 %v6994_v44 }
0x1985   :  { %7010 = vmatprep.subr.msk.bf16.mxu1 %vm7691_vm2, %v7008_v43  ;;  %6688 = vmatprep.mubr.msk.f32.mxu1 %vm193_vm1, %v3928_v45 }
0x1986   :  { %v7405_v46 = vpop.eup %7404  ;;  %6997 = vmatpush3.bf16.msra.mxu0 %v6994_v44  ;;  %6652 = vmatprep.mubr.msk.f32.mxu0 %vm281_vm3, %v3389_v47  ;;  %v6055_v44 = vld [vmem:[%s8570_s4 + $0x38] sm:$0xff] }
0x1987   :  { %v3390_v7 = vmul.f32 %v7405_v46, %v7397_v18  ;;  %7013 = vmatpush3.bf16.xpose.msk.msra.mxu1 %vm7691_vm2, %v7008_v43  ;;  %6655 = vmatprep.subr.mxu0 %v6053_v56 }
0x1989   :  { %6653 = vmatmul.mubr.msk.f32.vlgmr.msra.gmra.mrb[26].mxu0 %vm281_vm3, %v3390_v7 }
0x198a   :  { %6656 = vmatpush3.msra.mxu0 %v6053_v56 }
0x198b   :  { %6660 = vmatprep.subr.mxu0 %v6052_v61 }
0x198e   :  { %6689 = vmatmul.mubr.msk.f32.vlgmr.msra.gmra.mrb[30].mxu1 %vm193_vm1, %v3930_v17 }
0x19b4   :  { %v3737_v48 = vpop.xlane.xlu1 %3736  ;;  %v3740_v49 = vpop.xlane.xlu0 %3739 }
0x19b5   :  { %v3741_v50 = vsub.f32 %v3733_v51, %v3737_v48  ;;  %v3742_v52 = vsub.f32 %v3734_v26, %v3740_v49  ;;  %v7469_v48 = vld [vmem:[%s8565_s28] sm:$0xff] }
0x19b6   :  { %v7470_v49 = vld [vmem:[%s8571_s2] sm:$0x3]  ;;  %s8586_s2 = sld [smem:[#allocation16_spill]] }
0x19b7   :  { %v3743_v53 = vmul.f32 1.442695, %v3741_v50  ;;  %v3745_v55 = vmul.f32 1.442695, %v3742_v52  ;;  %v4217_v50 = vrot.slane %v7470_v49, %v8081_v13 }
0x19b9   :  { %7406 = vpow2.f32 %v3743_v53 }
0x19ba   :  { %7408 = vpow2.f32 %v3745_v55 }
0x19c3   :  { %v7407_v57 = vpop.eup %7406 }
0x19c4   :  { %v7409_v58 = vpop.eup %7408  ;;  %v3747_v59 = vsel %vm281_vm3, %v7407_v57, 0.0 }
0x19c5   :  { %3748 = vadd.xlane.f32.xlu0 %v3747_v59  ;;  %v3750_v60 = vsel %vm281_vm3, %v7409_v58, 0.0 }
0x19c6   :  { %3751 = vadd.xlane.f32.xlu1 %v3750_v60 }
0x19db   :  { %7260 = vrot.lane.b32.xlu0 %v8095_v25, %s8583_s16 }
0x1a52   :  { %v3749_v15 = vpop.xlane.xlu0 %3748 }
0x1a53   :  { %v3752_v11 = vpop.xlane.xlu1 %3751  ;;  %7410 = vrcp.f32 %v3749_v15  ;;  %v6091_v15 = vld [vmem:[%s8572_s27 + $0x38] sm:$0xff] }
0x1a54   :  { %7412 = vrcp.f32 %v3752_v11 }
0x1a56   :  { %v7261_v54 = vpop.permute.xlu0 %7260 }
0x1a57   :  { %v6640_v62 = vpop.f32.mrb[24].mxu0  ;;  %v7263_v0 = vunpack.i.h.bf16 %v7261_v54  ;;  %v7262_v3 = vunpack.i.l.bf16 %v7261_v54 }
0x1a58   :  { %v3265_v63 = vpop.f32.mrb[25].mxu0 }
0x1a59   :  { %v7004_v8 = vpack.c.bf16 %v7263_v0, %v7262_v3 }
0x1a5c   :  { %v6654_v5 = vpop.f32.mrb[26].mxu0 }
0x1a5d   :  { %v3469_v4 = vpop.f32.mrb[27].mxu0  ;;  %v7411_v9 = vpop.eup %7410 }
0x1a5e   :  { %6657 = vmatprep.mubr.msk.f32.mxu0 %vm193_vm1, %v3469_v4  ;;  %v7413_v51 = vpop.eup %7412  ;;  %v3755_v29 = vmul.f32 %v7411_v9, %v7407_v57 }
0x1a5f   :  { %6658 = vmatmul.mubr.msk.f32.vlgmr.msra.gmra.mrb[28].mxu0 %vm193_vm1, %v6654_v5  ;;  %v3756_v23 = vmul.f32 %v7413_v51, %v7409_v58 }
0x1a60   :  { %6661 = vmatpush3.msra.mxu0 %v6052_v61  ;;  %6662 = vmatprep.mubr.msk.f32.mxu0 %vm193_vm1, %v3265_v63  ;;  %v6090_v61 = vld [vmem:[%s8572_s27 + $0x30] sm:$0xff] }
0x1a61   :  { %v6690_v10 = vpop.f32.mrb[30].mxu1  ;;  %7005 = vmatprep.subr.bf16.mxu0 %v7004_v8  ;;  %v7022_v51 = vpack.c.bf16 %v6091_v15, %v6090_v61 }
0x1a62   :  { %v4009_v18 = vpop.f32.mrb[31].mxu1  ;;  %v4019_v19 = vmul.f32 0.35355338, %v6690_v10  ;;  %v6088_v10 = vld [vmem:[%s8572_s27 + $0x20] sm:$0xff] }
0x1a63   :  { %v4018_v22 = vmul.f32 0.35355338, %v4009_v18  ;;  %v6089_v18 = vld [vmem:[%s8572_s27 + $0x28] sm:$0xff]  ;;  %s8589_s27 = sld [smem:[#allocation14_spill]] }
0x1a64   :  { %v4021_v30 = vadd.f32 %v8132_v39, %v4019_v19  ;;  %v7269_v19 = vpack.i.bf16 %v6089_v18, %v6088_v10 }
0x1a65   :  { %v4020_v26 = vadd.f32 %v8138_v41, %v4018_v22  ;;  %v6054_v41 = vld [vmem:[%s8570_s4 + $0x30] sm:$0xff]  ;;  %v7471_v22 = vld [vmem:[%s8499_s8] sm:$0x3]  ;;  %s8585_s4 = sld [smem:[#allocation15_spill]] }
0x1a66   :  { %v4025_v31 = vsel %vm281_vm3, %v4021_v30, -inf  ;;  %v4268_v9 = vrot.slane %v7471_v22, %v8081_v13 }
0x1a67   :  { %v4022_v28 = vsel %vm281_vm3, %v4020_v26, -inf  ;;  %6663 = vmatmul.mubr.msk.f32.vlgmr.msra.gmra.mrb[28].mxu0 %vm193_vm1, %v6640_v62  ;;  %v7274_v62 = vpack.i.bf16 %v6091_v15, %v6090_v61 }
0x1a68   :  { %4023 = vmax.xlane.f32.xlu1 %v4022_v28  ;;  %7007 = vmatpush3.bf16.msra.mxu0 %v7004_v8 }
0x1a69   :  { %6676 = vmatprep.mubr.msk.f32.mxu0 %vm281_vm3, %v3755_v29  ;;  %6679 = vmatprep.subr.mxu0 %v6054_v41 }
0x1a6b   :  { %6677 = vmatmul.mubr.msk.f32.vlgmr.msra.gmra.mrb[30].mxu0 %vm281_vm3, %v3756_v23 }
0x1a6c   :  { %4026 = vmax.xlane.f32.xlu1 %v4025_v31  ;;  %6680 = vmatpush3.msra.mxu0 %v6054_v41 }
0x1af5   :  { %v4024_v32 = vpop.xlane.xlu1 %4023 }
0x1af6   :  { %v4028_v20 = vsub.f32 %v4020_v26, %v4024_v32  ;;  %v7018_v26 = vpack.c.bf16 %v6089_v18, %v6088_v10 }
0x1af8   :  { %v4030_v27 = vmul.f32 1.442695, %v4028_v20  ;;  %7019 = vmatprep.subr.bf16.mxu1 %v7018_v26 }
0x1af9   :  { %v4027_v2 = vpop.xlane.xlu1 %4026  ;;  %7021 = vmatpush3.bf16.msra.mxu1 %v7018_v26 }
0x1afa   :  { %v4029_v39 = vsub.f32 %v4021_v30, %v4027_v2  ;;  %7023 = vmatprep.subr.bf16.mxu1 %v7022_v51 }
0x1afc   :  { %v4032_v24 = vmul.f32 1.442695, %v4029_v39 }
0x1afd   :  { %7025 = vmatpush3.bf16.msra.mxu1 %v7022_v51 }
0x1afe   :  { %7414 = vpow2.f32 %v4032_v24 }
0x1aff   :  { %7416 = vpow2.f32 %v4030_v27 }
0x1b08   :  { %v7415_v33 = vpop.eup %7414 }
0x1b09   :  { %v4037_v34 = vsel %vm281_vm3, %v7415_v33, 0.0  ;;  %v7417_v35 = vpop.eup %7416 }
0x1b0a   :  { %4038 = vadd.xlane.f32.xlu1 %v4037_v34  ;;  %v4034_v36 = vsel %vm281_vm3, %v7417_v35, 0.0 }
0x1b0e   :  { %4035 = vadd.xlane.f32.xlu1 %v4034_v36 }
0x1b1f   :  { %7265 = vrot.lane.b32.xlu1 %v8095_v25, %s8584_s23 }
0x1b3e   :  { %v6678_v37 = vpop.f32.mrb[30].mxu0 }
0x1b3f   :  { %v3835_v1 = vpop.f32.mrb[31].mxu0 }
0x1b40   :  { %6681 = vmatprep.mubr.msk.f32.mxu0 %vm193_vm1, %v3835_v1 }
0x1b41   :  { %6682 = vmatmul.mubr.msk.f32.vlgmr.msra.gmra.mrb[28].mxu0 %vm193_vm1, %v6678_v37  ;;  %v7472_v37 = vld [vmem:[%s8585_s4] sm:$0x3] }
0x1b42   :  { %v4251_v1 = vrot.slane %v7472_v37, %v8081_v13 }
0x1b97   :  { %v4039_v38 = vpop.xlane.xlu1 %4038 }
0x1b98   :  { %7418 = vrcp.f32 %v4039_v38 }
0x1b9b   :  { %v4036_v14 = vpop.xlane.xlu1 %4035 }
0x1b9c   :  { %7420 = vrcp.f32 %v4036_v14 }
0x1b9f   :  { %v7266_v16 = vpop.permute.xlu1 %7265 }
0x1ba0   :  { %v7268_v40 = vunpack.i.h.bf16 %v7266_v16  ;;  %v7267_v42 = vunpack.i.l.bf16 %v7266_v16  ;;  %v7473_v16 = vld [vmem:[%s8565_s28 + $0x8] sm:$0xff] }
0x1ba2   :  { %v7014_v43 = vpack.c.bf16 %v7268_v40, %v7267_v42  ;;  %v7419_v25 = vpop.eup %7418  ;;  %v7474_v42 = vld [vmem:[%s8586_s2] sm:$0x3]  ;;  %s8590_s2 = sld [smem:[#allocation17_spill]] }
0x1ba3   :  { %v4043_v46 = vmul.f32 %v7419_v25, %v7415_v33 }
0x1ba4   :  { %7015 = vmatprep.subr.bf16.mxu0 %v7014_v43 }
0x1ba5   :  { %7017 = vmatpush3.bf16.msra.mxu0 %v7014_v43  ;;  %v4257_v43 = vrot.slane %v7474_v42, %v8081_v13 }
0x1ba6   :  { %v7421_v45 = vpop.eup %7420  ;;  %6698 = vmatprep.subr.mxu0 %v6055_v44 }
0x1ba7   :  { %v4042_v47 = vmul.f32 %v7421_v45, %v7417_v35 }
0x1ba9   :  { %6695 = vmatprep.mubr.msk.f32.mxu0 %vm281_vm3, %v4042_v47 }
0x1baa   :  { %6696 = vmatmul.mubr.msk.f32.vlgmr.msra.gmra.mrb[32].mxu0 %vm281_vm3, %v4043_v46 }
0x1bab   :  { %6699 = vmatpush3.msra.mxu0 %v6055_v44 }
0x1c7d   :  { %v6697_v7 = vpop.f32.mrb[32].mxu0 }
0x1c7e   :  { %v4122_v17 = vpop.f32.mrb[33].mxu0 }
0x1c7f   :  { %6700 = vmatprep.mubr.msk.f32.mxu0 %vm193_vm1, %v4122_v17 }
0x1c80   :  { %6701 = vmatmul.mubr.msk.f32.vlgmr.msra.gmra.mrb[28].mxu0 %vm193_vm1, %v6697_v7 }
0x1c81   :  { %6722 = vmatprep.mubr.msk.f32.mxu0 %vm101_vm0, %v7469_v48 }
0x1d53   :  { %v6702_v52 = vpop.f32.mrb[28].mxu0 }
0x1d54   :  { %v4219_v53 = vadd.f32 %v6702_v52, %v4217_v50  ;;  %v4203_v55 = vpop.f32.mrb[29].mxu0 }
0x1d55   :  { %v4218_v57 = vadd.f32 %v4217_v50, %v4203_v55 }
0x1d56   :  { %v4221_v58 = vadd.f32 %v4219_v53, %v8076_v12 }
0x1d57   :  { %v4220_v59 = vadd.f32 %v4218_v57, %v8072_v6 }
0x1d58   :  { %v4225_v60 = vsel %vm101_vm0, %v4221_v58, 0.0 }
0x1d59   :  { %4226 = vadd.xlane.f32.xlu1 %v4225_v60  ;;  %v4222_v56 = vsel %vm101_vm0, %v4220_v59, 0.0 }
0x1d5a   :  { %4223 = vadd.xlane.f32.xlu0 %v4222_v56 }
0x1d6a   :  { %7275 = vrot.lane.b32.xlu1 %v7274_v62, %s8579_s21 }
0x1de6   :  { %v4227_v12 = vpop.xlane.xlu1 %4226 }
0x1de7   :  { %v4229_v54 = vmul.f32 0.03125, %v4227_v12  ;;  %v4224_v6 = vpop.xlane.xlu0 %4223 }
0x1de8   :  { %v4228_v63 = vmul.f32 0.03125, %v4224_v6 }
0x1de9   :  { %v4231_v11 = vsub.f32 %v4221_v58, %v4229_v54 }
0x1dea   :  { %v4230_v0 = vsub.f32 %v4220_v59, %v4228_v63  ;;  %v7276_v31 = vpop.permute.xlu1 %7275 }
0x1deb   :  { %v4233_v3 = vmul.f32 %v4231_v11, %v4231_v11  ;;  %v7278_v20 = vunpack.i.h.bf16 %v7276_v31  ;;  %v7277_v2 = vunpack.i.l.bf16 %v7276_v31 }
0x1dec   :  { %v4232_v4 = vmul.f32 %v4230_v0, %v4230_v0 }
0x1ded   :  { %v4237_v5 = vsel %vm101_vm0, %v4233_v3, 0.0  ;;  %v7030_v34 = vpack.c.bf16 %v7278_v20, %v7277_v2 }
0x1dee   :  { %4238 = vadd.xlane.f32.xlu0 %v4237_v5  ;;  %v4234_v8 = vsel %vm101_vm0, %v4232_v4, 0.0 }
0x1df2   :  { %4235 = vadd.xlane.f32.xlu0 %v4234_v8 }
0x1e08   :  { %7270 = vrot.lane.b32.xlu0 %v7269_v19, %s8579_s21 }
0x1e0c   :  { %4367 = vrot.lane.b32.xlu0 %v4268_v9, %s8579_s21 }
0x1e7b   :  { %v4239_v28 = vpop.xlane.xlu0 %4238 }
0x1e7c   :  { %v4241_v29 = vmul.f32 0.03125, %v4239_v28 }
0x1e7e   :  { %v4243_v30 = vadd.f32 1e-05, %v4241_v29 }
0x1e7f   :  { %v4236_v23 = vpop.xlane.xlu0 %4235 }
0x1e80   :  { %7422 = vrsqrt.f32 %v4243_v30  ;;  %v4240_v41 = vmul.f32 0.03125, %v4236_v23 }
0x1e82   :  { %v4242_v32 = vadd.f32 1e-05, %v4240_v41 }
0x1e83   :  { %v7271_v39 = vpop.permute.xlu0 %7270 }
0x1e84   :  { %7424 = vrsqrt.f32 %v4242_v32  ;;  %v7273_v27 = vunpack.i.h.bf16 %v7271_v39  ;;  %v7272_v24 = vunpack.i.l.bf16 %v7271_v39 }
0x1e86   :  { %v7026_v33 = vpack.c.bf16 %v7273_v27, %v7272_v24 }
0x1e87   :  { %v4368_v47 = vpop.permute.xlu0 %4367 }
0x1e88   :  { %7027 = vmatprep.subr.bf16.mxu0 %v7026_v33 }
0x1e89   :  { %7029 = vmatpush3.bf16.msra.mxu0 %v7026_v33 }
0x1e8a   :  { %v7423_v35 = vpop.eup %7422  ;;  %7031 = vmatprep.subr.bf16.mxu0 %v7030_v34 }
0x1e8b   :  { %v4247_v36 = vmul.f32 %v7423_v35, %v4231_v11 }
0x1e8d   :  { %7033 = vmatpush3.bf16.msra.mxu0 %v7030_v34  ;;  %v4253_v40 = vmul.f32 %v4251_v1, %v4247_v36 }
0x1e8e   :  { %v7425_v38 = vpop.eup %7424 }
0x1e8f   :  { %v4246_v14 = vmul.f32 %v7425_v38, %v4230_v0  ;;  %v8258_v45 = vadd.f32 %v4257_v43, %v4253_v40 }
0x1e90   :  { %6723 = vmatmul.mubr.msk.f32.vlgmr.msra.gmra.mrb[34].mxu0 %vm101_vm0, %v7473_v16 }
0x1e91   :  { %v4252_v44 = vmul.f32 %v4251_v1, %v4246_v14 }
0x1e93   :  { %v8256_v25 = vadd.f32 %v4257_v43, %v4252_v44 }
0x1e95   :  { %6711 = vmatprep.mubr.msk.f32.mxu1 %vm101_vm0, %v8256_v25 }
0x1e96   :  { %6712 = vmatmul.mubr.msk.f32.vlgmr.msra.gmra.mrb[32].mxu1 %vm101_vm0, %v8258_v45 }
0x1f63   :  { %v6724_v46 = vpop.f32.mrb[34].mxu0 }
0x1f64   :  { %v4442_v7 = vadd.f32 %v6724_v46, %v4368_v47  ;;  %v4436_v17 = vpop.f32.mrb[35].mxu0 }
0x1f65   :  { %v4437_v48 = vadd.f32 %v4436_v17, %v4368_v47 }
0x1f67   :  { %v8264_v49 = vpack.i.bf16 %v4442_v7, %v4437_v48  ;;  %v7034_v50 = vpack.c.bf16 %v4442_v7, %v4437_v48 }
0x1f69   :  { %v6713_v52 = vpop.f32.mrb[32].mxu1  ;;  %7280 = vrot.lane.b32.xlu0 %v8264_v49, %s8580_s30  ;;  %7036 = vmatprep.subr.msk.bf16.mxu1 %vm7691_vm2, %v7034_v50 }
0x1f6a   :  { %v8270_v53 = vadd.f32 %v6713_v52, %v4268_v9  ;;  %v4341_v55 = vpop.f32.mrb[33].mxu1  ;;  %7039 = vmatpush3.bf16.xpose.msk.msra.mxu1 %vm7691_vm2, %v7034_v50 }
0x1f6b   :  { %v8274_v57 = vadd.f32 %v4341_v55, %v4268_v9 }
0x1f6d   :  { %4650 = vrot.lane.b32.xlu1 %v8274_v57, %s8580_s30  ;;  %6729 = vmatprep.mubr.msk.f32.mxu1 %vm193_vm1, %v8274_v57 }
0x1f6e   :  { %4652 = vrot.lane.b32.xlu0 %v8270_v53, %s8580_s30  ;;  %s8587_s30 = sld [smem:[#allocation7_spill]] }
0x1f71   :  { %7285 = vrot.lane.b32.xlu1 %v8264_v49, %s8573_s6  ;;  %6730 = vmatmul.mubr.msk.f32.vlgmr.msra.gmra.mrb[34].mxu1 %vm193_vm1, %v8270_v53 }
0x1f72   :  { %5016 = vrot.lane.b32.xlu0 %v8274_v57, %s8573_s6 }
0x1f74   :  { %v8305_v8 = vld [vmem:[%s8587_s30 + $0x8] sm:$0xff]  ;;  %v8311_v18 = vld [vmem:[%s8587_s30] sm:$0xff] }
0x1f75   :  { %5018 = vrot.lane.b32.xlu1 %v8270_v53, %s8573_s6 }
0x1fdb   :  { %v7281_v58 = vpop.permute.xlu0 %7280 }
0x1fdc   :  { %v7283_v59 = vunpack.i.h.bf16 %v7281_v58  ;;  %v7282_v60 = vunpack.i.l.bf16 %v7281_v58 }
0x1fde   :  { %v7044_v56 = vpack.c.bf16 %v7283_v59, %v7282_v60 }
0x1fdf   :  { %v4651_v61 = vpop.permute.xlu1 %4650 }
0x1fe0   :  { %7046 = vmatprep.subr.msk.bf16.mxu1 %vm7691_vm2, %v7044_v56  ;;  %6743 = vmatprep.mubr.msk.f32.mxu1 %vm193_vm1, %v4651_v61  ;;  %v4653_v15 = vpop.permute.xlu0 %4652 }
0x1fe1   :  { %7049 = vmatpush3.bf16.xpose.msk.msra.mxu1 %vm7691_vm2, %v7044_v56 }
0x1fe3   :  { %v7286_v62 = vpop.permute.xlu1 %7285 }
0x1fe4   :  { %v7288_v12 = vunpack.i.h.bf16 %v7286_v62  ;;  %v7287_v54 = vunpack.i.l.bf16 %v7286_v62  ;;  %v5017_v63 = vpop.permute.xlu0 %5016 }
0x1fe6   :  { %v7054_v6 = vpack.c.bf16 %v7288_v12, %v7287_v54 }
0x1fe7   :  { %v5019_v11 = vpop.permute.xlu1 %5018 }
0x1fe8   :  { %6744 = vmatmul.mubr.msk.f32.vlgmr.msra.gmra.mrb[36].mxu1 %vm193_vm1, %v4653_v15  ;;  %7056 = vmatprep.subr.msk.bf16.mxu1 %vm7691_vm2, %v7054_v6 }
0x1fe9   :  { %7059 = vmatpush3.bf16.xpose.msk.msra.mxu1 %vm7691_vm2, %v7054_v6  ;;  %6767 = vmatprep.mubr.msk.f32.mxu1 %vm193_vm1, %v5017_v63 }
0x1ff0   :  { %6768 = vmatmul.mubr.msk.f32.vlgmr.msra.gmra.mrb[38].mxu1 %vm193_vm1, %v5019_v11 }
0x2044   :  { %v6731_v0 = vpop.f32.mrb[34].mxu1 }
0x2045   :  { %v4538_v3 = vmul.f32 0.35355338, %v6731_v0  ;;  %v4528_v5 = vpop.f32.mrb[35].mxu1 }
0x2046   :  { %v4537_v4 = vmul.f32 0.35355338, %v4528_v5 }
0x2047   :  { %v4540_v10 = vadd.f32 %v8305_v8, %v4538_v3 }
0x2048   :  { %v4539_v19 = vadd.f32 %v8311_v18, %v4537_v4 }
0x2049   :  { %v4544_v22 = vsel %vm281_vm3, %v4540_v10, -inf }
0x204a   :  { %4545 = vmax.xlane.f32.xlu1 %v4544_v22  ;;  %v4541_v9 = vsel %vm281_vm3, %v4539_v19, -inf }
0x204b   :  { %4542 = vmax.xlane.f32.xlu0 %v4541_v9 }
0x20bb   :  { %v6745_v26 = vpop.f32.mrb[36].mxu1 }
0x20bc   :  { %v4732_v51 = vpop.f32.mrb[37].mxu1  ;;  %v4742_v28 = vmul.f32 0.35355338, %v6745_v26 }
0x20bd   :  { %v4741_v29 = vmul.f32 0.35355338, %v4732_v51 }
0x20be   :  { %v4744_v23 = vadd.f32 %v8305_v8, %v4742_v28 }
0x20bf   :  { %v4743_v30 = vadd.f32 %v8311_v18, %v4741_v29 }
0x20c0   :  { %v4748_v20 = vsel %vm281_vm3, %v4744_v23, -inf }
0x20c1   :  { %v4745_v31 = vsel %vm281_vm3, %v4743_v30, -inf }
0x20c2   :  { %4746 = vmax.xlane.f32.xlu0 %v4745_v31 }
0x20c3   :  { %v6769_v41 = vpop.f32.mrb[38].mxu1 }
0x20c4   :  { %v5098_v32 = vpop.f32.mrb[39].mxu1  ;;  %v5108_v52 = vmul.f32 0.35355338, %v6769_v41 }
0x20c5   :  { %v5107_v55 = vmul.f32 0.35355338, %v5098_v32 }
0x20c6   :  { %4749 = vmax.xlane.f32.xlu0 %v4748_v20  ;;  %v5110_v58 = vadd.f32 %v8305_v8, %v5108_v52 }
0x20c7   :  { %v5109_v59 = vadd.f32 %v8311_v18, %v5107_v55 }
0x20c9   :  { %v5111_v60 = vsel %vm281_vm3, %v5109_v59, -inf }
0x20d7   :  { %v4546_v2 = vpop.xlane.xlu1 %4545 }
0x20d8   :  { %v4548_v39 = vsub.f32 %v4540_v10, %v4546_v2  ;;  %v4543_v27 = vpop.xlane.xlu0 %4542 }
0x20d9   :  { %v4547_v24 = vsub.f32 %v4539_v19, %v4543_v27 }
0x20da   :  { %v4551_v33 = vmul.f32 1.442695, %v4548_v39 }
0x20db   :  { %v4549_v34 = vmul.f32 1.442695, %v4547_v24 }
0x20dc   :  { %7426 = vpow2.f32 %v4551_v33 }
0x20dd   :  { %7428 = vpow2.f32 %v4549_v34 }
0x20e6   :  { %v7427_v35 = vpop.eup %7426 }
0x20e7   :  { %v7429_v36 = vpop.eup %7428  ;;  %v4556_v37 = vsel %vm281_vm3, %v7427_v35, 0.0 }
0x20e8   :  { %4557 = vadd.xlane.f32.xlu0 %v4556_v37  ;;  %v4553_v1 = vsel %vm281_vm3, %v7429_v36, 0.0 }
0x20e9   :  { %4554 = vadd.xlane.f32.xlu1 %v4553_v1 }
0x214f   :  { %v4747_v38 = vpop.xlane.xlu0 %4746 }
0x2150   :  { %v4751_v14 = vsub.f32 %v4743_v30, %v4747_v38 }
0x2152   :  { %v4753_v16 = vmul.f32 1.442695, %v4751_v14 }
0x2153   :  { %v4750_v40 = vpop.xlane.xlu0 %4749 }
0x2154   :  { %7430 = vpow2.f32 %v4753_v16  ;;  %v4752_v42 = vsub.f32 %v4744_v23, %v4750_v40 }
0x2156   :  { %v4755_v43 = vmul.f32 1.442695, %v4752_v42 }
0x2158   :  { %7432 = vpow2.f32 %v4755_v43 }
0x215e   :  { %v7431_v44 = vpop.eup %7430 }
0x215f   :  { %v4757_v47 = vsel %vm281_vm3, %v7431_v44, 0.0 }
0x2160   :  { %4758 = vadd.xlane.f32.xlu1 %v4757_v47 }
0x2162   :  { %v7433_v46 = vpop.eup %7432 }
0x2163   :  { %v4760_v7 = vsel %vm281_vm3, %v7433_v46, 0.0 }
0x2164   :  { %4761 = vadd.xlane.f32.xlu0 %v4760_v7 }
0x2171   :  { %7290 = vrot.lane.b32.xlu1 %v8264_v49, %s8579_s21  ;;  %s8588_s21 = sld [smem:[#allocation13_spill]] }
0x2175   :  { %7300 = vrot.lane.b32.xlu1 %v8264_v49, %s8575_s5  ;;  %v4558_v56 = vpop.xlane.xlu0 %4557 }
0x2176   :  { %v4555_v17 = vpop.xlane.xlu1 %4554 }
0x2177   :  { %7434 = vrcp.f32 %v4555_v17  ;;  %v6097_v33 = vld [vmem:[%s8588_s21 + $0x28] sm:$0xff]  ;;  %v6096_v34 = vld [vmem:[%s8588_s21 + $0x20] sm:$0xff] }
0x2178   :  { %7436 = vrcp.f32 %v4558_v56 }
0x2179   :  { %5303 = vrot.lane.b32.xlu1 %v8274_v57, %s8575_s5  ;;  %v5114_v57 = vsel %vm281_vm3, %v5110_v58, -inf }
0x217a   :  { %7295 = vrot.lane.b32.xlu0 %v8264_v49, %s8576_s0 }
0x217e   :  { %5305 = vrot.lane.b32.xlu0 %v8270_v53, %s8575_s5 }
0x2181   :  { %v7435_v48 = vpop.eup %7434 }
0x2182   :  { %v4561_v50 = vmul.f32 %v7435_v48, %v7429_v36  ;;  %v7437_v6 = vpop.eup %7436 }
0x2183   :  { %v4562_v19 = vmul.f32 %v7437_v6, %v7427_v35 }
0x2184   :  { %6736 = vmatprep.mubr.msk.f32.mxu0 %vm281_vm3, %v4561_v50 }
0x219d   :  { %5112 = vmax.xlane.f32.xlu1 %v5111_v60  ;;  %5115 = vmax.xlane.f32.xlu0 %v5114_v57 }
0x21ed   :  { %v4759_v61 = vpop.xlane.xlu1 %4758 }
0x21ee   :  { %7438 = vrcp.f32 %v4759_v61 }
0x21f1   :  { %v7291_v53 = vpop.permute.xlu1 %7290  ;;  %v4762_v15 = vpop.xlane.xlu0 %4761 }
0x21f2   :  { %v7293_v62 = vunpack.i.h.bf16 %v7291_v53  ;;  %v7292_v12 = vunpack.i.l.bf16 %v7291_v53  ;;  %7440 = vrcp.f32 %v4762_v15 }
0x21f4   :  { %v7040_v54 = vpack.c.bf16 %v7293_v62, %v7292_v12 }
0x21f5   :  { %v7301_v63 = vpop.permute.xlu1 %7300  ;;  %v7296_v11 = vpop.permute.xlu0 %7295 }
0x21f6   :  { %v7303_v0 = vunpack.i.h.bf16 %v7301_v63  ;;  %v7302_v3 = vunpack.i.l.bf16 %v7301_v63  ;;  %v7298_v5 = vunpack.i.h.bf16 %v7296_v11  ;;  %v7297_v4 = vunpack.i.l.bf16 %v7296_v11  ;;  %7041 = vmatprep.subr.bf16.mxu0 %v7040_v54 }
0x21f7   :  { %7043 = vmatpush3.bf16.msra.mxu0 %v7040_v54 }
0x21f8   :  { %v7439_v10 = vpop.eup %7438  ;;  %v7064_v22 = vpack.c.bf16 %v7303_v0, %v7302_v3  ;;  %v7050_v9 = vpack.c.bf16 %v7298_v5, %v7297_v4 }
0x21f9   :  { %v5304_v26 = vpop.permute.xlu1 %5303  ;;  %v4765_v51 = vmul.f32 %v7439_v10, %v7431_v44  ;;  %v5306_v30 = vpop.permute.xlu0 %5305 }
0x21fa   :  { %6737 = vmatmul.mubr.msk.f32.vlgmr.msra.gmra.mrb[36].mxu0 %vm281_vm3, %v4562_v19  ;;  %7051 = vmatprep.subr.bf16.mxu0 %v7050_v9 }
0x21fb   :  { %7066 = vmatprep.subr.msk.bf16.mxu1 %vm7691_vm2, %v7064_v22  ;;  %6786 = vmatprep.mubr.msk.f32.mxu1 %vm193_vm1, %v5304_v26 }
0x21fc   :  { %v7441_v28 = vpop.eup %7440  ;;  %7053 = vmatpush3.bf16.msra.mxu0 %v7050_v9  ;;  %6750 = vmatprep.mubr.msk.f32.mxu0 %vm281_vm3, %v4765_v51 }
0x21fd   :  { %v4766_v29 = vmul.f32 %v7441_v28, %v7433_v46  ;;  %7069 = vmatpush3.bf16.xpose.msk.msra.mxu1 %vm7691_vm2, %v7064_v22  ;;  %6753 = vmatprep.subr.mxu0 %v6097_v33  ;;  %v6099_v22 = vld [vmem:[%s8588_s21 + $0x38] sm:$0xff] }
0x21ff   :  { %6751 = vmatmul.mubr.msk.f32.vlgmr.msra.gmra.mrb[38].mxu0 %vm281_vm3, %v4766_v29 }
0x2200   :  { %6754 = vmatpush3.msra.mxu0 %v6097_v33 }
0x2201   :  { %6758 = vmatprep.subr.mxu0 %v6096_v34 }
0x2204   :  { %6787 = vmatmul.mubr.msk.f32.vlgmr.msra.gmra.mrb[40].mxu1 %vm193_vm1, %v5306_v30  ;;  %v7477_v30 = vld [vmem:[%s8589_s27] sm:$0x3] }
0x222a   :  { %v5113_v23 = vpop.xlane.xlu1 %5112  ;;  %v5116_v31 = vpop.xlane.xlu0 %5115 }
0x222b   :  { %v5117_v41 = vsub.f32 %v5109_v59, %v5113_v23  ;;  %v5118_v32 = vsub.f32 %v5110_v58, %v5116_v31  ;;  %v5593_v23 = vrot.slane %v7477_v30, %v8081_v13 }
0x222d   :  { %v5119_v20 = vmul.f32 1.442695, %v5117_v41  ;;  %v5121_v2 = vmul.f32 1.442695, %v5118_v32 }
0x222f   :  { %7442 = vpow2.f32 %v5119_v20 }
0x2230   :  { %7444 = vpow2.f32 %v5121_v2 }
0x2239   :  { %v7443_v39 = vpop.eup %7442 }
0x223a   :  { %v7445_v27 = vpop.eup %7444  ;;  %v5123_v24 = vsel %vm281_vm3, %v7443_v39, 0.0 }
0x223b   :  { %5124 = vadd.xlane.f32.xlu0 %v5123_v24  ;;  %v5126_v21 = vsel %vm281_vm3, %v7445_v27, 0.0 }
0x223c   :  { %5127 = vadd.xlane.f32.xlu1 %v5126_v21 }
0x2251   :  { %7305 = vrot.lane.b32.xlu0 %v8264_v49, %s8577_s7  ;;  %s8591_s7 = sld [smem:[#allocation18_spill]] }
0x22c8   :  { %v5125_v35 = vpop.xlane.xlu0 %5124 }
0x22c9   :  { %v5128_v38 = vpop.xlane.xlu1 %5127  ;;  %7446 = vrcp.f32 %v5125_v35 }
0x22ca   :  { %7448 = vrcp.f32 %v5128_v38 }
0x22cc   :  { %v7306_v37 = vpop.permute.xlu0 %7305 }
0x22cd   :  { %v6738_v36 = vpop.f32.mrb[36].mxu0  ;;  %v7308_v14 = vunpack.i.h.bf16 %v7306_v37  ;;  %v7307_v16 = vunpack.i.l.bf16 %v7306_v37 }
0x22ce   :  { %v4641_v1 = vpop.f32.mrb[37].mxu0 }
0x22cf   :  { %v7060_v43 = vpack.c.bf16 %v7308_v14, %v7307_v16  ;;  %v6133_v16 = vld [vmem:[%s8502_s11 + $0x28] sm:$0xff] }
0x22d2   :  { %v6752_v40 = vpop.f32.mrb[38].mxu0 }
0x22d3   :  { %v4845_v42 = vpop.f32.mrb[39].mxu0  ;;  %v7447_v17 = vpop.eup %7446 }
0x22d4   :  { %6755 = vmatprep.mubr.msk.f32.mxu0 %vm193_vm1, %v4845_v42  ;;  %v7449_v50 = vpop.eup %7448  ;;  %v5131_v58 = vmul.f32 %v7447_v17, %v7443_v39  ;;  %v6134_v42 = vld [vmem:[%s8502_s11 + $0x30] sm:$0xff] }
0x22d5   :  { %6756 = vmatmul.mubr.msk.f32.vlgmr.msra.gmra.mrb[40].mxu0 %vm193_vm1, %v6752_v40  ;;  %v5132_v59 = vmul.f32 %v7449_v50, %v7445_v27 }
0x22d6   :  { %6759 = vmatpush3.msra.mxu0 %v6096_v34  ;;  %6760 = vmatprep.mubr.msk.f32.mxu0 %vm193_vm1, %v4641_v1 }
0x22d7   :  { %v6788_v44 = vpop.f32.mrb[40].mxu1  ;;  %7061 = vmatprep.subr.bf16.mxu0 %v7060_v43 }
0x22d8   :  { %v5385_v47 = vpop.f32.mrb[41].mxu1  ;;  %v5395_v46 = vmul.f32 0.35355338, %v6788_v44 }
0x22d9   :  { %v5394_v7 = vmul.f32 0.35355338, %v5385_v47  ;;  %v6138_v47 = vld [vmem:[%s8504_s13 + $0x40] sm:$0xff] }
0x22da   :  { %v5397_v52 = vadd.f32 %v8305_v8, %v5395_v46  ;;  %v6139_v46 = vld [vmem:[%s8504_s13 + $0x48] sm:$0xff] }
0x22db   :  { %v5396_v48 = vadd.f32 %v8311_v18, %v5394_v7  ;;  %v6098_v18 = vld [vmem:[%s8588_s21 + $0x30] sm:$0xff]  ;;  %v7082_v17 = vpack.c.bf16 %v6139_v46, %v6138_v47 }
0x22dc   :  { %v5401_v60 = vsel %vm281_vm3, %v5397_v52, -inf  ;;  %v6140_v7 = vld [vmem:[%s8504_s13 + $0x50] sm:$0xff] }
0x22dd   :  { %v5398_v55 = vsel %vm281_vm3, %v5396_v48, -inf  ;;  %6761 = vmatmul.mubr.msk.f32.vlgmr.msra.gmra.mrb[40].mxu0 %vm193_vm1, %v6738_v36 }
0x22de   :  { %5399 = vmax.xlane.f32.xlu1 %v5398_v55  ;;  %7063 = vmatpush3.bf16.msra.mxu0 %v7060_v43  ;;  %v6135_v43 = vld [vmem:[%s8502_s11 + $0x38] sm:$0xff]  ;;  %v6143_v55 = vld [vmem:[%s8504_s13 + $0x68] sm:$0xff] }
0x22df   :  { %6774 = vmatprep.mubr.msk.f32.mxu0 %vm281_vm3, %v5131_v58  ;;  %6777 = vmatprep.subr.mxu0 %v6098_v18  ;;  %v7078_v44 = vpack.c.bf16 %v6135_v43, %v6134_v42  ;;  %v5864_v43 = vld [vmem:[%s8590_s2 + $0x10] sm:$0xff] }
0x22e1   :  { %6775 = vmatmul.mubr.msk.f32.vlgmr.msra.gmra.mrb[42].mxu0 %vm281_vm3, %v5132_v59 }
0x22e2   :  { %5402 = vmax.xlane.f32.xlu1 %v5401_v60  ;;  %6778 = vmatpush3.msra.mxu0 %v6098_v18 }
0x236b   :  { %v5400_v8 = vpop.xlane.xlu1 %5399 }
0x236c   :  { %v5404_v57 = vsub.f32 %v5396_v48, %v5400_v8  ;;  %v6141_v48 = vld [vmem:[%s8504_s13 + $0x58] sm:$0xff] }
0x236d   :  { %v7086_v50 = vpack.c.bf16 %v6141_v48, %v6140_v7 }
0x236e   :  { %v5406_v53 = vmul.f32 1.442695, %v5404_v57 }
0x236f   :  { %v5403_v56 = vpop.xlane.xlu1 %5402 }
0x2370   :  { %v5405_v61 = vsub.f32 %v5397_v52, %v5403_v56  ;;  %v6142_v52 = vld [vmem:[%s8504_s13 + $0x60] sm:$0xff] }
0x2371   :  { %v7090_v58 = vpack.c.bf16 %v6143_v55, %v6142_v52  ;;  %v7482_v55 = vld [vmem:[%s8510_s19] sm:$0x3] }
0x2372   :  { %v5408_v15 = vmul.f32 1.442695, %v5405_v61  ;;  %v7478_v61 = vld [vmem:[%s8508_s17] sm:$0x3] }
0x2374   :  { %7450 = vpow2.f32 %v5408_v15 }
0x2375   :  { %7452 = vpow2.f32 %v5406_v53  ;;  %v5627_v53 = vrot.slane %v7478_v61, %v8081_v13 }
0x237e   :  { %v7451_v62 = vpop.eup %7450 }
0x237f   :  { %v5413_v12 = vsel %vm281_vm3, %v7451_v62, 0.0  ;;  %v7453_v54 = vpop.eup %7452 }
0x2380   :  { %5414 = vadd.xlane.f32.xlu1 %v5413_v12  ;;  %v5410_v6 = vsel %vm281_vm3, %v7453_v54, 0.0  ;;  %v7479_v12 = vld [vmem:[%s8509_s18] sm:$0x3] }
0x2384   :  { %5411 = vadd.xlane.f32.xlu1 %v5410_v6 }
0x2395   :  { %7310 = vrot.lane.b32.xlu1 %v8264_v49, %s8578_s29 }
0x23b4   :  { %v6776_v63 = vpop.f32.mrb[42].mxu0 }
0x23b5   :  { %v5211_v11 = vpop.f32.mrb[43].mxu0 }
0x23b6   :  { %6779 = vmatprep.mubr.msk.f32.mxu0 %vm193_vm1, %v5211_v11 }
0x23b7   :  { %6780 = vmatmul.mubr.msk.f32.vlgmr.msra.gmra.mrb[40].mxu0 %vm193_vm1, %v6776_v63 }
0x240d   :  { %v5415_v0 = vpop.xlane.xlu1 %5414 }
0x240e   :  { %7454 = vrcp.f32 %v5415_v0 }
0x2411   :  { %v5412_v3 = vpop.xlane.xlu1 %5411 }
0x2412   :  { %7456 = vrcp.f32 %v5412_v3 }
0x2415   :  { %v7311_v5 = vpop.permute.xlu1 %7310 }
0x2416   :  { %v7313_v4 = vunpack.i.h.bf16 %v7311_v5  ;;  %v7312_v10 = vunpack.i.l.bf16 %v7311_v5 }
0x2418   :  { %v7070_v19 = vpack.c.bf16 %v7313_v4, %v7312_v10  ;;  %v7455_v49 = vpop.eup %7454  ;;  %v6144_v4 = vld [vmem:[%s8504_s13 + $0x70] sm:$0xff]  ;;  %v6145_v10 = vld [vmem:[%s8504_s13 + $0x78] sm:$0xff] }
0x2419   :  { %v5419_v51 = vmul.f32 %v7455_v49, %v7451_v62 }
0x241a   :  { %7071 = vmatprep.subr.bf16.mxu0 %v7070_v19 }
0x241b   :  { %7073 = vmatpush3.bf16.msra.mxu0 %v7070_v19  ;;  %v7094_v19 = vpack.c.bf16 %v6145_v10, %v6144_v4 }
0x241c   :  { %v7457_v9 = vpop.eup %7456  ;;  %6796 = vmatprep.subr.mxu0 %v6099_v22 }
0x241d   :  { %v5418_v26 = vmul.f32 %v7457_v9, %v7453_v54  ;;  %v5633_v54 = vrot.slane %v7479_v12, %v8081_v13  ;;  %v6148_v12 = vld [vmem:[%s8591_s7] ss:$0 sm:$0xff] }
0x241f   :  { %6793 = vmatprep.mubr.msk.f32.mxu0 %vm281_vm3, %v5418_v26 }
0x2420   :  { %6794 = vmatmul.mubr.msk.f32.vlgmr.msra.gmra.mrb[44].mxu0 %vm281_vm3, %v5419_v51 }
0x2421   :  { %6797 = vmatpush3.msra.mxu0 %v6099_v22  ;;  %v7480_v22 = vld [vmem:[%s8503_s12] sm:$0x3] }
0x2422   :  { %7083 = vmatprep.subr.bf16.mxu0 %v7082_v17  ;;  %v5644_v49 = vrot.slane %v7480_v22, %v8081_v13 }
0x24f3   :  { %v6795_v28 = vpop.f32.mrb[44].mxu0 }
0x24f4   :  { %v5498_v29 = vpop.f32.mrb[45].mxu0 }
0x24f5   :  { %6798 = vmatprep.mubr.msk.f32.mxu0 %vm193_vm1, %v5498_v29 }
0x24f6   :  { %6799 = vmatmul.mubr.msk.f32.vlgmr.msra.gmra.mrb[40].mxu0 %vm193_vm1, %v6795_v28 }
0x24f7   :  { %7085 = vmatpush3.bf16.msra.mxu0 %v7082_v17 }
0x24f8   :  { %7087 = vmatprep.subr.bf16.mxu0 %v7086_v50 }
0x24fb   :  { %7089 = vmatpush3.bf16.msra.mxu0 %v7086_v50 }
0x24fc   :  { %7091 = vmatprep.subr.bf16.mxu0 %v7090_v58 }
0x24ff   :  { %7093 = vmatpush3.bf16.msra.mxu0 %v7090_v58  ;;  %v5853_v58 = vrot.slane %v7482_v55, %v8081_v13 }
0x2500   :  { %7095 = vmatprep.subr.bf16.mxu0 %v7094_v19 }
0x2503   :  { %7097 = vmatpush3.bf16.msra.mxu0 %v7094_v19 }
0x25c9   :  { %v6800_v31 = vpop.f32.mrb[40].mxu0 }
0x25ca   :  { %v5595_v41 = vadd.f32 %v6800_v31, %v5593_v23  ;;  %v5579_v32 = vpop.f32.mrb[41].mxu0 }
0x25cb   :  { %v5594_v20 = vadd.f32 %v5593_v23, %v5579_v32  ;;  %v7481_v23 = vld [vmem:[%s8505_s14] sm:$0x3] }
0x25cc   :  { %v5597_v2 = vadd.f32 %v5595_v41, %v8258_v45  ;;  %v5740_v31 = vrot.slane %v7481_v23, %v8081_v13 }
0x25cd   :  { %v5596_v39 = vadd.f32 %v5594_v20, %v8256_v25  ;;  %v6132_v25 = vld [vmem:[%s8502_s11 + $0x20] sm:$0xff] }
0x25ce   :  { %v5601_v27 = vsel %vm101_vm0, %v5597_v2, 0.0  ;;  %v7074_v40 = vpack.c.bf16 %v6133_v16, %v6132_v25  ;;  %v5862_v16 = vld [vmem:[%s8590_s2] sm:$0xff] }
0x25cf   :  { %5602 = vadd.xlane.f32.xlu1 %v5601_v27  ;;  %v5598_v24 = vsel %vm101_vm0, %v5596_v39, 0.0 }
0x25d0   :  { %5599 = vadd.xlane.f32.xlu0 %v5598_v24  ;;  %7075 = vmatprep.subr.bf16.mxu1 %v7074_v40 }
0x25d1   :  { %7077 = vmatpush3.bf16.msra.mxu1 %v7074_v40  ;;  %v5863_v40 = vld [vmem:[%s8590_s2 + $0x8] sm:$0xff] }
0x25d2   :  { %7079 = vmatprep.subr.bf16.mxu1 %v7078_v44  ;;  %v7098_v42 = vpack.c.bf16 %v5863_v40, %v5862_v16 }
0x25d5   :  { %7081 = vmatpush3.bf16.msra.mxu1 %v7078_v44  ;;  %v5865_v44 = vld [vmem:[%s8590_s2 + $0x18] sm:$0xff] }
0x25d6   :  { %7099 = vmatprep.subr.bf16.mxu1 %v7098_v42  ;;  %v7102_v47 = vpack.c.bf16 %v5865_v44, %v5864_v43 }
0x265c   :  { %v5603_v21 = vpop.xlane.xlu1 %5602 }
0x265d   :  { %v5605_v33 = vmul.f32 0.03125, %v5603_v21  ;;  %v5600_v34 = vpop.xlane.xlu0 %5599 }
0x265e   :  { %v5604_v35 = vmul.f32 0.03125, %v5600_v34 }
0x265f   :  { %v5607_v36 = vsub.f32 %v5597_v2, %v5605_v33 }
0x2660   :  { %v5606_v37 = vsub.f32 %v5596_v39, %v5604_v35 }
0x2661   :  { %v5609_v14 = vmul.f32 %v5607_v36, %v5607_v36 }
0x2662   :  { %v5608_v1 = vmul.f32 %v5606_v37, %v5606_v37 }
0x2663   :  { %v5613_v45 = vsel %vm101_vm0, %v5609_v14, 0.0 }
0x2664   :  { %v5610_v38 = vsel %vm101_vm0, %v5608_v1, 0.0 }
0x2665   :  { %5611 = vadd.xlane.f32.xlu0 %v5610_v38 }
0x2669   :  { %5614 = vadd.xlane.f32.xlu0 %v5613_v45 }
0x26f2   :  { %v5612_v59 = vpop.xlane.xlu0 %5611 }
0x26f3   :  { %v5616_v60 = vmul.f32 0.03125, %v5612_v59 }
0x26f5   :  { %v5618_v18 = vadd.f32 1e-05, %v5616_v60 }
0x26f6   :  { %v5615_v8 = vpop.xlane.xlu0 %5614 }
0x26f7   :  { %7458 = vrsqrt.f32 %v5618_v18  ;;  %v5617_v57 = vmul.f32 0.03125, %v5615_v8  ;;  %v7483_v18 = vld [vmem:[%s8511_s20] sm:$0x3]  ;;  %s7484_s20 = scalar_lea.vmem %s5962_s26, 256 }
0x26f8   :  { %v5859_v8 = vrot.slane %v7483_v18, %v8081_v13  ;;  %p7485_p0 = scmp.ne.s32.totalorder %s5962_s26, %s7484_s20  ;;  %p7490_p2 = scmp.lt.s32.totalorder %s7484_s20, %s7484_s20 }
0x26f9   :  { %v5619_v56 = vadd.f32 1e-05, %v5617_v57 }
0x26fa   :  { %p7491_p3 = por %p7490_p2, %p7489_p1 }
0x26fb   :  { %7460 = vrsqrt.f32 %v5619_v56 }
0x26fc   :  { %p7492_p4 = pnand %p7491_p3, %p7485_p0 }
0x2701   :  { %v7459_v15 = vpop.eup %7458 }
0x2702   :  { %v5622_v62 = vmul.f32 %v7459_v15, %v5606_v37 }
0x2704   :  { %v5628_v6 = vmul.f32 %v5627_v53, %v5622_v62 }
0x2705   :  { %v7461_v63 = vpop.eup %7460 }
0x2706   :  { %v5623_v11 = vmul.f32 %v7461_v63, %v5607_v36  ;;  %v5634_v0 = vadd.f32 %v5633_v54, %v5628_v6 }
0x2708   :  { %v5629_v3 = vmul.f32 %v5627_v53, %v5623_v11  ;;  %6809 = vmatprep.mubr.msk.f32.mxu1 %vm101_vm0, %v5634_v0 }
0x270a   :  { %v5635_v5 = vadd.f32 %v5633_v54, %v5629_v3 }
0x270c   :  { %6810 = vmatmul.mubr.msk.f32.vlgmr.msra.gmra.mrb[42].mxu1 %vm101_vm0, %v5635_v5 }
0x270d   :  { %7101 = vmatpush3.bf16.msra.mxu1 %v7098_v42 }
0x270e   :  { %7103 = vmatprep.subr.bf16.mxu1 %v7102_v47 }
0x2711   :  { %7105 = vmatpush3.bf16.msra.mxu1 %v7102_v47 }
0x27df   :  { %v6811_v9 = vpop.f32.mrb[42].mxu1 }
0x27e0   :  { %v5723_v26 = vadd.f32 %v6811_v9, %v5644_v49  ;;  %v5717_v51 = vpop.f32.mrb[43].mxu1 }
0x27e1   :  { %v5718_v28 = vadd.f32 %v5717_v51, %v5644_v49 }
0x27e2   :  { %v5727_v30 = vmax.f32 %v5723_v26, 0.0 }
0x27e3   :  { %v5726_v29 = vmax.f32 %v5718_v28, 0.0 }
0x27e5   :  { %6828 = vmatprep.mubr.msk.f32.mxu0 %vm2855_vm4, %v5726_v29 }
0x27e6   :  { %6829 = vmatmul.mubr.msk.f32.vlgmr.msra.gmra.mrb[46].mxu0 %vm2855_vm4, %v5727_v30 }
0x28b9   :  { %v6830_v41 = vpop.f32.mrb[46].mxu0 }
0x28ba   :  { %v5813_v32 = vpop.f32.mrb[47].mxu0  ;;  %v5819_v20 = vadd.f32 %v6830_v41, %v5740_v31 }
0x28bb   :  { %v5814_v2 = vadd.f32 %v5813_v32, %v5740_v31 }
0x28bc   :  { %v5823_v27 = vadd.f32 %v5819_v20, %v5635_v5 }
0x28bd   :  { %v5822_v39 = vadd.f32 %v5814_v2, %v5634_v0 }
0x28be   :  { %v5827_v21 = vsel %vm101_vm0, %v5823_v27, 0.0 }
0x28bf   :  { %v5824_v24 = vsel %vm101_vm0, %v5822_v39, 0.0 }
0x28c0   :  { %5825 = vadd.xlane.f32.xlu0 %v5824_v24 }
0x28c4   :  { %5828 = vadd.xlane.f32.xlu0 %v5827_v21 }
0x294d   :  { %v5826_v33 = vpop.xlane.xlu0 %5825 }
0x294e   :  { %v5830_v34 = vmul.f32 0.03125, %v5826_v33 }
0x2950   :  { %v5832_v35 = vsub.f32 %v5822_v39, %v5830_v34 }
0x2951   :  { %v5829_v36 = vpop.xlane.xlu0 %5828 }
0x2952   :  { %v5831_v37 = vmul.f32 0.03125, %v5829_v36  ;;  %v5834_v1 = vmul.f32 %v5832_v35, %v5832_v35 }
0x2954   :  { %v5833_v38 = vsub.f32 %v5823_v27, %v5831_v37  ;;  %v5836_v14 = vsel %vm101_vm0, %v5834_v1, 0.0 }
0x2955   :  { %5837 = vadd.xlane.f32.xlu0 %v5836_v14 }
0x2956   :  { %v5835_v45 = vmul.f32 %v5833_v38, %v5833_v38 }
0x2958   :  { %v5839_v25 = vsel %vm101_vm0, %v5835_v45, 0.0 }
0x2959   :  { %5840 = vadd.xlane.f32.xlu1 %v5839_v25 }
0x29e2   :  { %v5838_v46 = vpop.xlane.xlu0 %5837 }
0x29e3   :  { %v5842_v7 = vmul.f32 0.03125, %v5838_v46 }
0x29e5   :  { %v5844_v17 = vadd.f32 1e-05, %v5842_v7 }
0x29e6   :  { %v5841_v48 = vpop.xlane.xlu1 %5840 }
0x29e7   :  { %7462 = vrsqrt.f32 %v5844_v17  ;;  %v5843_v50 = vmul.f32 0.03125, %v5841_v48 }
0x29e9   :  { %v5845_v52 = vadd.f32 1e-05, %v5843_v50 }
0x29eb   :  { %7464 = vrsqrt.f32 %v5845_v52 }
0x29f1   :  { %v7463_v59 = vpop.eup %7462 }
0x29f2   :  { %v5848_v60 = vmul.f32 %v7463_v59, %v5832_v35 }
0x29f4   :  { %v5854_v57 = vmul.f32 %v5853_v58, %v5848_v60 }
0x29f5   :  { %v7465_v56 = vpop.eup %7464 }
0x29f6   :  { %v5849_v61 = vmul.f32 %v7465_v56, %v5833_v38  ;;  %v5860_v53 = vadd.f32 %v5859_v8, %v5854_v57 }
0x29f8   :  { %v5855_v15 = vmul.f32 %v5853_v58, %v5849_v61  ;;  %6839 = vmatprep.mubr.msk.f32.mxu1 %vm101_vm0, %v5860_v53 }
0x29fa   :  { %v5861_v62 = vadd.f32 %v5859_v8, %v5855_v15 }
0x29fc   :  { %6840 = vmatmul.mubr.msk.f32.vlgmr.msra.gmra.mrb[44].mxu1 %vm101_vm0, %v5861_v62 }
0x2acf   :  { %v6841_v54 = vpop.f32.mrb[44].mxu1 }
0x2ad0   :  { %v5951_v6 = vadd.f32 %v6841_v54, %v6148_v12  ;;  %v5945_v63 = vpop.f32.mrb[45].mxu1 }
0x2ad1   :  { %v5946_v13 = vadd.f32 %v6148_v12, %v5945_v63 }
0x2ad2   :  { %5955 = vst [vmem:[#allocation2 + $0x8] sm:$0xff] %v5951_v6 }
0x2ad3   :  { %5954 = vst [vmem:[#allocation2] sm:$0xff] %v5946_v13 }
0x2ad4   :  { %7495 = shalt.err (!%p7492_p4)
}
0x2ad5   :  { %s8592_s8 = sld [smem:[#allocation19_spill]] }
0x2adb   :  { %s7496_s27 = scalar_lea.hbm %s8592_s8, 256 }
0x2adc   :  { %p7497_p5 = scmp.ne.s32.totalorder %s8592_s8, %s7496_s27  ;;  %p7500_p6 = scmp.lt.u32.totalorder %s7496_s27, %s8592_s8 }
0x2ade   :  { %p7502_p7 = pnand %p7500_p6, %p7497_p5 }
0x2ae0   :  { %7505 = shalt.err (!%p7502_p7)
}
0x2ae1   :  { %s7520_s18 = smov 128   ;;  %s7521_s3 = smov 8  }
0x2ae2   :  { %5967 = dma.vmem_to_hbm [thread:$0]  %s5962_s26, 256, %s8592_s8, [#allocation3], %s7520_s18, %s7520_s18, %s7521_s3  }
0x2ae3   :  { %7506 = dma.done.wait [#allocation3], 256  }
0x2ae4   :  { %7507 = vsyncadd [#allocation3], 4294967040 }
0x2ae5   :  { %5971 = vsyncpa [#allocation3], 1 }

</bundles_post_ra>
